<compile_context>
chip_gen: v7x
topology: tpu7x:2x2x1
jax: 0.10.0
libtpu: 0.0.40
codegen_flags: <defaults>
</compile_context>

<pallas_src>
import math
import functools
import numpy as np

import jax
import jax.numpy as jnp
from jax.experimental import pallas as pl
from jax.experimental.pallas import tpu as pltpu

F32 = jnp.float32
BF16 = jnp.bfloat16
LN_EPS = 1e-5


# ----------------------------- in-kernel helpers -----------------------------

def _mm(a, b):
    # bf16 MXU operands, f32 accumulation (deliberate; see header comment).
    return jnp.dot(a.astype(BF16), b.astype(BF16), preferred_element_type=F32)


def _gelu(x):
    # PyTorch nn.GELU default (erf form), f32 math.
    return 0.5 * x * (1.0 + jax.lax.erf(x * 0.7071067811865476))


def _layernorm(x, g, b):
    mu = jnp.mean(x, axis=-1, keepdims=True)
    var = jnp.mean((x - mu) ** 2, axis=-1, keepdims=True)
    return (x - mu) * jax.lax.rsqrt(var + LN_EPS) * g + b


# ----------------------------- Pallas kernels -----------------------------

def _embed_kernel(feats_ref, cop_ref, pw_ref, pvec_ref,
                  pos1_ref, pos2_ref, dpos1_ref, dpos2_ref,
                  tok_ref, pos_ref, dpos_ref):
    # Fused: patch Linear+LayerNorm, encoder pos-MLP, decoder pos-MLP (one batch elem).
    x = feats_ref[0].astype(F32)                                     # (P, C*PS)
    pvec = pvec_ref[...]                                             # (3, E): [bias; ln_g; ln_b]
    t = _mm(x, pw_ref[...]) + pvec[0:1, :]
    tok_ref[0] = _layernorm(t, pvec[1:2, :], pvec[2:3, :]).astype(tok_ref.dtype)

    c = cop_ref[0].astype(F32)                                       # (P, 3)

    def pos_mlp(w1b, w2b):
        # first Linear has contraction dim 3 -> VPU broadcast-MAC instead of a skinny matmul
        h = (c[:, 0:1] * w1b[0:1, :] + c[:, 1:2] * w1b[1:2, :]
             + c[:, 2:3] * w1b[2:3, :] + w1b[3:4, :])
        h = _gelu(h)
        return _mm(h, w2b[0:128, :]) + w2b[128:129, :]

    pos_ref[0] = pos_mlp(pos1_ref[...], pos2_ref[...]).astype(pos_ref.dtype)
    dpos_ref[0] = pos_mlp(dpos1_ref[...], dpos2_ref[...]).astype(dpos_ref.dtype)


def _stack_kernel(x_ref, slab_ref, tgb_ref, tw_ref, tb_ref, o_ref, tok,
                  *, num_heads, tail_rows):
    # One grid step = one transformer Block of one batch element.  grid=(B, depth).
    # Tokens live in the VMEM scratch `tok` across the depth axis; the tail
    # (final LayerNorm + Linear head(s)) runs fused at the last layer.
    l = pl.program_id(1)
    depth = pl.num_programs(1)
    S, E = tok.shape
    dh = E // num_heads
    scale = dh ** -0.5

    @pl.when(l == 0)
    def _():
        tok[...] = x_ref[0].astype(F32)

    x = tok[...]

    # Per-layer packed params (rows are 8-aligned; finer splits done on values).
    wa = slab_ref[0, 0:E, :]                     # (E, 4E) = [qkv_w | proj_w]
    fc1_w = slab_ref[0, E:2 * E, :]              # (E, 4E)
    fc2_wT = slab_ref[0, 2 * E:3 * E, :]         # (E, 4E) == fc2_w.T
    vecs = slab_ref[0, 3 * E:3 * E + 8, :]       # (8, 4E)
    qkv_w = wa[:, 0:3 * E]
    proj_w = wa[:, 3 * E:]
    ln1_g, ln1_b = vecs[0:1, 0:E], vecs[1:2, 0:E]
    qkv_b = vecs[2:3, 0:3 * E]
    fc1_b = vecs[3:4, :]
    proj_b = vecs[4:5, 0:E]
    ln2_g, ln2_b = vecs[5:6, 0:E], vecs[6:7, 0:E]
    fc2_b = vecs[7:8, 0:E]

    # --- attention ---
    y = _layernorm(x, ln1_g, ln1_b)
    qkv = _mm(y, qkv_w) + qkv_b                  # (S, 3E)
    attn = jnp.zeros((S, E), F32)
    for h in range(num_heads):                   # static unroll; XLU slack covers the slices
        q = qkv[:, h * dh:(h + 1) * dh]
        k = qkv[:, E + h * dh:E + (h + 1) * dh]
        v = qkv[:, 2 * E + h * dh:2 * E + (h + 1) * dh]
        s = jnp.einsum('qd,kd->qk', q.astype(BF16), k.astype(BF16),
                       preferred_element_type=F32) * scale
        m = jnp.max(s, axis=-1, keepdims=True)
        e = jnp.exp(s - m)
        p = e / jnp.sum(e, axis=-1, keepdims=True)
        attn = attn + _mm(_mm(p, v), proj_w[h * dh:(h + 1) * dh, :])
    x = x + attn + proj_b

    # --- MLP ---
    y2 = _layernorm(x, ln2_g, ln2_b)
    h1 = _gelu(_mm(y2, fc1_w) + fc1_b)
    h2 = jnp.einsum('sk,ek->se', h1.astype(BF16), fc2_wT.astype(BF16),
                    preferred_element_type=F32) + fc2_b
    xo = x + h2
    tok[...] = xo

    @pl.when(l == depth - 1)
    def _():
        tgb = tgb_ref[...]                                            # (2, dim)
        r = _layernorm(xo[:tail_rows], tgb[0:1, :], tgb[1:2, :])
        o_ref[0] = (_mm(r, tw_ref[...]) + tb_ref[...]).astype(o_ref.dtype)


def _loss_kernel(pv_ref, c_ref, yt_ref, pf_ref, mf_ref, o_ref):
    # Per-n partial sums for Chamfer-L1 + MSE.  Contraction dim of the pairwise
    # distance is 3 -> pure VPU broadcast-subtract-square-sum (no MXU).
    x = pv_ref[0].astype(F32) + c_ref[0].astype(F32)                  # (45, 3) + (1, 3)
    y = yt_ref[0].astype(F32)                                         # (3, K)
    d2 = ((x[:, 0:1] - y[0:1, :]) ** 2
          + (x[:, 1:2] - y[1:2, :]) ** 2
          + (x[:, 2:3] - y[2:3, :]) ** 2)                             # (45, K)
    s_xy = jnp.sum(jnp.sqrt(jnp.min(d2, axis=1, keepdims=True)), axis=0, keepdims=True)
    s_yx = jnp.sum(jnp.sqrt(jnp.min(d2, axis=0, keepdims=True)), axis=1, keepdims=True)
    diff = pf_ref[0].astype(F32) - mf_ref[0].astype(F32)              # (1, C*PS)
    sq = jnp.sum(diff * diff, axis=1, keepdims=True)
    o_ref[0, :, 0:1] = s_xy
    o_ref[0, :, 1:2] = s_yx
    o_ref[0, :, 2:3] = sq


# ----------------------------- kernel wrappers -----------------------------

def _embed(feats_r, cop, p):
    B, P, _ = feats_r.shape
    E = p['patch_w'].shape[1]
    D = p['dpos2'].shape[1]
    consts = (p['patch_w'], p['patch_vec'], p['pos1'], p['pos2'], p['dpos1'], p['dpos2'])

    def bspec(shape):
        return pl.BlockSpec((1,) + tuple(shape[1:]), lambda b: (b, 0, 0))

    def cspec(a):
        nd = a.ndim
        return pl.BlockSpec(a.shape, lambda b: (0,) * nd)

    return pl.pallas_call(
        _embed_kernel,
        out_shape=(jax.ShapeDtypeStruct((B, P, E), F32),
                   jax.ShapeDtypeStruct((B, P, E), F32),
                   jax.ShapeDtypeStruct((B, P, D), F32)),
        grid=(B,),
        in_specs=[bspec(feats_r.shape), bspec(cop.shape)] + [cspec(a) for a in consts],
        out_specs=(bspec((B, P, E)), bspec((B, P, E)), bspec((B, P, D))),
        compiler_params=pltpu.CompilerParams(dimension_semantics=("parallel",)),
    )(feats_r, cop, *consts)


def _run_stack(x, slab, tail_gb, tail_w, tail_b, *, num_heads, tail_rows):
    # Whole transformer stack (+ fused tail) in one pallas_call.  grid=(B, depth):
    # batch parallel (v7x megacore), depth sequential with a resident VMEM scratch.
    B, S, E = x.shape
    depth = slab.shape[0]
    n_out = tail_w.shape[1]
    kern = functools.partial(_stack_kernel, num_heads=num_heads, tail_rows=tail_rows)
    return pl.pallas_call(
        kern,
        out_shape=jax.ShapeDtypeStruct((B, tail_rows, n_out), F32),
        grid=(B, depth),
        in_specs=[
            pl.BlockSpec((1, S, E), lambda b, l: (b, 0, 0)),
            pl.BlockSpec((1,) + tuple(slab.shape[1:]), lambda b, l: (l, 0, 0)),
            pl.BlockSpec(tail_gb.shape, lambda b, l: (0, 0)),
            pl.BlockSpec(tail_w.shape, lambda b, l: (0, 0)),
            pl.BlockSpec(tail_b.shape, lambda b, l: (0, 0)),
        ],
        out_specs=pl.BlockSpec((1, tail_rows, n_out), lambda b, l: (b, 0, 0)),
        scratch_shapes=[pltpu.VMEM((S, E), F32)],
        compiler_params=pltpu.CompilerParams(
            dimension_semantics=("parallel", "arbitrary")),
    )(x, slab, tail_gb, tail_w, tail_b)


def _loss_partials(pred_v, center, cord_t, pred_f, masked_f):
    N = pred_v.shape[0]

    def bspec(shape):
        return pl.BlockSpec((1,) + tuple(shape[1:]), lambda n: (n, 0, 0))

    return pl.pallas_call(
        _loss_kernel,
        out_shape=jax.ShapeDtypeStruct((N, 1, 3), F32),
        grid=(N,),
        in_specs=[bspec(pred_v.shape), bspec(center.shape), bspec(cord_t.shape),
                  bspec(pred_f.shape), bspec(masked_f.shape)],
        out_specs=bspec((N, 1, 3)),
        compiler_params=pltpu.CompilerParams(dimension_semantics=("parallel",)),
    )(pred_v, center, cord_t, pred_f, masked_f)


# ----------------------------- model forward -----------------------------

@functools.partial(jax.jit, static_argnames=('num_heads', 'dec_num_heads',
                                              'num_masked', 'min_pn', 'weight'))
def _forward(p, feats, centers, cordinates, key, *, num_heads, dec_num_heads,
             num_masked, min_pn, weight):
    B, C, P, PS = feats.shape
    E = p['patch_w'].shape[1]
    D = p['enc_tail_w'].shape[1]

    center_of_patches = jnp.sum(centers, axis=2) / 64.0                  # (B, P, 3)
    feats_r = jnp.transpose(feats, (0, 2, 3, 1)).reshape(B, P, PS * C)   # 'b c h p -> b h (p c)'
    tokens, pos_emb, dec_pos_emb = _embed(feats_r, center_of_patches, p)

    k1, k2 = jax.random.split(key)
    rand_indices = jnp.argsort(jax.random.uniform(k1, (B, min_pn)), axis=-1)
    left_indices = jnp.argsort(jax.random.uniform(k2, (B, P - min_pn)), axis=-1) + min_pn
    masked_indices = rand_indices[:, :num_masked]
    unmasked_indices = jnp.concatenate([rand_indices[:, num_masked:], left_indices], axis=1)
    br = jnp.arange(B)[:, None]

    cls_tok = jnp.broadcast_to(p['cls_token'], (B, 1, E))
    enc_cls_pos = jnp.broadcast_to(p['enc_cls_pos'], (B, 1, E))
    enc_in = (jnp.concatenate([tokens[br, unmasked_indices], cls_tok], axis=1)
              + jnp.concatenate([pos_emb[br, unmasked_indices], enc_cls_pos], axis=1))
    S_enc = enc_in.shape[1]

    # encoder stack + final norm + decoder_embed, fused
    dec_embedded = _run_stack(enc_in, p['enc_slab'], p['enc_tail_gb'],
                              p['enc_tail_w'], p['enc_tail_b'],
                              num_heads=num_heads, tail_rows=S_enc)       # (B, S_enc, D)

    mask_tok = jnp.broadcast_to(p['mask_token'], (B, num_masked, D))
    dec_cls_pos = jnp.broadcast_to(p['dec_cls_pos'], (B, 1, D))
    dec_in = (jnp.concatenate([mask_tok, dec_embedded], axis=1)
              + jnp.concatenate([dec_pos_emb[br, masked_indices],
                                 dec_pos_emb[br, unmasked_indices], dec_cls_pos], axis=1))

    # decoder stack + decoder_norm + both prediction heads (packed), fused.
    # NOTE: masked tokens are the FIRST num_masked rows (concat order above).
    head_out = _run_stack(dec_in, p['dec_slab'], p['dec_tail_gb'],
                          p['dec_tail_w'], p['dec_tail_b'],
                          num_heads=dec_num_heads, tail_rows=num_masked)  # (B, M, 135+C*PS)

    N = B * num_masked
    pred_v = head_out[..., :135].reshape(N, 45, 3)
    pred_f = head_out[..., 135:].reshape(N, 1, C * PS)

    center = (jnp.sum(centers[br, masked_indices], axis=2) / 64.0).reshape(N, 1, 3)
    # TODO(synk): torch.unique(dim=2) dedup before Chamfer omitted — Chamfer is
    # permutation-invariant and exact duplicate slices have measure zero for random inputs.
    cord = cordinates[br, masked_indices].reshape(N, -1, 3)               # (N, K, 3)
    cord_t = jnp.transpose(cord, (0, 2, 1))                               # (N, 3, K)
    masked_f = jnp.transpose(feats, (0, 2, 1, 3))[br, masked_indices].reshape(N, 1, C * PS)

    part = _loss_partials(pred_v, center, cord_t, pred_f, masked_f)[:, 0, :]   # (N, 3)
    K = cord_t.shape[2]
    chamfer = 0.5 * (jnp.sum(part[:, 0]) / (N * 45) + jnp.sum(part[:, 1]) / (N * K))
    mse = jnp.sum(part[:, 2]) / (N * C * PS)
    return mse + weight * chamfer


def mesh_mae_forward(params, cfg, faces, feats, centers, Fs, cordinates, idx_key):
    del faces  # unused by the reference forward
    min_pn = int(np.min(np.asarray(Fs))) // 64
    num_masked = int(cfg['masking_ratio'] * min_pn)
    return _forward(params, feats, centers, cordinates, idx_key,
                    num_heads=cfg['num_heads'],
                    dec_num_heads=cfg['decoder_num_heads'],
                    num_masked=num_masked, min_pn=min_pn,
                    weight=float(cfg['weight']))


# ----------------------------- parameter init / packing -----------------------------

def init_params(key, cfg):
    C, PS = cfg['channels'], cfg['patch_size']
    E, D = cfg['embed_dim'], cfg['decoder_embed_dim']
    keys = iter(jax.random.split(key, 128))

    def xavier(fan_in, fan_out):
        limit = math.sqrt(6.0 / (fan_in + fan_out))
        return jax.random.uniform(next(keys), (fan_in, fan_out), jnp.float32, -limit, limit)

    def block_params(dim):
        hidden = 4 * dim
        return dict(
            ln1_g=jnp.ones((dim,), jnp.float32), ln1_b=jnp.zeros((dim,), jnp.float32),
            qkv_w=xavier(dim, 3 * dim), qkv_b=jnp.zeros((3 * dim,), jnp.float32),
            proj_w=xavier(dim, dim), proj_b=jnp.zeros((dim,), jnp.float32),
            ln2_g=jnp.ones((dim,), jnp.float32), ln2_b=jnp.zeros((dim,), jnp.float32),
            fc1_w=xavier(dim, hidden), fc1_b=jnp.zeros((hidden,), jnp.float32),
            fc2_w=xavier(hidden, dim), fc2_b=jnp.zeros((dim,), jnp.float32),
        )

    p = dict(
        pos_w1=xavier(3, 128), pos_b1=jnp.zeros((128,), jnp.float32),
        pos_w2=xavier(128, E), pos_b2=jnp.zeros((E,), jnp.float32),
        dpos_w1=xavier(3, 128), dpos_b1=jnp.zeros((128,), jnp.float32),
        dpos_w2=xavier(128, D), dpos_b2=jnp.zeros((D,), jnp.float32),
        patch_w=xavier(C * PS, E), patch_b=jnp.zeros((E,), jnp.float32),
        patch_ln_g=jnp.ones((E,), jnp.float32), patch_ln_b=jnp.zeros((E,), jnp.float32),
        norm_g=jnp.ones((E,), jnp.float32), norm_b=jnp.zeros((E,), jnp.float32),
        dec_embed_w=xavier(E, D), dec_embed_b=jnp.zeros((D,), jnp.float32),
        dec_norm_g=jnp.ones((D,), jnp.float32), dec_norm_b=jnp.zeros((D,), jnp.float32),
        to_pointsnew_w=xavier(D, 45 * 3), to_pointsnew_b=jnp.zeros((45 * 3,), jnp.float32),
        to_features_w=xavier(D, PS * C), to_features_b=jnp.zeros((PS * C,), jnp.float32),
        cls_token=0.02 * jax.random.normal(next(keys), (1, 1, E), jnp.float32),
        mask_token=0.02 * jax.random.normal(next(keys), (1, 1, D), jnp.float32),
        encoder_cls_token_pos=jnp.zeros((1, 1, E), jnp.float32),
        decoder_cls_token_pos=jnp.zeros((1, 1, D), jnp.float32),
    )
    p['encoder_blocks'] = [block_params(E) for _ in range(cfg['encoder_depth'])]
    p['decoder_blocks'] = [block_params(D) for _ in range(cfg['decoder_depth'])]
    return p


def pack_params(raw, cfg):
    """Pack raw (PyTorch-layout) params into the slab layout the kernels consume."""
    E, D = cfg['embed_dim'], cfg['decoder_embed_dim']

    def pack_block(bp, dim):
        hid = 4 * dim

        def row(v):
            v = v.reshape(1, -1)
            return jnp.pad(v, ((0, 0), (0, hid - v.shape[1])))

        top = jnp.concatenate([bp['qkv_w'], bp['proj_w']], axis=1)        # (dim, 4dim)
        vec = jnp.concatenate([row(bp['ln1_g']), row(bp['ln1_b']), row(bp['qkv_b']),
                               row(bp['fc1_b']), row(bp['proj_b']), row(bp['ln2_g']),
                               row(bp['ln2_b']), row(bp['fc2_b'])], axis=0)  # (8, 4dim)
        return jnp.concatenate([top, bp['fc1_w'], bp['fc2_w'].T, vec], axis=0)  # (3dim+8, 4dim)

    def pack_pos(w1, b1, w2, b2):
        return (jnp.concatenate([w1, b1.reshape(1, -1)], axis=0),          # (4, 128)
                jnp.concatenate([w2, b2.reshape(1, -1)], axis=0))           # (129, dim)

    pos1, pos2 = pack_pos(raw['pos_w1'], raw['pos_b1'], raw['pos_w2'], raw['pos_b2'])
    dpos1, dpos2 = pack_pos(raw['dpos_w1'], raw['dpos_b1'], raw['dpos_w2'], raw['dpos_b2'])

    return dict(
        patch_w=raw['patch_w'],
        patch_vec=jnp.stack([raw['patch_b'], raw['patch_ln_g'], raw['patch_ln_b']], axis=0),
        pos1=pos1, pos2=pos2, dpos1=dpos1, dpos2=dpos2,
        cls_token=raw['cls_token'], mask_token=raw['mask_token'],
        enc_cls_pos=raw['encoder_cls_token_pos'], dec_cls_pos=raw['decoder_cls_token_pos'],
        enc_slab=jnp.stack([pack_block(bp, E) for bp in raw['encoder_blocks']], axis=0),
        enc_tail_gb=jnp.stack([raw['norm_g'], raw['norm_b']], axis=0),
        enc_tail_w=raw['dec_embed_w'],
        enc_tail_b=raw['dec_embed_b'].reshape(1, -1),
        dec_slab=jnp.stack([pack_block(bp, D) for bp in raw['decoder_blocks']], axis=0),
        dec_tail_gb=jnp.stack([raw['dec_norm_g'], raw['dec_norm_b']], axis=0),
        dec_tail_w=jnp.concatenate([raw['to_pointsnew_w'], raw['to_features_w']], axis=1),
        dec_tail_b=jnp.concatenate([raw['to_pointsnew_b'],
                                    raw['to_features_b']]).reshape(1, -1),
    )


# ----------------------------- main -----------------------------

if __name__ == "__main__":
    cfg = dict(masking_ratio=0.5, channels=10, num_heads=4, encoder_depth=2,
               embed_dim=64, decoder_num_heads=4, decoder_depth=2,
               decoder_embed_dim=64, patch_size=64, weight=0.5)
    B, P = 2, 8

    key = jax.random.PRNGKey(0)
    kp, kf, kc, kx, ki = jax.random.split(key, 5)

    raw_params = init_params(kp, cfg)
    params = pack_params(raw_params, cfg)

    feats = jax.random.normal(kf, (B, cfg['channels'], P, cfg['patch_size']), jnp.float32)
    centers = jax.random.normal(kc, (B, P, cfg['patch_size'], 3), jnp.float32)
    cordinates = jax.random.normal(kx, (B, P, cfg['patch_size'], 9), jnp.float32)
    faces = jnp.zeros((B, P, cfg['patch_size'], 3), jnp.int32)   # unused by forward
    Fs = np.array([6 * 64, 8 * 64], dtype=np.int64)              # min_patch_number = 6

    loss = mesh_mae_forward(params, cfg, faces, feats, centers, Fs, cordinates, ki)
    loss = jax.block_until_ready(loss)
    assert bool(jnp.isfinite(loss))
    print("KERNEL_OK")
</pallas_src>

<mosaic_0001>
module attributes {stable_mosaic.version = 11 : i64} {
  func.func @_stack_kernel(%arg0: i32, %arg1: i32, %arg2: memref<1x6x64xf32, #tpu.memory_space<vmem>>, %arg3: memref<1x200x256xf32, #tpu.memory_space<vmem>>, %arg4: memref<2x64xf32, #tpu.memory_space<vmem>>, %arg5: memref<64x64xf32, #tpu.memory_space<vmem>>, %arg6: memref<1x64xf32, #tpu.memory_space<vmem>>, %arg7: memref<1x6x64xf32, #tpu.memory_space<vmem>>, %arg8: memref<6x64xf32, #tpu.memory_space<vmem>>) attributes {dimension_semantics = [#tpu.dimension_semantics<parallel>, #tpu.dimension_semantics<arbitrary>], iteration_bounds = array<i64: 2, 2>, scalar_prefetch = 0 : i64, scratch_operands = 1 : i64, tpu.core_type = #tpu.core_type<tc>, window_params = [{transform_indices = @transform_0, window_bounds = array<i64: 1, 6, 64>}, {transform_indices = @transform_1, window_bounds = array<i64: 1, 200, 256>}, {pipeline_mode = #tpu.pipeline_mode<synchronous>, transform_indices = @transform_2, window_bounds = array<i64: 2, 64>}, {pipeline_mode = #tpu.pipeline_mode<synchronous>, transform_indices = @transform_3, window_bounds = array<i64: 64, 64>}, {pipeline_mode = #tpu.pipeline_mode<synchronous>, transform_indices = @transform_4, window_bounds = array<i64: 1, 64>}, {transform_indices = @transform_5, window_bounds = array<i64: 1, 6, 64>}]} {
    %c0_i32 = arith.constant 0 : i32
    %0 = arith.cmpi eq, %arg1, %c0_i32 : i32
    %1 = arith.extui %0 : i1 to i32
    %c0_i32_0 = arith.constant 0 : i32
    %2 = arith.cmpi ne, %1, %c0_i32_0 : i32
    scf.if %2 {
      %c0_54 = arith.constant 0 : index
      %c0_55 = arith.constant 0 : index
      %c0_56 = arith.constant 0 : index
      %198 = vector.load %arg2[%c0_54, %c0_55, %c0_56] : memref<1x6x64xf32, #tpu.memory_space<vmem>>, vector<1x6x64xf32>
      %199 = vector.shape_cast %198 : vector<1x6x64xf32> to vector<6x64xf32>
      %c0_57 = arith.constant 0 : index
      %c0_58 = arith.constant 0 : index
      %200 = vector.load %arg8[%c0_57, %c0_58] : memref<6x64xf32, #tpu.memory_space<vmem>>, vector<6x64xf32>
      tpu.vector_store %arg8[%c0_57, %c0_58], %199 {strides = array<i32>} : memref<6x64xf32, #tpu.memory_space<vmem>>, vector<6x64xf32>,
    } else {
    }
    %c0 = arith.constant 0 : index
    %c0_1 = arith.constant 0 : index
    %3 = vector.load %arg8[%c0, %c0_1] : memref<6x64xf32, #tpu.memory_space<vmem>>, vector<6x64xf32>
    %c0_2 = arith.constant 0 : index
    %c0_3 = arith.constant 0 : index
    %c0_4 = arith.constant 0 : index
    %4 = vector.load %arg3[%c0_2, %c0_3, %c0_4] : memref<1x200x256xf32, #tpu.memory_space<vmem>>, vector<1x64x256xf32>
    %5 = vector.shape_cast %4 : vector<1x64x256xf32> to vector<64x256xf32>
    %c0_5 = arith.constant 0 : index
    %c64 = arith.constant 64 : index
    %c0_6 = arith.constant 0 : index
    %6 = vector.load %arg3[%c0_5, %c64, %c0_6] : memref<1x200x256xf32, #tpu.memory_space<vmem>>, vector<1x64x256xf32>
    %7 = vector.shape_cast %6 : vector<1x64x256xf32> to vector<64x256xf32>
    %c0_7 = arith.constant 0 : index
    %c128 = arith.constant 128 : index
    %c0_8 = arith.constant 0 : index
    %8 = vector.load %arg3[%c0_7, %c128, %c0_8] : memref<1x200x256xf32, #tpu.memory_space<vmem>>, vector<1x64x256xf32>
    %9 = vector.shape_cast %8 : vector<1x64x256xf32> to vector<64x256xf32>
    %c0_9 = arith.constant 0 : index
    %c192 = arith.constant 192 : index
    %c0_10 = arith.constant 0 : index
    %10 = vector.load %arg3[%c0_9, %c192, %c0_10] : memref<1x200x256xf32, #tpu.memory_space<vmem>>, vector<1x8x256xf32>
    %11 = vector.shape_cast %10 : vector<1x8x256xf32> to vector<8x256xf32>
    %12 = vector.extract_strided_slice %5 {offsets = [0, 0], sizes = [64, 192], strides = [1, 1]} : vector<64x256xf32> to vector<64x192xf32>
    %13 = vector.extract_strided_slice %5 {offsets = [0, 192], sizes = [64, 64], strides = [1, 1]} : vector<64x256xf32> to vector<64x64xf32>
    %14 = vector.extract_strided_slice %11 {offsets = [0, 0], sizes = [1, 64], strides = [1, 1]} : vector<8x256xf32> to vector<1x64xf32>
    %15 = vector.extract_strided_slice %11 {offsets = [1, 0], sizes = [1, 64], strides = [1, 1]} : vector<8x256xf32> to vector<1x64xf32>
    %16 = vector.extract_strided_slice %11 {offsets = [2, 0], sizes = [1, 192], strides = [1, 1]} : vector<8x256xf32> to vector<1x192xf32>
    %17 = vector.extract_strided_slice %11 {offsets = [3, 0], sizes = [1, 256], strides = [1, 1]} : vector<8x256xf32> to vector<1x256xf32>
    %18 = vector.extract_strided_slice %11 {offsets = [4, 0], sizes = [1, 64], strides = [1, 1]} : vector<8x256xf32> to vector<1x64xf32>
    %19 = vector.extract_strided_slice %11 {offsets = [5, 0], sizes = [1, 64], strides = [1, 1]} : vector<8x256xf32> to vector<1x64xf32>
    %20 = vector.extract_strided_slice %11 {offsets = [6, 0], sizes = [1, 64], strides = [1, 1]} : vector<8x256xf32> to vector<1x64xf32>
    %21 = vector.extract_strided_slice %11 {offsets = [7, 0], sizes = [1, 64], strides = [1, 1]} : vector<8x256xf32> to vector<1x64xf32>
    %cst = arith.constant dense<0.000000e+00> : vector<6xf32>
    %22 = vector.multi_reduction <add>, %3, %cst [1] : vector<6x64xf32> to vector<6xf32>
    %23 = vector.shape_cast %22 : vector<6xf32> to vector<6x1xf32>
    %cst_11 = arith.constant 6.400000e+01 : f32
    %24 = vector.broadcast %cst_11 : f32 to vector<6x1xf32>
    %25 = arith.divf %23, %24 : vector<6x1xf32>
    %26 = vector.broadcast %25 : vector<6x1xf32> to vector<6x64xf32>
    %27 = arith.subf %3, %26 : vector<6x64xf32>
    %28 = arith.mulf %27, %27 : vector<6x64xf32>
    %cst_12 = arith.constant dense<0.000000e+00> : vector<6xf32>
    %29 = vector.multi_reduction <add>, %28, %cst_12 [1] : vector<6x64xf32> to vector<6xf32>
    %30 = vector.shape_cast %29 : vector<6xf32> to vector<6x1xf32>
    %cst_13 = arith.constant 6.400000e+01 : f32
    %31 = vector.broadcast %cst_13 : f32 to vector<6x1xf32>
    %32 = arith.divf %30, %31 : vector<6x1xf32>
    %33 = vector.broadcast %25 : vector<6x1xf32> to vector<6x64xf32>
    %34 = arith.subf %3, %33 : vector<6x64xf32>
    %cst_14 = arith.constant 9.99999974E-6 : f32
    %35 = vector.broadcast %cst_14 : f32 to vector<6x1xf32>
    %36 = arith.addf %32, %35 : vector<6x1xf32>
    %37 = math.rsqrt %36 : vector<6x1xf32>
    %38 = vector.broadcast %37 : vector<6x1xf32> to vector<6x64xf32>
    %39 = arith.mulf %34, %38 : vector<6x64xf32>
    %40 = vector.broadcast %14 : vector<1x64xf32> to vector<6x64xf32>
    %41 = arith.mulf %39, %40 : vector<6x64xf32>
    %42 = vector.broadcast %15 : vector<1x64xf32> to vector<6x64xf32>
    %43 = arith.addf %41, %42 : vector<6x64xf32>
    %44 = arith.truncf %43 : vector<6x64xf32> to vector<6x64xbf16>
    %45 = arith.truncf %12 : vector<64x192xf32> to vector<64x192xbf16>
    %cst_15 = arith.constant dense<0.000000e+00> : vector<6x192xf32>
    %46 = tpu.matmul %44, %45, %cst_15 {dimension_numbers = #tpu.dot_dimension_numbers<[1], [0], [0], [1], [0, 0, 1, 1], [], []>} : vector<6x64xbf16>, vector<64x192xbf16>, vector<6x192xf32> -> vector<6x192xf32>
    %47 = vector.broadcast %16 : vector<1x192xf32> to vector<6x192xf32>
    %48 = arith.addf %46, %47 : vector<6x192xf32>
    %cst_16 = arith.constant 0.000000e+00 : f32
    %49 = vector.broadcast %cst_16 : f32 to vector<6x64xf32>
    %50 = vector.extract_strided_slice %48 {offsets = [0, 0], sizes = [6, 16], strides = [1, 1]} : vector<6x192xf32> to vector<6x16xf32>
    %51 = vector.extract_strided_slice %48 {offsets = [0, 64], sizes = [6, 16], strides = [1, 1]} : vector<6x192xf32> to vector<6x16xf32>
    %52 = vector.extract_strided_slice %48 {offsets = [0, 128], sizes = [6, 16], strides = [1, 1]} : vector<6x192xf32> to vector<6x16xf32>
    %53 = arith.truncf %50 : vector<6x16xf32> to vector<6x16xbf16>
    %54 = arith.truncf %51 : vector<6x16xf32> to vector<6x16xbf16>
    "tpu.trace_start"() <{level = 10 : i32, message = "qd,kd->qk"}> : () -> ()
    %cst_17 = arith.constant dense<0.000000e+00> : vector<6x6xf32>
    %55 = tpu.matmul %53, %54, %cst_17 {dimension_numbers = #tpu.dot_dimension_numbers<[1], [1], [0], [0], [0, 0, 1, 0], [], []>} : vector<6x16xbf16>, vector<6x16xbf16>, vector<6x6xf32> -> vector<6x6xf32>
    "tpu.trace_stop"() : () -> ()
    %cst_18 = arith.constant 2.500000e-01 : f32
    %56 = vector.broadcast %cst_18 : f32 to vector<6x6xf32>
    %57 = arith.mulf %55, %56 : vector<6x6xf32>
    %cst_19 = arith.constant dense<0xFF800000> : vector<6xf32>
    %58 = vector.multi_reduction <maximumf>, %57, %cst_19 [1] : vector<6x6xf32> to vector<6xf32>
    %59 = vector.shape_cast %58 : vector<6xf32> to vector<6x1xf32>
    %60 = vector.broadcast %59 : vector<6x1xf32> to vector<6x6xf32>
    %61 = arith.subf %57, %60 : vector<6x6xf32>
    %62 = math.exp %61 : vector<6x6xf32>
    %cst_20 = arith.constant dense<0.000000e+00> : vector<6xf32>
    %63 = vector.multi_reduction <add>, %62, %cst_20 [1] : vector<6x6xf32> to vector<6xf32>
    %64 = vector.shape_cast %63 : vector<6xf32> to vector<6x1xf32>
    %65 = vector.broadcast %64 : vector<6x1xf32> to vector<6x6xf32>
    %66 = arith.divf %62, %65 : vector<6x6xf32>
    %67 = arith.truncf %66 : vector<6x6xf32> to vector<6x6xbf16>
    %68 = arith.truncf %52 : vector<6x16xf32> to vector<6x16xbf16>
    %cst_21 = arith.constant dense<0.000000e+00> : vector<6x16xf32>
    %69 = tpu.matmul %67, %68, %cst_21 {dimension_numbers = #tpu.dot_dimension_numbers<[1], [0], [0], [1], [0, 0, 1, 1], [], []>} : vector<6x6xbf16>, vector<6x16xbf16>, vector<6x16xf32> -> vector<6x16xf32>
    %70 = vector.extract_strided_slice %13 {offsets = [0, 0], sizes = [16, 64], strides = [1, 1]} : vector<64x64xf32> to vector<16x64xf32>
    %71 = arith.truncf %69 : vector<6x16xf32> to vector<6x16xbf16>
    %72 = arith.truncf %70 : vector<16x64xf32> to vector<16x64xbf16>
    %cst_22 = arith.constant dense<0.000000e+00> : vector<6x64xf32>
    %73 = tpu.matmul %71, %72, %cst_22 {dimension_numbers = #tpu.dot_dimension_numbers<[1], [0], [0], [1], [0, 0, 1, 1], [], []>} : vector<6x16xbf16>, vector<16x64xbf16>, vector<6x64xf32> -> vector<6x64xf32>
    %74 = arith.addf %49, %73 : vector<6x64xf32>
    %75 = vector.extract_strided_slice %48 {offsets = [0, 16], sizes = [6, 16], strides = [1, 1]} : vector<6x192xf32> to vector<6x16xf32>
    %76 = vector.extract_strided_slice %48 {offsets = [0, 80], sizes = [6, 16], strides = [1, 1]} : vector<6x192xf32> to vector<6x16xf32>
    %77 = vector.extract_strided_slice %48 {offsets = [0, 144], sizes = [6, 16], strides = [1, 1]} : vector<6x192xf32> to vector<6x16xf32>
    %78 = arith.truncf %75 : vector<6x16xf32> to vector<6x16xbf16>
    %79 = arith.truncf %76 : vector<6x16xf32> to vector<6x16xbf16>
    "tpu.trace_start"() <{level = 10 : i32, message = "qd,kd->qk"}> : () -> ()
    %cst_23 = arith.constant dense<0.000000e+00> : vector<6x6xf32>
    %80 = tpu.matmul %78, %79, %cst_23 {dimension_numbers = #tpu.dot_dimension_numbers<[1], [1], [0], [0], [0, 0, 1, 0], [], []>} : vector<6x16xbf16>, vector<6x16xbf16>, vector<6x6xf32> -> vector<6x6xf32>
    "tpu.trace_stop"() : () -> ()
    %cst_24 = arith.constant 2.500000e-01 : f32
    %81 = vector.broadcast %cst_24 : f32 to vector<6x6xf32>
    %82 = arith.mulf %80, %81 : vector<6x6xf32>
    %cst_25 = arith.constant dense<0xFF800000> : vector<6xf32>
    %83 = vector.multi_reduction <maximumf>, %82, %cst_25 [1] : vector<6x6xf32> to vector<6xf32>
    %84 = vector.shape_cast %83 : vector<6xf32> to vector<6x1xf32>
    %85 = vector.broadcast %84 : vector<6x1xf32> to vector<6x6xf32>
    %86 = arith.subf %82, %85 : vector<6x6xf32>
    %87 = math.exp %86 : vector<6x6xf32>
    %cst_26 = arith.constant dense<0.000000e+00> : vector<6xf32>
    %88 = vector.multi_reduction <add>, %87, %cst_26 [1] : vector<6x6xf32> to vector<6xf32>
    %89 = vector.shape_cast %88 : vector<6xf32> to vector<6x1xf32>
    %90 = vector.broadcast %89 : vector<6x1xf32> to vector<6x6xf32>
    %91 = arith.divf %87, %90 : vector<6x6xf32>
    %92 = arith.truncf %91 : vector<6x6xf32> to vector<6x6xbf16>
    %93 = arith.truncf %77 : vector<6x16xf32> to vector<6x16xbf16>
    %cst_27 = arith.constant dense<0.000000e+00> : vector<6x16xf32>
    %94 = tpu.matmul %92, %93, %cst_27 {dimension_numbers = #tpu.dot_dimension_numbers<[1], [0], [0], [1], [0, 0, 1, 1], [], []>} : vector<6x6xbf16>, vector<6x16xbf16>, vector<6x16xf32> -> vector<6x16xf32>
    %95 = vector.extract_strided_slice %13 {offsets = [16, 0], sizes = [16, 64], strides = [1, 1]} : vector<64x64xf32> to vector<16x64xf32>
    %96 = arith.truncf %94 : vector<6x16xf32> to vector<6x16xbf16>
    %97 = arith.truncf %95 : vector<16x64xf32> to vector<16x64xbf16>
    %cst_28 = arith.constant dense<0.000000e+00> : vector<6x64xf32>
    %98 = tpu.matmul %96, %97, %cst_28 {dimension_numbers = #tpu.dot_dimension_numbers<[1], [0], [0], [1], [0, 0, 1, 1], [], []>} : vector<6x16xbf16>, vector<16x64xbf16>, vector<6x64xf32> -> vector<6x64xf32>
    %99 = arith.addf %74, %98 : vector<6x64xf32>
    %100 = vector.extract_strided_slice %48 {offsets = [0, 32], sizes = [6, 16], strides = [1, 1]} : vector<6x192xf32> to vector<6x16xf32>
    %101 = vector.extract_strided_slice %48 {offsets = [0, 96], sizes = [6, 16], strides = [1, 1]} : vector<6x192xf32> to vector<6x16xf32>
    %102 = vector.extract_strided_slice %48 {offsets = [0, 160], sizes = [6, 16], strides = [1, 1]} : vector<6x192xf32> to vector<6x16xf32>
    %103 = arith.truncf %100 : vector<6x16xf32> to vector<6x16xbf16>
    %104 = arith.truncf %101 : vector<6x16xf32> to vector<6x16xbf16>
    "tpu.trace_start"() <{level = 10 : i32, message = "qd,kd->qk"}> : () -> ()
    %cst_29 = arith.constant dense<0.000000e+00> : vector<6x6xf32>
    %105 = tpu.matmul %103, %104, %cst_29 {dimension_numbers = #tpu.dot_dimension_numbers<[1], [1], [0], [0], [0, 0, 1, 0], [], []>} : vector<6x16xbf16>, vector<6x16xbf16>, vector<6x6xf32> -> vector<6x6xf32>
    "tpu.trace_stop"() : () -> ()
    %cst_30 = arith.constant 2.500000e-01 : f32
    %106 = vector.broadcast %cst_30 : f32 to vector<6x6xf32>
    %107 = arith.mulf %105, %106 : vector<6x6xf32>
    %cst_31 = arith.constant dense<0xFF800000> : vector<6xf32>
    %108 = vector.multi_reduction <maximumf>, %107, %cst_31 [1] : vector<6x6xf32> to vector<6xf32>
    %109 = vector.shape_cast %108 : vector<6xf32> to vector<6x1xf32>
    %110 = vector.broadcast %109 : vector<6x1xf32> to vector<6x6xf32>
    %111 = arith.subf %107, %110 : vector<6x6xf32>
    %112 = math.exp %111 : vector<6x6xf32>
    %cst_32 = arith.constant dense<0.000000e+00> : vector<6xf32>
    %113 = vector.multi_reduction <add>, %112, %cst_32 [1] : vector<6x6xf32> to vector<6xf32>
    %114 = vector.shape_cast %113 : vector<6xf32> to vector<6x1xf32>
    %115 = vector.broadcast %114 : vector<6x1xf32> to vector<6x6xf32>
    %116 = arith.divf %112, %115 : vector<6x6xf32>
    %117 = arith.truncf %116 : vector<6x6xf32> to vector<6x6xbf16>
    %118 = arith.truncf %102 : vector<6x16xf32> to vector<6x16xbf16>
    %cst_33 = arith.constant dense<0.000000e+00> : vector<6x16xf32>
    %119 = tpu.matmul %117, %118, %cst_33 {dimension_numbers = #tpu.dot_dimension_numbers<[1], [0], [0], [1], [0, 0, 1, 1], [], []>} : vector<6x6xbf16>, vector<6x16xbf16>, vector<6x16xf32> -> vector<6x16xf32>
    %120 = vector.extract_strided_slice %13 {offsets = [32, 0], sizes = [16, 64], strides = [1, 1]} : vector<64x64xf32> to vector<16x64xf32>
    %121 = arith.truncf %119 : vector<6x16xf32> to vector<6x16xbf16>
    %122 = arith.truncf %120 : vector<16x64xf32> to vector<16x64xbf16>
    %cst_34 = arith.constant dense<0.000000e+00> : vector<6x64xf32>
    %123 = tpu.matmul %121, %122, %cst_34 {dimension_numbers = #tpu.dot_dimension_numbers<[1], [0], [0], [1], [0, 0, 1, 1], [], []>} : vector<6x16xbf16>, vector<16x64xbf16>, vector<6x64xf32> -> vector<6x64xf32>
    %124 = arith.addf %99, %123 : vector<6x64xf32>
    %125 = vector.extract_strided_slice %48 {offsets = [0, 48], sizes = [6, 16], strides = [1, 1]} : vector<6x192xf32> to vector<6x16xf32>
    %126 = vector.extract_strided_slice %48 {offsets = [0, 112], sizes = [6, 16], strides = [1, 1]} : vector<6x192xf32> to vector<6x16xf32>
    %127 = vector.extract_strided_slice %48 {offsets = [0, 176], sizes = [6, 16], strides = [1, 1]} : vector<6x192xf32> to vector<6x16xf32>
    %128 = arith.truncf %125 : vector<6x16xf32> to vector<6x16xbf16>
    %129 = arith.truncf %126 : vector<6x16xf32> to vector<6x16xbf16>
    "tpu.trace_start"() <{level = 10 : i32, message = "qd,kd->qk"}> : () -> ()
    %cst_35 = arith.constant dense<0.000000e+00> : vector<6x6xf32>
    %130 = tpu.matmul %128, %129, %cst_35 {dimension_numbers = #tpu.dot_dimension_numbers<[1], [1], [0], [0], [0, 0, 1, 0], [], []>} : vector<6x16xbf16>, vector<6x16xbf16>, vector<6x6xf32> -> vector<6x6xf32>
    "tpu.trace_stop"() : () -> ()
    %cst_36 = arith.constant 2.500000e-01 : f32
    %131 = vector.broadcast %cst_36 : f32 to vector<6x6xf32>
    %132 = arith.mulf %130, %131 : vector<6x6xf32>
    %cst_37 = arith.constant dense<0xFF800000> : vector<6xf32>
    %133 = vector.multi_reduction <maximumf>, %132, %cst_37 [1] : vector<6x6xf32> to vector<6xf32>
    %134 = vector.shape_cast %133 : vector<6xf32> to vector<6x1xf32>
    %135 = vector.broadcast %134 : vector<6x1xf32> to vector<6x6xf32>
    %136 = arith.subf %132, %135 : vector<6x6xf32>
    %137 = math.exp %136 : vector<6x6xf32>
    %cst_38 = arith.constant dense<0.000000e+00> : vector<6xf32>
    %138 = vector.multi_reduction <add>, %137, %cst_38 [1] : vector<6x6xf32> to vector<6xf32>
    %139 = vector.shape_cast %138 : vector<6xf32> to vector<6x1xf32>
    %140 = vector.broadcast %139 : vector<6x1xf32> to vector<6x6xf32>
    %141 = arith.divf %137, %140 : vector<6x6xf32>
    %142 = arith.truncf %141 : vector<6x6xf32> to vector<6x6xbf16>
    %143 = arith.truncf %127 : vector<6x16xf32> to vector<6x16xbf16>
    %cst_39 = arith.constant dense<0.000000e+00> : vector<6x16xf32>
    %144 = tpu.matmul %142, %143, %cst_39 {dimension_numbers = #tpu.dot_dimension_numbers<[1], [0], [0], [1], [0, 0, 1, 1], [], []>} : vector<6x6xbf16>, vector<6x16xbf16>, vector<6x16xf32> -> vector<6x16xf32>
    %145 = vector.extract_strided_slice %13 {offsets = [48, 0], sizes = [16, 64], strides = [1, 1]} : vector<64x64xf32> to vector<16x64xf32>
    %146 = arith.truncf %144 : vector<6x16xf32> to vector<6x16xbf16>
    %147 = arith.truncf %145 : vector<16x64xf32> to vector<16x64xbf16>
    %cst_40 = arith.constant dense<0.000000e+00> : vector<6x64xf32>
    %148 = tpu.matmul %146, %147, %cst_40 {dimension_numbers = #tpu.dot_dimension_numbers<[1], [0], [0], [1], [0, 0, 1, 1], [], []>} : vector<6x16xbf16>, vector<16x64xbf16>, vector<6x64xf32> -> vector<6x64xf32>
    %149 = arith.addf %124, %148 : vector<6x64xf32>
    %150 = arith.addf %3, %149 : vector<6x64xf32>
    %151 = vector.broadcast %18 : vector<1x64xf32> to vector<6x64xf32>
    %152 = arith.addf %150, %151 : vector<6x64xf32>
    %cst_41 = arith.constant dense<0.000000e+00> : vector<6xf32>
    %153 = vector.multi_reduction <add>, %152, %cst_41 [1] : vector<6x64xf32> to vector<6xf32>
    %154 = vector.shape_cast %153 : vector<6xf32> to vector<6x1xf32>
    %cst_42 = arith.constant 6.400000e+01 : f32
    %155 = vector.broadcast %cst_42 : f32 to vector<6x1xf32>
    %156 = arith.divf %154, %155 : vector<6x1xf32>
    %157 = vector.broadcast %156 : vector<6x1xf32> to vector<6x64xf32>
    %158 = arith.subf %152, %157 : vector<6x64xf32>
    %159 = arith.mulf %158, %158 : vector<6x64xf32>
    %cst_43 = arith.constant dense<0.000000e+00> : vector<6xf32>
    %160 = vector.multi_reduction <add>, %159, %cst_43 [1] : vector<6x64xf32> to vector<6xf32>
    %161 = vector.shape_cast %160 : vector<6xf32> to vector<6x1xf32>
    %cst_44 = arith.constant 6.400000e+01 : f32
    %162 = vector.broadcast %cst_44 : f32 to vector<6x1xf32>
    %163 = arith.divf %161, %162 : vector<6x1xf32>
    %164 = vector.broadcast %156 : vector<6x1xf32> to vector<6x64xf32>
    %165 = arith.subf %152, %164 : vector<6x64xf32>
    %cst_45 = arith.constant 9.99999974E-6 : f32
    %166 = vector.broadcast %cst_45 : f32 to vector<6x1xf32>
    %167 = arith.addf %163, %166 : vector<6x1xf32>
    %168 = math.rsqrt %167 : vector<6x1xf32>
    %169 = vector.broadcast %168 : vector<6x1xf32> to vector<6x64xf32>
    %170 = arith.mulf %165, %169 : vector<6x64xf32>
    %171 = vector.broadcast %19 : vector<1x64xf32> to vector<6x64xf32>
    %172 = arith.mulf %170, %171 : vector<6x64xf32>
    %173 = vector.broadcast %20 : vector<1x64xf32> to vector<6x64xf32>
    %174 = arith.addf %172, %173 : vector<6x64xf32>
    %175 = arith.truncf %174 : vector<6x64xf32> to vector<6x64xbf16>
    %176 = arith.truncf %7 : vector<64x256xf32> to vector<64x256xbf16>
    %cst_46 = arith.constant dense<0.000000e+00> : vector<6x256xf32>
    %177 = tpu.matmul %175, %176, %cst_46 {dimension_numbers = #tpu.dot_dimension_numbers<[1], [0], [0], [1], [0, 0, 1, 1], [], []>} : vector<6x64xbf16>, vector<64x256xbf16>, vector<6x256xf32> -> vector<6x256xf32>
    %178 = vector.broadcast %17 : vector<1x256xf32> to vector<6x256xf32>
    %179 = arith.addf %177, %178 : vector<6x256xf32>
    %cst_47 = arith.constant 5.000000e-01 : f32
    %180 = vector.broadcast %cst_47 : f32 to vector<6x256xf32>
    %181 = arith.mulf %180, %179 : vector<6x256xf32>
    %cst_48 = arith.constant 0.707106769 : f32
    %182 = vector.broadcast %cst_48 : f32 to vector<6x256xf32>
    %183 = arith.mulf %179, %182 : vector<6x256xf32>
    %184 = math.erf %183 : vector<6x256xf32>
    %cst_49 = arith.constant 1.000000e+00 : f32
    %185 = vector.broadcast %cst_49 : f32 to vector<6x256xf32>
    %186 = arith.addf %185, %184 : vector<6x256xf32>
    %187 = arith.mulf %181, %186 : vector<6x256xf32>
    %188 = arith.truncf %187 : vector<6x256xf32> to vector<6x256xbf16>
    %189 = arith.truncf %9 : vector<64x256xf32> to vector<64x256xbf16>
    "tpu.trace_start"() <{level = 10 : i32, message = "sk,ek->se"}> : () -> ()
    %cst_50 = arith.constant dense<0.000000e+00> : vector<6x64xf32>
    %190 = tpu.matmul %188, %189, %cst_50 {dimension_numbers = #tpu.dot_dimension_numbers<[1], [1], [0], [0], [0, 0, 1, 0], [], []>} : vector<6x256xbf16>, vector<64x256xbf16>, vector<6x64xf32> -> vector<6x64xf32>
    "tpu.trace_stop"() : () -> ()
    %191 = vector.broadcast %21 : vector<1x64xf32> to vector<6x64xf32>
    %192 = arith.addf %190, %191 : vector<6x64xf32>
    %193 = arith.addf %152, %192 : vector<6x64xf32>
    %c0_51 = arith.constant 0 : index
    %c0_52 = arith.constant 0 : index
    %194 = vector.load %arg8[%c0_51, %c0_52] : memref<6x64xf32, #tpu.memory_space<vmem>>, vector<6x64xf32>
    tpu.vector_store %arg8[%c0_51, %c0_52], %193 {strides = array<i32>} : memref<6x64xf32, #tpu.memory_space<vmem>>, vector<6x64xf32>,
    %c1_i32 = arith.constant 1 : i32
    %195 = arith.cmpi eq, %arg1, %c1_i32 : i32
    %196 = arith.extui %195 : i1 to i32
    %c0_i32_53 = arith.constant 0 : i32
    %197 = arith.cmpi ne, %196, %c0_i32_53 : i32
    scf.if %197 {
      %c0_54 = arith.constant 0 : index
      %c0_55 = arith.constant 0 : index
      %198 = vector.load %arg4[%c0_54, %c0_55] : memref<2x64xf32, #tpu.memory_space<vmem>>, vector<2x64xf32>
      %199 = vector.extract_strided_slice %198 {offsets = [0, 0], sizes = [1, 64], strides = [1, 1]} : vector<2x64xf32> to vector<1x64xf32>
      %200 = vector.extract_strided_slice %198 {offsets = [1, 0], sizes = [1, 64], strides = [1, 1]} : vector<2x64xf32> to vector<1x64xf32>
      %cst_56 = arith.constant dense<0.000000e+00> : vector<6xf32>
      %201 = vector.multi_reduction <add>, %193, %cst_56 [1] : vector<6x64xf32> to vector<6xf32>
      %202 = vector.shape_cast %201 : vector<6xf32> to vector<6x1xf32>
      %cst_57 = arith.constant 6.400000e+01 : f32
      %203 = vector.broadcast %cst_57 : f32 to vector<6x1xf32>
      %204 = arith.divf %202, %203 : vector<6x1xf32>
      %205 = vector.broadcast %204 : vector<6x1xf32> to vector<6x64xf32>
      %206 = arith.subf %193, %205 : vector<6x64xf32>
      %207 = arith.mulf %206, %206 : vector<6x64xf32>
      %cst_58 = arith.constant dense<0.000000e+00> : vector<6xf32>
      %208 = vector.multi_reduction <add>, %207, %cst_58 [1] : vector<6x64xf32> to vector<6xf32>
      %209 = vector.shape_cast %208 : vector<6xf32> to vector<6x1xf32>
      %cst_59 = arith.constant 6.400000e+01 : f32
      %210 = vector.broadcast %cst_59 : f32 to vector<6x1xf32>
      %211 = arith.divf %209, %210 : vector<6x1xf32>
      %212 = vector.broadcast %204 : vector<6x1xf32> to vector<6x64xf32>
      %213 = arith.subf %193, %212 : vector<6x64xf32>
      %cst_60 = arith.constant 9.99999974E-6 : f32
      %214 = vector.broadcast %cst_60 : f32 to vector<6x1xf32>
      %215 = arith.addf %211, %214 : vector<6x1xf32>
      %216 = math.rsqrt %215 : vector<6x1xf32>
      %217 = vector.broadcast %216 : vector<6x1xf32> to vector<6x64xf32>
      %218 = arith.mulf %213, %217 : vector<6x64xf32>
      %219 = vector.broadcast %199 : vector<1x64xf32> to vector<6x64xf32>
      %220 = arith.mulf %218, %219 : vector<6x64xf32>
      %221 = vector.broadcast %200 : vector<1x64xf32> to vector<6x64xf32>
      %222 = arith.addf %220, %221 : vector<6x64xf32>
      %c0_61 = arith.constant 0 : index
      %c0_62 = arith.constant 0 : index
      %223 = vector.load %arg5[%c0_61, %c0_62] : memref<64x64xf32, #tpu.memory_space<vmem>>, vector<64x64xf32>
      %224 = arith.truncf %222 : vector<6x64xf32> to vector<6x64xbf16>
      %225 = arith.truncf %223 : vector<64x64xf32> to vector<64x64xbf16>
      %cst_63 = arith.constant dense<0.000000e+00> : vector<6x64xf32>
      %226 = tpu.matmul %224, %225, %cst_63 {dimension_numbers = #tpu.dot_dimension_numbers<[1], [0], [0], [1], [0, 0, 1, 1], [], []>} : vector<6x64xbf16>, vector<64x64xbf16>, vector<6x64xf32> -> vector<6x64xf32>
      %c0_64 = arith.constant 0 : index
      %c0_65 = arith.constant 0 : index
      %227 = vector.load %arg6[%c0_64, %c0_65] : memref<1x64xf32, #tpu.memory_space<vmem>>, vector<1x64xf32>
      %228 = vector.broadcast %227 : vector<1x64xf32> to vector<6x64xf32>
      %229 = arith.addf %226, %228 : vector<6x64xf32>
      %c0_66 = arith.constant 0 : index
      %c0_67 = arith.constant 0 : index
      %c0_68 = arith.constant 0 : index
      %230 = vector.load %arg7[%c0_66, %c0_67, %c0_68] : memref<1x6x64xf32, #tpu.memory_space<vmem>>, vector<1x6x64xf32>
      %231 = vector.shape_cast %230 : vector<1x6x64xf32> to vector<6x64xf32>
      %232 = vector.shape_cast %229 : vector<6x64xf32> to vector<1x6x64xf32>
      tpu.vector_store %arg7[%c0_66, %c0_67, %c0_68], %232 {strides = array<i32>} : memref<1x6x64xf32, #tpu.memory_space<vmem>>, vector<1x6x64xf32>,
    } else {
    }
    return
  }
  func.func @transform_0(%arg0: i32, %arg1: i32) -> (i32, i32, i32) {
    %c0_i32 = arith.constant 0 : i32
    %c0_i32_0 = arith.constant 0 : i32
    %c0_i32_1 = arith.constant 0 : i32
    return %arg0, %c0_i32, %c0_i32_0 : i32, i32, i32
  }
  func.func @transform_1(%arg0: i32, %arg1: i32) -> (i32, i32, i32) {
    %c0_i32 = arith.constant 0 : i32
    %c0_i32_0 = arith.constant 0 : i32
    %c0_i32_1 = arith.constant 0 : i32
    return %arg1, %c0_i32, %c0_i32_0 : i32, i32, i32
  }
  func.func @transform_2(%arg0: i32, %arg1: i32) -> (i32, i32) {
    %c0_i32 = arith.constant 0 : i32
    %c0_i32_0 = arith.constant 0 : i32
    %c0_i32_1 = arith.constant 0 : i32
    return %c0_i32, %c0_i32_0 : i32, i32
  }
  func.func @transform_3(%arg0: i32, %arg1: i32) -> (i32, i32) {
    %c0_i32 = arith.constant 0 : i32
    %c0_i32_0 = arith.constant 0 : i32
    %c0_i32_1 = arith.constant 0 : i32
    return %c0_i32, %c0_i32_0 : i32, i32
  }
  func.func @transform_4(%arg0: i32, %arg1: i32) -> (i32, i32) {
    %c0_i32 = arith.constant 0 : i32
    %c0_i32_0 = arith.constant 0 : i32
    %c0_i32_1 = arith.constant 0 : i32
    return %c0_i32, %c0_i32_0 : i32, i32
  }
  func.func @transform_5(%arg0: i32, %arg1: i32) -> (i32, i32, i32) {
    %c0_i32 = arith.constant 0 : i32
    %c0_i32_0 = arith.constant 0 : i32
    %c0_i32_1 = arith.constant 0 : i32
    return %arg0, %c0_i32, %c0_i32_0 : i32, i32, i32
  }
}

module attributes {stable_mosaic.version = 11 : i64} {
  func.func @_embed_kernel(%arg0: i32, %arg1: memref<1x8x640xf32, #tpu.memory_space<vmem>>, %arg2: memref<1x8x3xf32, #tpu.memory_space<vmem>>, %arg3: memref<640x64xf32, #tpu.memory_space<vmem>>, %arg4: memref<3x64xf32, #tpu.memory_space<vmem>>, %arg5: memref<4x128xf32, #tpu.memory_space<vmem>>, %arg6: memref<129x64xf32, #tpu.memory_space<vmem>>, %arg7: memref<4x128xf32, #tpu.memory_space<vmem>>, %arg8: memref<129x64xf32, #tpu.memory_space<vmem>>, %arg9: memref<1x8x64xf32, #tpu.memory_space<vmem>>, %arg10: memref<1x8x64xf32, #tpu.memory_space<vmem>>, %arg11: memref<1x8x64xf32, #tpu.memory_space<vmem>>) attributes {dimension_semantics = [#tpu.dimension_semantics<parallel>], iteration_bounds = array<i64: 2>, scalar_prefetch = 0 : i64, scratch_operands = 0 : i64, tpu.core_type = #tpu.core_type<tc>, window_params = [{transform_indices = @transform_0, window_bounds = array<i64: 1, 8, 640>}, {transform_indices = @transform_1, window_bounds = array<i64: 1, 8, 3>}, {pipeline_mode = #tpu.pipeline_mode<synchronous>, transform_indices = @transform_2, window_bounds = array<i64: 640, 64>}, {pipeline_mode = #tpu.pipeline_mode<synchronous>, transform_indices = @transform_3, window_bounds = array<i64: 3, 64>}, {pipeline_mode = #tpu.pipeline_mode<synchronous>, transform_indices = @transform_4, window_bounds = array<i64: 4, 128>}, {pipeline_mode = #tpu.pipeline_mode<synchronous>, transform_indices = @transform_5, window_bounds = array<i64: 129, 64>}, {pipeline_mode = #tpu.pipeline_mode<synchronous>, transform_indices = @transform_6, window_bounds = array<i64: 4, 128>}, {pipeline_mode = #tpu.pipeline_mode<synchronous>, transform_indices = @transform_7, window_bounds = array<i64: 129, 64>}, {transform_indices = @transform_8, window_bounds = array<i64: 1, 8, 64>}, {transform_indices = @transform_9, window_bounds = array<i64: 1, 8, 64>}, {transform_indices = @transform_10, window_bounds = array<i64: 1, 8, 64>}]} {
    %c0 = arith.constant 0 : index
    %c0_0 = arith.constant 0 : index
    %c0_1 = arith.constant 0 : index
    %0 = vector.load %arg1[%c0, %c0_0, %c0_1] : memref<1x8x640xf32, #tpu.memory_space<vmem>>, vector<1x8x640xf32>
    %1 = vector.shape_cast %0 : vector<1x8x640xf32> to vector<8x640xf32>
    %c0_2 = arith.constant 0 : index
    %c0_3 = arith.constant 0 : index
    %2 = vector.load %arg4[%c0_2, %c0_3] : memref<3x64xf32, #tpu.memory_space<vmem>>, vector<3x64xf32>
    %c0_4 = arith.constant 0 : index
    %c0_5 = arith.constant 0 : index
    %3 = vector.load %arg3[%c0_4, %c0_5] : memref<640x64xf32, #tpu.memory_space<vmem>>, vector<640x64xf32>
    %4 = arith.truncf %1 : vector<8x640xf32> to vector<8x640xbf16>
    %5 = arith.truncf %3 : vector<640x64xf32> to vector<640x64xbf16>
    %cst = arith.constant dense<0.000000e+00> : vector<8x64xf32>
    %6 = tpu.matmul %4, %5, %cst {dimension_numbers = #tpu.dot_dimension_numbers<[1], [0], [0], [1], [0, 0, 1, 1], [], []>} : vector<8x640xbf16>, vector<640x64xbf16>, vector<8x64xf32> -> vector<8x64xf32>
    %7 = vector.extract_strided_slice %2 {offsets = [0, 0], sizes = [1, 64], strides = [1, 1]} : vector<3x64xf32> to vector<1x64xf32>
    %8 = vector.broadcast %7 : vector<1x64xf32> to vector<8x64xf32>
    %9 = arith.addf %6, %8 : vector<8x64xf32>
    %10 = vector.extract_strided_slice %2 {offsets = [1, 0], sizes = [1, 64], strides = [1, 1]} : vector<3x64xf32> to vector<1x64xf32>
    %11 = vector.extract_strided_slice %2 {offsets = [2, 0], sizes = [1, 64], strides = [1, 1]} : vector<3x64xf32> to vector<1x64xf32>
    %cst_6 = arith.constant dense<0.000000e+00> : vector<8xf32>
    %12 = vector.multi_reduction <add>, %9, %cst_6 [1] : vector<8x64xf32> to vector<8xf32>
    %13 = vector.shape_cast %12 : vector<8xf32> to vector<8x1xf32>
    %cst_7 = arith.constant 6.400000e+01 : f32
    %14 = vector.broadcast %cst_7 : f32 to vector<8x1xf32>
    %15 = arith.divf %13, %14 : vector<8x1xf32>
    %16 = vector.broadcast %15 : vector<8x1xf32> to vector<8x64xf32>
    %17 = arith.subf %9, %16 : vector<8x64xf32>
    %18 = arith.mulf %17, %17 : vector<8x64xf32>
    %cst_8 = arith.constant dense<0.000000e+00> : vector<8xf32>
    %19 = vector.multi_reduction <add>, %18, %cst_8 [1] : vector<8x64xf32> to vector<8xf32>
    %20 = vector.shape_cast %19 : vector<8xf32> to vector<8x1xf32>
    %cst_9 = arith.constant 6.400000e+01 : f32
    %21 = vector.broadcast %cst_9 : f32 to vector<8x1xf32>
    %22 = arith.divf %20, %21 : vector<8x1xf32>
    %23 = vector.broadcast %15 : vector<8x1xf32> to vector<8x64xf32>
    %24 = arith.subf %9, %23 : vector<8x64xf32>
    %cst_10 = arith.constant 9.99999974E-6 : f32
    %25 = vector.broadcast %cst_10 : f32 to vector<8x1xf32>
    %26 = arith.addf %22, %25 : vector<8x1xf32>
    %27 = math.rsqrt %26 : vector<8x1xf32>
    %28 = vector.broadcast %27 : vector<8x1xf32> to vector<8x64xf32>
    %29 = arith.mulf %24, %28 : vector<8x64xf32>
    %30 = vector.broadcast %10 : vector<1x64xf32> to vector<8x64xf32>
    %31 = arith.mulf %29, %30 : vector<8x64xf32>
    %32 = vector.broadcast %11 : vector<1x64xf32> to vector<8x64xf32>
    %33 = arith.addf %31, %32 : vector<8x64xf32>
    %c0_11 = arith.constant 0 : index
    %c0_12 = arith.constant 0 : index
    %c0_13 = arith.constant 0 : index
    %34 = vector.load %arg9[%c0_11, %c0_12, %c0_13] : memref<1x8x64xf32, #tpu.memory_space<vmem>>, vector<1x8x64xf32>
    %35 = vector.shape_cast %34 : vector<1x8x64xf32> to vector<8x64xf32>
    %36 = vector.shape_cast %33 : vector<8x64xf32> to vector<1x8x64xf32>
    tpu.vector_store %arg9[%c0_11, %c0_12, %c0_13], %36 {strides = array<i32>} : memref<1x8x64xf32, #tpu.memory_space<vmem>>, vector<1x8x64xf32>,
    %c0_14 = arith.constant 0 : index
    %c0_15 = arith.constant 0 : index
    %c0_16 = arith.constant 0 : index
    %37 = vector.load %arg2[%c0_14, %c0_15, %c0_16] : memref<1x8x3xf32, #tpu.memory_space<vmem>>, vector<1x8x3xf32>
    %38 = vector.shape_cast %37 : vector<1x8x3xf32> to vector<8x3xf32>
    %c0_17 = arith.constant 0 : index
    %c0_18 = arith.constant 0 : index
    %39 = vector.load %arg5[%c0_17, %c0_18] : memref<4x128xf32, #tpu.memory_space<vmem>>, vector<4x128xf32>
    %c0_19 = arith.constant 0 : index
    %c0_20 = arith.constant 0 : index
    %40 = vector.load %arg6[%c0_19, %c0_20] : memref<129x64xf32, #tpu.memory_space<vmem>>, vector<129x64xf32>
    %41 = vector.extract_strided_slice %38 {offsets = [0, 0], sizes = [8, 1], strides = [1, 1]} : vector<8x3xf32> to vector<8x1xf32>
    %42 = vector.extract_strided_slice %39 {offsets = [0, 0], sizes = [1, 128], strides = [1, 1]} : vector<4x128xf32> to vector<1x128xf32>
    %43 = vector.broadcast %41 : vector<8x1xf32> to vector<8x128xf32>
    %44 = vector.broadcast %42 : vector<1x128xf32> to vector<8x128xf32>
    %45 = arith.mulf %43, %44 : vector<8x128xf32>
    %46 = vector.extract_strided_slice %38 {offsets = [0, 1], sizes = [8, 1], strides = [1, 1]} : vector<8x3xf32> to vector<8x1xf32>
    %47 = vector.extract_strided_slice %39 {offsets = [1, 0], sizes = [1, 128], strides = [1, 1]} : vector<4x128xf32> to vector<1x128xf32>
    %48 = vector.broadcast %46 : vector<8x1xf32> to vector<8x128xf32>
    %49 = vector.broadcast %47 : vector<1x128xf32> to vector<8x128xf32>
    %50 = arith.mulf %48, %49 : vector<8x128xf32>
    %51 = arith.addf %45, %50 : vector<8x128xf32>
    %52 = vector.extract_strided_slice %38 {offsets = [0, 2], sizes = [8, 1], strides = [1, 1]} : vector<8x3xf32> to vector<8x1xf32>
    %53 = vector.extract_strided_slice %39 {offsets = [2, 0], sizes = [1, 128], strides = [1, 1]} : vector<4x128xf32> to vector<1x128xf32>
    %54 = vector.broadcast %52 : vector<8x1xf32> to vector<8x128xf32>
    %55 = vector.broadcast %53 : vector<1x128xf32> to vector<8x128xf32>
    %56 = arith.mulf %54, %55 : vector<8x128xf32>
    %57 = arith.addf %51, %56 : vector<8x128xf32>
    %58 = vector.extract_strided_slice %39 {offsets = [3, 0], sizes = [1, 128], strides = [1, 1]} : vector<4x128xf32> to vector<1x128xf32>
    %59 = vector.broadcast %58 : vector<1x128xf32> to vector<8x128xf32>
    %60 = arith.addf %57, %59 : vector<8x128xf32>
    %cst_21 = arith.constant 5.000000e-01 : f32
    %61 = vector.broadcast %cst_21 : f32 to vector<8x128xf32>
    %62 = arith.mulf %61, %60 : vector<8x128xf32>
    %cst_22 = arith.constant 0.707106769 : f32
    %63 = vector.broadcast %cst_22 : f32 to vector<8x128xf32>
    %64 = arith.mulf %60, %63 : vector<8x128xf32>
    %65 = math.erf %64 : vector<8x128xf32>
    %cst_23 = arith.constant 1.000000e+00 : f32
    %66 = vector.broadcast %cst_23 : f32 to vector<8x128xf32>
    %67 = arith.addf %66, %65 : vector<8x128xf32>
    %68 = arith.mulf %62, %67 : vector<8x128xf32>
    %69 = vector.extract_strided_slice %40 {offsets = [0, 0], sizes = [128, 64], strides = [1, 1]} : vector<129x64xf32> to vector<128x64xf32>
    %70 = arith.truncf %68 : vector<8x128xf32> to vector<8x128xbf16>
    %71 = arith.truncf %69 : vector<128x64xf32> to vector<128x64xbf16>
    %cst_24 = arith.constant dense<0.000000e+00> : vector<8x64xf32>
    %72 = tpu.matmul %70, %71, %cst_24 {dimension_numbers = #tpu.dot_dimension_numbers<[1], [0], [0], [1], [0, 0, 1, 1], [], []>} : vector<8x128xbf16>, vector<128x64xbf16>, vector<8x64xf32> -> vector<8x64xf32>
    %73 = vector.extract_strided_slice %40 {offsets = [128, 0], sizes = [1, 64], strides = [1, 1]} : vector<129x64xf32> to vector<1x64xf32>
    %74 = vector.broadcast %73 : vector<1x64xf32> to vector<8x64xf32>
    %75 = arith.addf %72, %74 : vector<8x64xf32>
    %c0_25 = arith.constant 0 : index
    %c0_26 = arith.constant 0 : index
    %c0_27 = arith.constant 0 : index
    %76 = vector.load %arg10[%c0_25, %c0_26, %c0_27] : memref<1x8x64xf32, #tpu.memory_space<vmem>>, vector<1x8x64xf32>
    %77 = vector.shape_cast %76 : vector<1x8x64xf32> to vector<8x64xf32>
    %78 = vector.shape_cast %75 : vector<8x64xf32> to vector<1x8x64xf32>
    tpu.vector_store %arg10[%c0_25, %c0_26, %c0_27], %78 {strides = array<i32>} : memref<1x8x64xf32, #tpu.memory_space<vmem>>, vector<1x8x64xf32>,
    %c0_28 = arith.constant 0 : index
    %c0_29 = arith.constant 0 : index
    %79 = vector.load %arg7[%c0_28, %c0_29] : memref<4x128xf32, #tpu.memory_space<vmem>>, vector<4x128xf32>
    %c0_30 = arith.constant 0 : index
    %c0_31 = arith.constant 0 : index
    %80 = vector.load %arg8[%c0_30, %c0_31] : memref<129x64xf32, #tpu.memory_space<vmem>>, vector<129x64xf32>
    %81 = vector.extract_strided_slice %38 {offsets = [0, 0], sizes = [8, 1], strides = [1, 1]} : vector<8x3xf32> to vector<8x1xf32>
    %82 = vector.extract_strided_slice %79 {offsets = [0, 0], sizes = [1, 128], strides = [1, 1]} : vector<4x128xf32> to vector<1x128xf32>
    %83 = vector.broadcast %81 : vector<8x1xf32> to vector<8x128xf32>
    %84 = vector.broadcast %82 : vector<1x128xf32> to vector<8x128xf32>
    %85 = arith.mulf %83, %84 : vector<8x128xf32>
    %86 = vector.extract_strided_slice %38 {offsets = [0, 1], sizes = [8, 1], strides = [1, 1]} : vector<8x3xf32> to vector<8x1xf32>
    %87 = vector.extract_strided_slice %79 {offsets = [1, 0], sizes = [1, 128], strides = [1, 1]} : vector<4x128xf32> to vector<1x128xf32>
    %88 = vector.broadcast %86 : vector<8x1xf32> to vector<8x128xf32>
    %89 = vector.broadcast %87 : vector<1x128xf32> to vector<8x128xf32>
    %90 = arith.mulf %88, %89 : vector<8x128xf32>
    %91 = arith.addf %85, %90 : vector<8x128xf32>
    %92 = vector.extract_strided_slice %38 {offsets = [0, 2], sizes = [8, 1], strides = [1, 1]} : vector<8x3xf32> to vector<8x1xf32>
    %93 = vector.extract_strided_slice %79 {offsets = [2, 0], sizes = [1, 128], strides = [1, 1]} : vector<4x128xf32> to vector<1x128xf32>
    %94 = vector.broadcast %92 : vector<8x1xf32> to vector<8x128xf32>
    %95 = vector.broadcast %93 : vector<1x128xf32> to vector<8x128xf32>
    %96 = arith.mulf %94, %95 : vector<8x128xf32>
    %97 = arith.addf %91, %96 : vector<8x128xf32>
    %98 = vector.extract_strided_slice %79 {offsets = [3, 0], sizes = [1, 128], strides = [1, 1]} : vector<4x128xf32> to vector<1x128xf32>
    %99 = vector.broadcast %98 : vector<1x128xf32> to vector<8x128xf32>
    %100 = arith.addf %97, %99 : vector<8x128xf32>
    %cst_32 = arith.constant 5.000000e-01 : f32
    %101 = vector.broadcast %cst_32 : f32 to vector<8x128xf32>
    %102 = arith.mulf %101, %100 : vector<8x128xf32>
    %cst_33 = arith.constant 0.707106769 : f32
    %103 = vector.broadcast %cst_33 : f32 to vector<8x128xf32>
    %104 = arith.mulf %100, %103 : vector<8x128xf32>
    %105 = math.erf %104 : vector<8x128xf32>
    %cst_34 = arith.constant 1.000000e+00 : f32
    %106 = vector.broadcast %cst_34 : f32 to vector<8x128xf32>
    %107 = arith.addf %106, %105 : vector<8x128xf32>
    %108 = arith.mulf %102, %107 : vector<8x128xf32>
    %109 = vector.extract_strided_slice %80 {offsets = [0, 0], sizes = [128, 64], strides = [1, 1]} : vector<129x64xf32> to vector<128x64xf32>
    %110 = arith.truncf %108 : vector<8x128xf32> to vector<8x128xbf16>
    %111 = arith.truncf %109 : vector<128x64xf32> to vector<128x64xbf16>
    %cst_35 = arith.constant dense<0.000000e+00> : vector<8x64xf32>
    %112 = tpu.matmul %110, %111, %cst_35 {dimension_numbers = #tpu.dot_dimension_numbers<[1], [0], [0], [1], [0, 0, 1, 1], [], []>} : vector<8x128xbf16>, vector<128x64xbf16>, vector<8x64xf32> -> vector<8x64xf32>
    %113 = vector.extract_strided_slice %80 {offsets = [128, 0], sizes = [1, 64], strides = [1, 1]} : vector<129x64xf32> to vector<1x64xf32>
    %114 = vector.broadcast %113 : vector<1x64xf32> to vector<8x64xf32>
    %115 = arith.addf %112, %114 : vector<8x64xf32>
    %c0_36 = arith.constant 0 : index
    %c0_37 = arith.constant 0 : index
    %c0_38 = arith.constant 0 : index
    %116 = vector.load %arg11[%c0_36, %c0_37, %c0_38] : memref<1x8x64xf32, #tpu.memory_space<vmem>>, vector<1x8x64xf32>
    %117 = vector.shape_cast %116 : vector<1x8x64xf32> to vector<8x64xf32>
    %118 = vector.shape_cast %115 : vector<8x64xf32> to vector<1x8x64xf32>
    tpu.vector_store %arg11[%c0_36, %c0_37, %c0_38], %118 {strides = array<i32>} : memref<1x8x64xf32, #tpu.memory_space<vmem>>, vector<1x8x64xf32>,
    return
  }
  func.func @transform_0(%arg0: i32) -> (i32, i32, i32) {
    %c0_i32 = arith.constant 0 : i32
    %c0_i32_0 = arith.constant 0 : i32
    %c0_i32_1 = arith.constant 0 : i32
    return %arg0, %c0_i32, %c0_i32_0 : i32, i32, i32
  }
  func.func @transform_1(%arg0: i32) -> (i32, i32, i32) {
    %c0_i32 = arith.constant 0 : i32
    %c0_i32_0 = arith.constant 0 : i32
    %c0_i32_1 = arith.constant 0 : i32
    return %arg0, %c0_i32, %c0_i32_0 : i32, i32, i32
  }
  func.func @transform_2(%arg0: i32) -> (i32, i32) {
    %c0_i32 = arith.constant 0 : i32
    %c0_i32_0 = arith.constant 0 : i32
    %c0_i32_1 = arith.constant 0 : i32
    return %c0_i32, %c0_i32_0 : i32, i32
  }
  func.func @transform_3(%arg0: i32) -> (i32, i32) {
    %c0_i32 = arith.constant 0 : i32
    %c0_i32_0 = arith.constant 0 : i32
    %c0_i32_1 = arith.constant 0 : i32
    return %c0_i32, %c0_i32_0 : i32, i32
  }
  func.func @transform_4(%arg0: i32) -> (i32, i32) {
    %c0_i32 = arith.constant 0 : i32
    %c0_i32_0 = arith.constant 0 : i32
    %c0_i32_1 = arith.constant 0 : i32
    return %c0_i32, %c0_i32_0 : i32, i32
  }
  func.func @transform_5(%arg0: i32) -> (i32, i32) {
    %c0_i32 = arith.constant 0 : i32
    %c0_i32_0 = arith.constant 0 : i32
    %c0_i32_1 = arith.constant 0 : i32
    return %c0_i32, %c0_i32_0 : i32, i32
  }
  func.func @transform_6(%arg0: i32) -> (i32, i32) {
    %c0_i32 = arith.constant 0 : i32
    %c0_i32_0 = arith.constant 0 : i32
    %c0_i32_1 = arith.constant 0 : i32
    return %c0_i32, %c0_i32_0 : i32, i32
  }
  func.func @transform_7(%arg0: i32) -> (i32, i32) {
    %c0_i32 = arith.constant 0 : i32
    %c0_i32_0 = arith.constant 0 : i32
    %c0_i32_1 = arith.constant 0 : i32
    return %c0_i32, %c0_i32_0 : i32, i32
  }
  func.func @transform_8(%arg0: i32) -> (i32, i32, i32) {
    %c0_i32 = arith.constant 0 : i32
    %c0_i32_0 = arith.constant 0 : i32
    %c0_i32_1 = arith.constant 0 : i32
    return %arg0, %c0_i32, %c0_i32_0 : i32, i32, i32
  }
  func.func @transform_9(%arg0: i32) -> (i32, i32, i32) {
    %c0_i32 = arith.constant 0 : i32
    %c0_i32_0 = arith.constant 0 : i32
    %c0_i32_1 = arith.constant 0 : i32
    return %arg0, %c0_i32, %c0_i32_0 : i32, i32, i32
  }
  func.func @transform_10(%arg0: i32) -> (i32, i32, i32) {
    %c0_i32 = arith.constant 0 : i32
    %c0_i32_0 = arith.constant 0 : i32
    %c0_i32_1 = arith.constant 0 : i32
    return %arg0, %c0_i32, %c0_i32_0 : i32, i32, i32
  }
}

module attributes {stable_mosaic.version = 11 : i64} {
  func.func @_stack_kernel(%arg0: i32, %arg1: i32, %arg2: memref<1x9x64xf32, #tpu.memory_space<vmem>>, %arg3: memref<1x200x256xf32, #tpu.memory_space<vmem>>, %arg4: memref<2x64xf32, #tpu.memory_space<vmem>>, %arg5: memref<64x775xf32, #tpu.memory_space<vmem>>, %arg6: memref<1x775xf32, #tpu.memory_space<vmem>>, %arg7: memref<1x3x775xf32, #tpu.memory_space<vmem>>, %arg8: memref<9x64xf32, #tpu.memory_space<vmem>>) attributes {dimension_semantics = [#tpu.dimension_semantics<parallel>, #tpu.dimension_semantics<arbitrary>], iteration_bounds = array<i64: 2, 2>, scalar_prefetch = 0 : i64, scratch_operands = 1 : i64, tpu.core_type = #tpu.core_type<tc>, window_params = [{transform_indices = @transform_0, window_bounds = array<i64: 1, 9, 64>}, {transform_indices = @transform_1, window_bounds = array<i64: 1, 200, 256>}, {pipeline_mode = #tpu.pipeline_mode<synchronous>, transform_indices = @transform_2, window_bounds = array<i64: 2, 64>}, {pipeline_mode = #tpu.pipeline_mode<synchronous>, transform_indices = @transform_3, window_bounds = array<i64: 64, 775>}, {pipeline_mode = #tpu.pipeline_mode<synchronous>, transform_indices = @transform_4, window_bounds = array<i64: 1, 775>}, {transform_indices = @transform_5, window_bounds = array<i64: 1, 3, 775>}]} {
    %c0_i32 = arith.constant 0 : i32
    %0 = arith.cmpi eq, %arg1, %c0_i32 : i32
    %1 = arith.extui %0 : i1 to i32
    %c0_i32_0 = arith.constant 0 : i32
    %2 = arith.cmpi ne, %1, %c0_i32_0 : i32
    scf.if %2 {
      %c0_54 = arith.constant 0 : index
      %c0_55 = arith.constant 0 : index
      %c0_56 = arith.constant 0 : index
      %198 = vector.load %arg2[%c0_54, %c0_55, %c0_56] : memref<1x9x64xf32, #tpu.memory_space<vmem>>, vector<1x9x64xf32>
      %199 = vector.shape_cast %198 : vector<1x9x64xf32> to vector<9x64xf32>
      %c0_57 = arith.constant 0 : index
      %c0_58 = arith.constant 0 : index
      %200 = vector.load %arg8[%c0_57, %c0_58] : memref<9x64xf32, #tpu.memory_space<vmem>>, vector<9x64xf32>
      tpu.vector_store %arg8[%c0_57, %c0_58], %199 {strides = array<i32>} : memref<9x64xf32, #tpu.memory_space<vmem>>, vector<9x64xf32>,
    } else {
    }
    %c0 = arith.constant 0 : index
    %c0_1 = arith.constant 0 : index
    %3 = vector.load %arg8[%c0, %c0_1] : memref<9x64xf32, #tpu.memory_space<vmem>>, vector<9x64xf32>
    %c0_2 = arith.constant 0 : index
    %c0_3 = arith.constant 0 : index
    %c0_4 = arith.constant 0 : index
    %4 = vector.load %arg3[%c0_2, %c0_3, %c0_4] : memref<1x200x256xf32, #tpu.memory_space<vmem>>, vector<1x64x256xf32>
    %5 = vector.shape_cast %4 : vector<1x64x256xf32> to vector<64x256xf32>
    %c0_5 = arith.constant 0 : index
    %c64 = arith.constant 64 : index
    %c0_6 = arith.constant 0 : index
    %6 = vector.load %arg3[%c0_5, %c64, %c0_6] : memref<1x200x256xf32, #tpu.memory_space<vmem>>, vector<1x64x256xf32>
    %7 = vector.shape_cast %6 : vector<1x64x256xf32> to vector<64x256xf32>
    %c0_7 = arith.constant 0 : index
    %c128 = arith.constant 128 : index
    %c0_8 = arith.constant 0 : index
    %8 = vector.load %arg3[%c0_7, %c128, %c0_8] : memref<1x200x256xf32, #tpu.memory_space<vmem>>, vector<1x64x256xf32>
    %9 = vector.shape_cast %8 : vector<1x64x256xf32> to vector<64x256xf32>
    %c0_9 = arith.constant 0 : index
    %c192 = arith.constant 192 : index
    %c0_10 = arith.constant 0 : index
    %10 = vector.load %arg3[%c0_9, %c192, %c0_10] : memref<1x200x256xf32, #tpu.memory_space<vmem>>, vector<1x8x256xf32>
    %11 = vector.shape_cast %10 : vector<1x8x256xf32> to vector<8x256xf32>
    %12 = vector.extract_strided_slice %5 {offsets = [0, 0], sizes = [64, 192], strides = [1, 1]} : vector<64x256xf32> to vector<64x192xf32>
    %13 = vector.extract_strided_slice %5 {offsets = [0, 192], sizes = [64, 64], strides = [1, 1]} : vector<64x256xf32> to vector<64x64xf32>
    %14 = vector.extract_strided_slice %11 {offsets = [0, 0], sizes = [1, 64], strides = [1, 1]} : vector<8x256xf32> to vector<1x64xf32>
    %15 = vector.extract_strided_slice %11 {offsets = [1, 0], sizes = [1, 64], strides = [1, 1]} : vector<8x256xf32> to vector<1x64xf32>
    %16 = vector.extract_strided_slice %11 {offsets = [2, 0], sizes = [1, 192], strides = [1, 1]} : vector<8x256xf32> to vector<1x192xf32>
    %17 = vector.extract_strided_slice %11 {offsets = [3, 0], sizes = [1, 256], strides = [1, 1]} : vector<8x256xf32> to vector<1x256xf32>
    %18 = vector.extract_strided_slice %11 {offsets = [4, 0], sizes = [1, 64], strides = [1, 1]} : vector<8x256xf32> to vector<1x64xf32>
    %19 = vector.extract_strided_slice %11 {offsets = [5, 0], sizes = [1, 64], strides = [1, 1]} : vector<8x256xf32> to vector<1x64xf32>
    %20 = vector.extract_strided_slice %11 {offsets = [6, 0], sizes = [1, 64], strides = [1, 1]} : vector<8x256xf32> to vector<1x64xf32>
    %21 = vector.extract_strided_slice %11 {offsets = [7, 0], sizes = [1, 64], strides = [1, 1]} : vector<8x256xf32> to vector<1x64xf32>
    %cst = arith.constant dense<0.000000e+00> : vector<9xf32>
    %22 = vector.multi_reduction <add>, %3, %cst [1] : vector<9x64xf32> to vector<9xf32>
    %23 = vector.shape_cast %22 : vector<9xf32> to vector<9x1xf32>
    %cst_11 = arith.constant 6.400000e+01 : f32
    %24 = vector.broadcast %cst_11 : f32 to vector<9x1xf32>
    %25 = arith.divf %23, %24 : vector<9x1xf32>
    %26 = vector.broadcast %25 : vector<9x1xf32> to vector<9x64xf32>
    %27 = arith.subf %3, %26 : vector<9x64xf32>
    %28 = arith.mulf %27, %27 : vector<9x64xf32>
    %cst_12 = arith.constant dense<0.000000e+00> : vector<9xf32>
    %29 = vector.multi_reduction <add>, %28, %cst_12 [1] : vector<9x64xf32> to vector<9xf32>
    %30 = vector.shape_cast %29 : vector<9xf32> to vector<9x1xf32>
    %cst_13 = arith.constant 6.400000e+01 : f32
    %31 = vector.broadcast %cst_13 : f32 to vector<9x1xf32>
    %32 = arith.divf %30, %31 : vector<9x1xf32>
    %33 = vector.broadcast %25 : vector<9x1xf32> to vector<9x64xf32>
    %34 = arith.subf %3, %33 : vector<9x64xf32>
    %cst_14 = arith.constant 9.99999974E-6 : f32
    %35 = vector.broadcast %cst_14 : f32 to vector<9x1xf32>
    %36 = arith.addf %32, %35 : vector<9x1xf32>
    %37 = math.rsqrt %36 : vector<9x1xf32>
    %38 = vector.broadcast %37 : vector<9x1xf32> to vector<9x64xf32>
    %39 = arith.mulf %34, %38 : vector<9x64xf32>
    %40 = vector.broadcast %14 : vector<1x64xf32> to vector<9x64xf32>
    %41 = arith.mulf %39, %40 : vector<9x64xf32>
    %42 = vector.broadcast %15 : vector<1x64xf32> to vector<9x64xf32>
    %43 = arith.addf %41, %42 : vector<9x64xf32>
    %44 = arith.truncf %43 : vector<9x64xf32> to vector<9x64xbf16>
    %45 = arith.truncf %12 : vector<64x192xf32> to vector<64x192xbf16>
    %cst_15 = arith.constant dense<0.000000e+00> : vector<9x192xf32>
    %46 = tpu.matmul %44, %45, %cst_15 {dimension_numbers = #tpu.dot_dimension_numbers<[1], [0], [0], [1], [0, 0, 1, 1], [], []>} : vector<9x64xbf16>, vector<64x192xbf16>, vector<9x192xf32> -> vector<9x192xf32>
    %47 = vector.broadcast %16 : vector<1x192xf32> to vector<9x192xf32>
    %48 = arith.addf %46, %47 : vector<9x192xf32>
    %cst_16 = arith.constant 0.000000e+00 : f32
    %49 = vector.broadcast %cst_16 : f32 to vector<9x64xf32>
    %50 = vector.extract_strided_slice %48 {offsets = [0, 0], sizes = [9, 16], strides = [1, 1]} : vector<9x192xf32> to vector<9x16xf32>
    %51 = vector.extract_strided_slice %48 {offsets = [0, 64], sizes = [9, 16], strides = [1, 1]} : vector<9x192xf32> to vector<9x16xf32>
    %52 = vector.extract_strided_slice %48 {offsets = [0, 128], sizes = [9, 16], strides = [1, 1]} : vector<9x192xf32> to vector<9x16xf32>
    %53 = arith.truncf %50 : vector<9x16xf32> to vector<9x16xbf16>
    %54 = arith.truncf %51 : vector<9x16xf32> to vector<9x16xbf16>
    "tpu.trace_start"() <{level = 10 : i32, message = "qd,kd->qk"}> : () -> ()
    %cst_17 = arith.constant dense<0.000000e+00> : vector<9x9xf32>
    %55 = tpu.matmul %53, %54, %cst_17 {dimension_numbers = #tpu.dot_dimension_numbers<[1], [1], [0], [0], [0, 0, 1, 0], [], []>} : vector<9x16xbf16>, vector<9x16xbf16>, vector<9x9xf32> -> vector<9x9xf32>
    "tpu.trace_stop"() : () -> ()
    %cst_18 = arith.constant 2.500000e-01 : f32
    %56 = vector.broadcast %cst_18 : f32 to vector<9x9xf32>
    %57 = arith.mulf %55, %56 : vector<9x9xf32>
    %cst_19 = arith.constant dense<0xFF800000> : vector<9xf32>
    %58 = vector.multi_reduction <maximumf>, %57, %cst_19 [1] : vector<9x9xf32> to vector<9xf32>
    %59 = vector.shape_cast %58 : vector<9xf32> to vector<9x1xf32>
    %60 = vector.broadcast %59 : vector<9x1xf32> to vector<9x9xf32>
    %61 = arith.subf %57, %60 : vector<9x9xf32>
    %62 = math.exp %61 : vector<9x9xf32>
    %cst_20 = arith.constant dense<0.000000e+00> : vector<9xf32>
    %63 = vector.multi_reduction <add>, %62, %cst_20 [1] : vector<9x9xf32> to vector<9xf32>
    %64 = vector.shape_cast %63 : vector<9xf32> to vector<9x1xf32>
    %65 = vector.broadcast %64 : vector<9x1xf32> to vector<9x9xf32>
    %66 = arith.divf %62, %65 : vector<9x9xf32>
    %67 = arith.truncf %66 : vector<9x9xf32> to vector<9x9xbf16>
    %68 = arith.truncf %52 : vector<9x16xf32> to vector<9x16xbf16>
    %cst_21 = arith.constant dense<0.000000e+00> : vector<9x16xf32>
    %69 = tpu.matmul %67, %68, %cst_21 {dimension_numbers = #tpu.dot_dimension_numbers<[1], [0], [0], [1], [0, 0, 1, 1], [], []>} : vector<9x9xbf16>, vector<9x16xbf16>, vector<9x16xf32> -> vector<9x16xf32>
    %70 = vector.extract_strided_slice %13 {offsets = [0, 0], sizes = [16, 64], strides = [1, 1]} : vector<64x64xf32> to vector<16x64xf32>
    %71 = arith.truncf %69 : vector<9x16xf32> to vector<9x16xbf16>
    %72 = arith.truncf %70 : vector<16x64xf32> to vector<16x64xbf16>
    %cst_22 = arith.constant dense<0.000000e+00> : vector<9x64xf32>
    %73 = tpu.matmul %71, %72, %cst_22 {dimension_numbers = #tpu.dot_dimension_numbers<[1], [0], [0], [1], [0, 0, 1, 1], [], []>} : vector<9x16xbf16>, vector<16x64xbf16>, vector<9x64xf32> -> vector<9x64xf32>
    %74 = arith.addf %49, %73 : vector<9x64xf32>
    %75 = vector.extract_strided_slice %48 {offsets = [0, 16], sizes = [9, 16], strides = [1, 1]} : vector<9x192xf32> to vector<9x16xf32>
    %76 = vector.extract_strided_slice %48 {offsets = [0, 80], sizes = [9, 16], strides = [1, 1]} : vector<9x192xf32> to vector<9x16xf32>
    %77 = vector.extract_strided_slice %48 {offsets = [0, 144], sizes = [9, 16], strides = [1, 1]} : vector<9x192xf32> to vector<9x16xf32>
    %78 = arith.truncf %75 : vector<9x16xf32> to vector<9x16xbf16>
    %79 = arith.truncf %76 : vector<9x16xf32> to vector<9x16xbf16>
    "tpu.trace_start"() <{level = 10 : i32, message = "qd,kd->qk"}> : () -> ()
    %cst_23 = arith.constant dense<0.000000e+00> : vector<9x9xf32>
    %80 = tpu.matmul %78, %79, %cst_23 {dimension_numbers = #tpu.dot_dimension_numbers<[1], [1], [0], [0], [0, 0, 1, 0], [], []>} : vector<9x16xbf16>, vector<9x16xbf16>, vector<9x9xf32> -> vector<9x9xf32>
    "tpu.trace_stop"() : () -> ()
    %cst_24 = arith.constant 2.500000e-01 : f32
    %81 = vector.broadcast %cst_24 : f32 to vector<9x9xf32>
    %82 = arith.mulf %80, %81 : vector<9x9xf32>
    %cst_25 = arith.constant dense<0xFF800000> : vector<9xf32>
    %83 = vector.multi_reduction <maximumf>, %82, %cst_25 [1] : vector<9x9xf32> to vector<9xf32>
    %84 = vector.shape_cast %83 : vector<9xf32> to vector<9x1xf32>
    %85 = vector.broadcast %84 : vector<9x1xf32> to vector<9x9xf32>
    %86 = arith.subf %82, %85 : vector<9x9xf32>
    %87 = math.exp %86 : vector<9x9xf32>
    %cst_26 = arith.constant dense<0.000000e+00> : vector<9xf32>
    %88 = vector.multi_reduction <add>, %87, %cst_26 [1] : vector<9x9xf32> to vector<9xf32>
    %89 = vector.shape_cast %88 : vector<9xf32> to vector<9x1xf32>
    %90 = vector.broadcast %89 : vector<9x1xf32> to vector<9x9xf32>
    %91 = arith.divf %87, %90 : vector<9x9xf32>
    %92 = arith.truncf %91 : vector<9x9xf32> to vector<9x9xbf16>
    %93 = arith.truncf %77 : vector<9x16xf32> to vector<9x16xbf16>
    %cst_27 = arith.constant dense<0.000000e+00> : vector<9x16xf32>
    %94 = tpu.matmul %92, %93, %cst_27 {dimension_numbers = #tpu.dot_dimension_numbers<[1], [0], [0], [1], [0, 0, 1, 1], [], []>} : vector<9x9xbf16>, vector<9x16xbf16>, vector<9x16xf32> -> vector<9x16xf32>
    %95 = vector.extract_strided_slice %13 {offsets = [16, 0], sizes = [16, 64], strides = [1, 1]} : vector<64x64xf32> to vector<16x64xf32>
    %96 = arith.truncf %94 : vector<9x16xf32> to vector<9x16xbf16>
    %97 = arith.truncf %95 : vector<16x64xf32> to vector<16x64xbf16>
    %cst_28 = arith.constant dense<0.000000e+00> : vector<9x64xf32>
    %98 = tpu.matmul %96, %97, %cst_28 {dimension_numbers = #tpu.dot_dimension_numbers<[1], [0], [0], [1], [0, 0, 1, 1], [], []>} : vector<9x16xbf16>, vector<16x64xbf16>, vector<9x64xf32> -> vector<9x64xf32>
    %99 = arith.addf %74, %98 : vector<9x64xf32>
    %100 = vector.extract_strided_slice %48 {offsets = [0, 32], sizes = [9, 16], strides = [1, 1]} : vector<9x192xf32> to vector<9x16xf32>
    %101 = vector.extract_strided_slice %48 {offsets = [0, 96], sizes = [9, 16], strides = [1, 1]} : vector<9x192xf32> to vector<9x16xf32>
    %102 = vector.extract_strided_slice %48 {offsets = [0, 160], sizes = [9, 16], strides = [1, 1]} : vector<9x192xf32> to vector<9x16xf32>
    %103 = arith.truncf %100 : vector<9x16xf32> to vector<9x16xbf16>
    %104 = arith.truncf %101 : vector<9x16xf32> to vector<9x16xbf16>
    "tpu.trace_start"() <{level = 10 : i32, message = "qd,kd->qk"}> : () -> ()
    %cst_29 = arith.constant dense<0.000000e+00> : vector<9x9xf32>
    %105 = tpu.matmul %103, %104, %cst_29 {dimension_numbers = #tpu.dot_dimension_numbers<[1], [1], [0], [0], [0, 0, 1, 0], [], []>} : vector<9x16xbf16>, vector<9x16xbf16>, vector<9x9xf32> -> vector<9x9xf32>
    "tpu.trace_stop"() : () -> ()
    %cst_30 = arith.constant 2.500000e-01 : f32
    %106 = vector.broadcast %cst_30 : f32 to vector<9x9xf32>
    %107 = arith.mulf %105, %106 : vector<9x9xf32>
    %cst_31 = arith.constant dense<0xFF800000> : vector<9xf32>
    %108 = vector.multi_reduction <maximumf>, %107, %cst_31 [1] : vector<9x9xf32> to vector<9xf32>
    %109 = vector.shape_cast %108 : vector<9xf32> to vector<9x1xf32>
    %110 = vector.broadcast %109 : vector<9x1xf32> to vector<9x9xf32>
    %111 = arith.subf %107, %110 : vector<9x9xf32>
    %112 = math.exp %111 : vector<9x9xf32>
    %cst_32 = arith.constant dense<0.000000e+00> : vector<9xf32>
    %113 = vector.multi_reduction <add>, %112, %cst_32 [1] : vector<9x9xf32> to vector<9xf32>
    %114 = vector.shape_cast %113 : vector<9xf32> to vector<9x1xf32>
    %115 = vector.broadcast %114 : vector<9x1xf32> to vector<9x9xf32>
    %116 = arith.divf %112, %115 : vector<9x9xf32>
    %117 = arith.truncf %116 : vector<9x9xf32> to vector<9x9xbf16>
    %118 = arith.truncf %102 : vector<9x16xf32> to vector<9x16xbf16>
    %cst_33 = arith.constant dense<0.000000e+00> : vector<9x16xf32>
    %119 = tpu.matmul %117, %118, %cst_33 {dimension_numbers = #tpu.dot_dimension_numbers<[1], [0], [0], [1], [0, 0, 1, 1], [], []>} : vector<9x9xbf16>, vector<9x16xbf16>, vector<9x16xf32> -> vector<9x16xf32>
    %120 = vector.extract_strided_slice %13 {offsets = [32, 0], sizes = [16, 64], strides = [1, 1]} : vector<64x64xf32> to vector<16x64xf32>
    %121 = arith.truncf %119 : vector<9x16xf32> to vector<9x16xbf16>
    %122 = arith.truncf %120 : vector<16x64xf32> to vector<16x64xbf16>
    %cst_34 = arith.constant dense<0.000000e+00> : vector<9x64xf32>
    %123 = tpu.matmul %121, %122, %cst_34 {dimension_numbers = #tpu.dot_dimension_numbers<[1], [0], [0], [1], [0, 0, 1, 1], [], []>} : vector<9x16xbf16>, vector<16x64xbf16>, vector<9x64xf32> -> vector<9x64xf32>
    %124 = arith.addf %99, %123 : vector<9x64xf32>
    %125 = vector.extract_strided_slice %48 {offsets = [0, 48], sizes = [9, 16], strides = [1, 1]} : vector<9x192xf32> to vector<9x16xf32>
    %126 = vector.extract_strided_slice %48 {offsets = [0, 112], sizes = [9, 16], strides = [1, 1]} : vector<9x192xf32> to vector<9x16xf32>
    %127 = vector.extract_strided_slice %48 {offsets = [0, 176], sizes = [9, 16], strides = [1, 1]} : vector<9x192xf32> to vector<9x16xf32>
    %128 = arith.truncf %125 : vector<9x16xf32> to vector<9x16xbf16>
    %129 = arith.truncf %126 : vector<9x16xf32> to vector<9x16xbf16>
    "tpu.trace_start"() <{level = 10 : i32, message = "qd,kd->qk"}> : () -> ()
    %cst_35 = arith.constant dense<0.000000e+00> : vector<9x9xf32>
    %130 = tpu.matmul %128, %129, %cst_35 {dimension_numbers = #tpu.dot_dimension_numbers<[1], [1], [0], [0], [0, 0, 1, 0], [], []>} : vector<9x16xbf16>, vector<9x16xbf16>, vector<9x9xf32> -> vector<9x9xf32>
    "tpu.trace_stop"() : () -> ()
    %cst_36 = arith.constant 2.500000e-01 : f32
    %131 = vector.broadcast %cst_36 : f32 to vector<9x9xf32>
    %132 = arith.mulf %130, %131 : vector<9x9xf32>
    %cst_37 = arith.constant dense<0xFF800000> : vector<9xf32>
    %133 = vector.multi_reduction <maximumf>, %132, %cst_37 [1] : vector<9x9xf32> to vector<9xf32>
    %134 = vector.shape_cast %133 : vector<9xf32> to vector<9x1xf32>
    %135 = vector.broadcast %134 : vector<9x1xf32> to vector<9x9xf32>
    %136 = arith.subf %132, %135 : vector<9x9xf32>
    %137 = math.exp %136 : vector<9x9xf32>
    %cst_38 = arith.constant dense<0.000000e+00> : vector<9xf32>
    %138 = vector.multi_reduction <add>, %137, %cst_38 [1] : vector<9x9xf32> to vector<9xf32>
    %139 = vector.shape_cast %138 : vector<9xf32> to vector<9x1xf32>
    %140 = vector.broadcast %139 : vector<9x1xf32> to vector<9x9xf32>
    %141 = arith.divf %137, %140 : vector<9x9xf32>
    %142 = arith.truncf %141 : vector<9x9xf32> to vector<9x9xbf16>
    %143 = arith.truncf %127 : vector<9x16xf32> to vector<9x16xbf16>
    %cst_39 = arith.constant dense<0.000000e+00> : vector<9x16xf32>
    %144 = tpu.matmul %142, %143, %cst_39 {dimension_numbers = #tpu.dot_dimension_numbers<[1], [0], [0], [1], [0, 0, 1, 1], [], []>} : vector<9x9xbf16>, vector<9x16xbf16>, vector<9x16xf32> -> vector<9x16xf32>
    %145 = vector.extract_strided_slice %13 {offsets = [48, 0], sizes = [16, 64], strides = [1, 1]} : vector<64x64xf32> to vector<16x64xf32>
    %146 = arith.truncf %144 : vector<9x16xf32> to vector<9x16xbf16>
    %147 = arith.truncf %145 : vector<16x64xf32> to vector<16x64xbf16>
    %cst_40 = arith.constant dense<0.000000e+00> : vector<9x64xf32>
    %148 = tpu.matmul %146, %147, %cst_40 {dimension_numbers = #tpu.dot_dimension_numbers<[1], [0], [0], [1], [0, 0, 1, 1], [], []>} : vector<9x16xbf16>, vector<16x64xbf16>, vector<9x64xf32> -> vector<9x64xf32>
    %149 = arith.addf %124, %148 : vector<9x64xf32>
    %150 = arith.addf %3, %149 : vector<9x64xf32>
    %151 = vector.broadcast %18 : vector<1x64xf32> to vector<9x64xf32>
    %152 = arith.addf %150, %151 : vector<9x64xf32>
    %cst_41 = arith.constant dense<0.000000e+00> : vector<9xf32>
    %153 = vector.multi_reduction <add>, %152, %cst_41 [1] : vector<9x64xf32> to vector<9xf32>
    %154 = vector.shape_cast %153 : vector<9xf32> to vector<9x1xf32>
    %cst_42 = arith.constant 6.400000e+01 : f32
    %155 = vector.broadcast %cst_42 : f32 to vector<9x1xf32>
    %156 = arith.divf %154, %155 : vector<9x1xf32>
    %157 = vector.broadcast %156 : vector<9x1xf32> to vector<9x64xf32>
    %158 = arith.subf %152, %157 : vector<9x64xf32>
    %159 = arith.mulf %158, %158 : vector<9x64xf32>
    %cst_43 = arith.constant dense<0.000000e+00> : vector<9xf32>
    %160 = vector.multi_reduction <add>, %159, %cst_43 [1] : vector<9x64xf32> to vector<9xf32>
    %161 = vector.shape_cast %160 : vector<9xf32> to vector<9x1xf32>
    %cst_44 = arith.constant 6.400000e+01 : f32
    %162 = vector.broadcast %cst_44 : f32 to vector<9x1xf32>
    %163 = arith.divf %161, %162 : vector<9x1xf32>
    %164 = vector.broadcast %156 : vector<9x1xf32> to vector<9x64xf32>
    %165 = arith.subf %152, %164 : vector<9x64xf32>
    %cst_45 = arith.constant 9.99999974E-6 : f32
    %166 = vector.broadcast %cst_45 : f32 to vector<9x1xf32>
    %167 = arith.addf %163, %166 : vector<9x1xf32>
    %168 = math.rsqrt %167 : vector<9x1xf32>
    %169 = vector.broadcast %168 : vector<9x1xf32> to vector<9x64xf32>
    %170 = arith.mulf %165, %169 : vector<9x64xf32>
    %171 = vector.broadcast %19 : vector<1x64xf32> to vector<9x64xf32>
    %172 = arith.mulf %170, %171 : vector<9x64xf32>
    %173 = vector.broadcast %20 : vector<1x64xf32> to vector<9x64xf32>
    %174 = arith.addf %172, %173 : vector<9x64xf32>
    %175 = arith.truncf %174 : vector<9x64xf32> to vector<9x64xbf16>
    %176 = arith.truncf %7 : vector<64x256xf32> to vector<64x256xbf16>
    %cst_46 = arith.constant dense<0.000000e+00> : vector<9x256xf32>
    %177 = tpu.matmul %175, %176, %cst_46 {dimension_numbers = #tpu.dot_dimension_numbers<[1], [0], [0], [1], [0, 0, 1, 1], [], []>} : vector<9x64xbf16>, vector<64x256xbf16>, vector<9x256xf32> -> vector<9x256xf32>
    %178 = vector.broadcast %17 : vector<1x256xf32> to vector<9x256xf32>
    %179 = arith.addf %177, %178 : vector<9x256xf32>
    %cst_47 = arith.constant 5.000000e-01 : f32
    %180 = vector.broadcast %cst_47 : f32 to vector<9x256xf32>
    %181 = arith.mulf %180, %179 : vector<9x256xf32>
    %cst_48 = arith.constant 0.707106769 : f32
    %182 = vector.broadcast %cst_48 : f32 to vector<9x256xf32>
    %183 = arith.mulf %179, %182 : vector<9x256xf32>
    %184 = math.erf %183 : vector<9x256xf32>
    %cst_49 = arith.constant 1.000000e+00 : f32
    %185 = vector.broadcast %cst_49 : f32 to vector<9x256xf32>
    %186 = arith.addf %185, %184 : vector<9x256xf32>
    %187 = arith.mulf %181, %186 : vector<9x256xf32>
    %188 = arith.truncf %187 : vector<9x256xf32> to vector<9x256xbf16>
    %189 = arith.truncf %9 : vector<64x256xf32> to vector<64x256xbf16>
    "tpu.trace_start"() <{level = 10 : i32, message = "sk,ek->se"}> : () -> ()
    %cst_50 = arith.constant dense<0.000000e+00> : vector<9x64xf32>
    %190 = tpu.matmul %188, %189, %cst_50 {dimension_numbers = #tpu.dot_dimension_numbers<[1], [1], [0], [0], [0, 0, 1, 0], [], []>} : vector<9x256xbf16>, vector<64x256xbf16>, vector<9x64xf32> -> vector<9x64xf32>
    "tpu.trace_stop"() : () -> ()
    %191 = vector.broadcast %21 : vector<1x64xf32> to vector<9x64xf32>
    %192 = arith.addf %190, %191 : vector<9x64xf32>
    %193 = arith.addf %152, %192 : vector<9x64xf32>
    %c0_51 = arith.constant 0 : index
    %c0_52 = arith.constant 0 : index
    %194 = vector.load %arg8[%c0_51, %c0_52] : memref<9x64xf32, #tpu.memory_space<vmem>>, vector<9x64xf32>
    tpu.vector_store %arg8[%c0_51, %c0_52], %193 {strides = array<i32>} : memref<9x64xf32, #tpu.memory_space<vmem>>, vector<9x64xf32>,
    %c1_i32 = arith.constant 1 : i32
    %195 = arith.cmpi eq, %arg1, %c1_i32 : i32
    %196 = arith.extui %195 : i1 to i32
    %c0_i32_53 = arith.constant 0 : i32
    %197 = arith.cmpi ne, %196, %c0_i32_53 : i32
    scf.if %197 {
      %c0_54 = arith.constant 0 : index
      %c0_55 = arith.constant 0 : index
      %198 = vector.load %arg4[%c0_54, %c0_55] : memref<2x64xf32, #tpu.memory_space<vmem>>, vector<2x64xf32>
      %199 = vector.extract_strided_slice %193 {offsets = [0, 0], sizes = [3, 64], strides = [1, 1]} : vector<9x64xf32> to vector<3x64xf32>
      %200 = vector.extract_strided_slice %198 {offsets = [0, 0], sizes = [1, 64], strides = [1, 1]} : vector<2x64xf32> to vector<1x64xf32>
      %201 = vector.extract_strided_slice %198 {offsets = [1, 0], sizes = [1, 64], strides = [1, 1]} : vector<2x64xf32> to vector<1x64xf32>
      %cst_56 = arith.constant dense<0.000000e+00> : vector<3xf32>
      %202 = vector.multi_reduction <add>, %199, %cst_56 [1] : vector<3x64xf32> to vector<3xf32>
      %203 = vector.shape_cast %202 : vector<3xf32> to vector<3x1xf32>
      %cst_57 = arith.constant 6.400000e+01 : f32
      %204 = vector.broadcast %cst_57 : f32 to vector<3x1xf32>
      %205 = arith.divf %203, %204 : vector<3x1xf32>
      %206 = vector.broadcast %205 : vector<3x1xf32> to vector<3x64xf32>
      %207 = arith.subf %199, %206 : vector<3x64xf32>
      %208 = arith.mulf %207, %207 : vector<3x64xf32>
      %cst_58 = arith.constant dense<0.000000e+00> : vector<3xf32>
      %209 = vector.multi_reduction <add>, %208, %cst_58 [1] : vector<3x64xf32> to vector<3xf32>
      %210 = vector.shape_cast %209 : vector<3xf32> to vector<3x1xf32>
      %cst_59 = arith.constant 6.400000e+01 : f32
      %211 = vector.broadcast %cst_59 : f32 to vector<3x1xf32>
      %212 = arith.divf %210, %211 : vector<3x1xf32>
      %213 = vector.broadcast %205 : vector<3x1xf32> to vector<3x64xf32>
      %214 = arith.subf %199, %213 : vector<3x64xf32>
      %cst_60 = arith.constant 9.99999974E-6 : f32
      %215 = vector.broadcast %cst_60 : f32 to vector<3x1xf32>
      %216 = arith.addf %212, %215 : vector<3x1xf32>
      %217 = math.rsqrt %216 : vector<3x1xf32>
      %218 = vector.broadcast %217 : vector<3x1xf32> to vector<3x64xf32>
      %219 = arith.mulf %214, %218 : vector<3x64xf32>
      %220 = vector.broadcast %200 : vector<1x64xf32> to vector<3x64xf32>
      %221 = arith.mulf %219, %220 : vector<3x64xf32>
      %222 = vector.broadcast %201 : vector<1x64xf32> to vector<3x64xf32>
      %223 = arith.addf %221, %222 : vector<3x64xf32>
      %c0_61 = arith.constant 0 : index
      %c0_62 = arith.constant 0 : index
      %224 = vector.load %arg5[%c0_61, %c0_62] : memref<64x775xf32, #tpu.memory_space<vmem>>, vector<64x775xf32>
      %225 = arith.truncf %223 : vector<3x64xf32> to vector<3x64xbf16>
      %226 = arith.truncf %224 : vector<64x775xf32> to vector<64x775xbf16>
      %cst_63 = arith.constant dense<0.000000e+00> : vector<3x775xf32>
      %227 = tpu.matmul %225, %226, %cst_63 {dimension_numbers = #tpu.dot_dimension_numbers<[1], [0], [0], [1], [0, 0, 1, 1], [], []>} : vector<3x64xbf16>, vector<64x775xbf16>, vector<3x775xf32> -> vector<3x775xf32>
      %c0_64 = arith.constant 0 : index
      %c0_65 = arith.constant 0 : index
      %228 = vector.load %arg6[%c0_64, %c0_65] : memref<1x775xf32, #tpu.memory_space<vmem>>, vector<1x775xf32>
      %229 = vector.broadcast %228 : vector<1x775xf32> to vector<3x775xf32>
      %230 = arith.addf %227, %229 : vector<3x775xf32>
      %c0_66 = arith.constant 0 : index
      %c0_67 = arith.constant 0 : index
      %c0_68 = arith.constant 0 : index
      %231 = vector.load %arg7[%c0_66, %c0_67, %c0_68] : memref<1x3x775xf32, #tpu.memory_space<vmem>>, vector<1x3x775xf32>
      %232 = vector.shape_cast %231 : vector<1x3x775xf32> to vector<3x775xf32>
      %233 = vector.shape_cast %230 : vector<3x775xf32> to vector<1x3x775xf32>
      tpu.vector_store %arg7[%c0_66, %c0_67, %c0_68], %233 {strides = array<i32>} : memref<1x3x775xf32, #tpu.memory_space<vmem>>, vector<1x3x775xf32>,
    } else {
    }
    return
  }
  func.func @transform_0(%arg0: i32, %arg1: i32) -> (i32, i32, i32) {
    %c0_i32 = arith.constant 0 : i32
    %c0_i32_0 = arith.constant 0 : i32
    %c0_i32_1 = arith.constant 0 : i32
    return %arg0, %c0_i32, %c0_i32_0 : i32, i32, i32
  }
  func.func @transform_1(%arg0: i32, %arg1: i32) -> (i32, i32, i32) {
    %c0_i32 = arith.constant 0 : i32
    %c0_i32_0 = arith.constant 0 : i32
    %c0_i32_1 = arith.constant 0 : i32
    return %arg1, %c0_i32, %c0_i32_0 : i32, i32, i32
  }
  func.func @transform_2(%arg0: i32, %arg1: i32) -> (i32, i32) {
    %c0_i32 = arith.constant 0 : i32
    %c0_i32_0 = arith.constant 0 : i32
    %c0_i32_1 = arith.constant 0 : i32
    return %c0_i32, %c0_i32_0 : i32, i32
  }
  func.func @transform_3(%arg0: i32, %arg1: i32) -> (i32, i32) {
    %c0_i32 = arith.constant 0 : i32
    %c0_i32_0 = arith.constant 0 : i32
    %c0_i32_1 = arith.constant 0 : i32
    return %c0_i32, %c0_i32_0 : i32, i32
  }
  func.func @transform_4(%arg0: i32, %arg1: i32) -> (i32, i32) {
    %c0_i32 = arith.constant 0 : i32
    %c0_i32_0 = arith.constant 0 : i32
    %c0_i32_1 = arith.constant 0 : i32
    return %c0_i32, %c0_i32_0 : i32, i32
  }
  func.func @transform_5(%arg0: i32, %arg1: i32) -> (i32, i32, i32) {
    %c0_i32 = arith.constant 0 : i32
    %c0_i32_0 = arith.constant 0 : i32
    %c0_i32_1 = arith.constant 0 : i32
    return %arg0, %c0_i32, %c0_i32_0 : i32, i32, i32
  }
}

module attributes {stable_mosaic.version = 11 : i64} {
  func.func @_loss_kernel(%arg0: i32, %arg1: memref<1x45x3xf32, #tpu.memory_space<vmem>>, %arg2: memref<1x1x3xf32, #tpu.memory_space<vmem>>, %arg3: memref<1x3x192xf32, #tpu.memory_space<vmem>>, %arg4: memref<1x1x640xf32, #tpu.memory_space<vmem>>, %arg5: memref<1x1x640xf32, #tpu.memory_space<vmem>>, %arg6: memref<1x1x3xf32, #tpu.memory_space<vmem>>) attributes {dimension_semantics = [#tpu.dimension_semantics<parallel>], iteration_bounds = array<i64: 6>, scalar_prefetch = 0 : i64, scratch_operands = 0 : i64, tpu.core_type = #tpu.core_type<tc>, window_params = [{transform_indices = @transform_0, window_bounds = array<i64: 1, 45, 3>}, {transform_indices = @transform_1, window_bounds = array<i64: 1, 1, 3>}, {transform_indices = @transform_2, window_bounds = array<i64: 1, 3, 192>}, {transform_indices = @transform_3, window_bounds = array<i64: 1, 1, 640>}, {transform_indices = @transform_4, window_bounds = array<i64: 1, 1, 640>}, {transform_indices = @transform_5, window_bounds = array<i64: 1, 1, 3>}]} {
    %c0 = arith.constant 0 : index
    %c0_0 = arith.constant 0 : index
    %c0_1 = arith.constant 0 : index
    %0 = vector.load %arg1[%c0, %c0_0, %c0_1] : memref<1x45x3xf32, #tpu.memory_space<vmem>>, vector<1x45x3xf32>
    %1 = vector.shape_cast %0 : vector<1x45x3xf32> to vector<45x3xf32>
    %c0_2 = arith.constant 0 : index
    %c0_3 = arith.constant 0 : index
    %c0_4 = arith.constant 0 : index
    %2 = vector.load %arg2[%c0_2, %c0_3, %c0_4] : memref<1x1x3xf32, #tpu.memory_space<vmem>>, vector<1x1x3xf32>
    %3 = vector.shape_cast %2 : vector<1x1x3xf32> to vector<1x3xf32>
    %4 = vector.broadcast %3 : vector<1x3xf32> to vector<45x3xf32>
    %5 = arith.addf %1, %4 : vector<45x3xf32>
    %c0_5 = arith.constant 0 : index
    %c0_6 = arith.constant 0 : index
    %c0_7 = arith.constant 0 : index
    %6 = vector.load %arg3[%c0_5, %c0_6, %c0_7] : memref<1x3x192xf32, #tpu.memory_space<vmem>>, vector<1x3x192xf32>
    %7 = vector.shape_cast %6 : vector<1x3x192xf32> to vector<3x192xf32>
    %8 = vector.extract_strided_slice %5 {offsets = [0, 0], sizes = [45, 1], strides = [1, 1]} : vector<45x3xf32> to vector<45x1xf32>
    %9 = vector.extract_strided_slice %7 {offsets = [0, 0], sizes = [1, 192], strides = [1, 1]} : vector<3x192xf32> to vector<1x192xf32>
    %10 = vector.broadcast %8 : vector<45x1xf32> to vector<45x192xf32>
    %11 = vector.broadcast %9 : vector<1x192xf32> to vector<45x192xf32>
    %12 = arith.subf %10, %11 : vector<45x192xf32>
    %13 = arith.mulf %12, %12 : vector<45x192xf32>
    %14 = vector.extract_strided_slice %5 {offsets = [0, 1], sizes = [45, 1], strides = [1, 1]} : vector<45x3xf32> to vector<45x1xf32>
    %15 = vector.extract_strided_slice %7 {offsets = [1, 0], sizes = [1, 192], strides = [1, 1]} : vector<3x192xf32> to vector<1x192xf32>
    %16 = vector.broadcast %14 : vector<45x1xf32> to vector<45x192xf32>
    %17 = vector.broadcast %15 : vector<1x192xf32> to vector<45x192xf32>
    %18 = arith.subf %16, %17 : vector<45x192xf32>
    %19 = arith.mulf %18, %18 : vector<45x192xf32>
    %20 = arith.addf %13, %19 : vector<45x192xf32>
    %21 = vector.extract_strided_slice %5 {offsets = [0, 2], sizes = [45, 1], strides = [1, 1]} : vector<45x3xf32> to vector<45x1xf32>
    %22 = vector.extract_strided_slice %7 {offsets = [2, 0], sizes = [1, 192], strides = [1, 1]} : vector<3x192xf32> to vector<1x192xf32>
    %23 = vector.broadcast %21 : vector<45x1xf32> to vector<45x192xf32>
    %24 = vector.broadcast %22 : vector<1x192xf32> to vector<45x192xf32>
    %25 = arith.subf %23, %24 : vector<45x192xf32>
    %26 = arith.mulf %25, %25 : vector<45x192xf32>
    %27 = arith.addf %20, %26 : vector<45x192xf32>
    %cst = arith.constant dense<0x7F800000> : vector<45xf32>
    %28 = vector.multi_reduction <minimumf>, %27, %cst [1] : vector<45x192xf32> to vector<45xf32>
    %29 = vector.shape_cast %28 : vector<45xf32> to vector<45x1xf32>
    %30 = math.sqrt %29 : vector<45x1xf32>
    %cst_8 = arith.constant dense<0.000000e+00> : vector<1xf32>
    %31 = vector.multi_reduction <add>, %30, %cst_8 [0] : vector<45x1xf32> to vector<1xf32>
    %32 = vector.shape_cast %31 : vector<1xf32> to vector<1x1xf32>
    %cst_9 = arith.constant dense<0x7F800000> : vector<192xf32>
    %33 = vector.multi_reduction <minimumf>, %27, %cst_9 [0] : vector<45x192xf32> to vector<192xf32>
    %34 = vector.shape_cast %33 : vector<192xf32> to vector<1x192xf32>
    %35 = math.sqrt %34 : vector<1x192xf32>
    %cst_10 = arith.constant dense<0.000000e+00> : vector<1xf32>
    %36 = vector.multi_reduction <add>, %35, %cst_10 [1] : vector<1x192xf32> to vector<1xf32>
    %37 = vector.shape_cast %36 : vector<1xf32> to vector<1x1xf32>
    %c0_11 = arith.constant 0 : index
    %c0_12 = arith.constant 0 : index
    %c0_13 = arith.constant 0 : index
    %38 = vector.load %arg4[%c0_11, %c0_12, %c0_13] : memref<1x1x640xf32, #tpu.memory_space<vmem>>, vector<1x1x640xf32>
    %39 = vector.shape_cast %38 : vector<1x1x640xf32> to vector<1x640xf32>
    %c0_14 = arith.constant 0 : index
    %c0_15 = arith.constant 0 : index
    %c0_16 = arith.constant 0 : index
    %40 = vector.load %arg5[%c0_14, %c0_15, %c0_16] : memref<1x1x640xf32, #tpu.memory_space<vmem>>, vector<1x1x640xf32>
    %41 = vector.shape_cast %40 : vector<1x1x640xf32> to vector<1x640xf32>
    %42 = arith.subf %39, %41 : vector<1x640xf32>
    %43 = arith.mulf %42, %42 : vector<1x640xf32>
    %cst_17 = arith.constant dense<0.000000e+00> : vector<1xf32>
    %44 = vector.multi_reduction <add>, %43, %cst_17 [1] : vector<1x640xf32> to vector<1xf32>
    %45 = vector.shape_cast %44 : vector<1xf32> to vector<1x1xf32>
    %c0_18 = arith.constant 0 : index
    %c0_19 = arith.constant 0 : index
    %c0_20 = arith.constant 0 : index
    %46 = vector.load %arg6[%c0_18, %c0_19, %c0_20] : memref<1x1x3xf32, #tpu.memory_space<vmem>>, vector<1x1x1xf32>
    %47 = vector.shape_cast %46 : vector<1x1x1xf32> to vector<1x1xf32>
    %48 = vector.shape_cast %32 : vector<1x1xf32> to vector<1x1x1xf32>
    tpu.vector_store %arg6[%c0_18, %c0_19, %c0_20], %48 {strides = array<i32>} : memref<1x1x3xf32, #tpu.memory_space<vmem>>, vector<1x1x1xf32>,
    %c0_21 = arith.constant 0 : index
    %c0_22 = arith.constant 0 : index
    %c1 = arith.constant 1 : index
    %49 = vector.load %arg6[%c0_21, %c0_22, %c1] : memref<1x1x3xf32, #tpu.memory_space<vmem>>, vector<1x1x1xf32>
    %50 = vector.shape_cast %49 : vector<1x1x1xf32> to vector<1x1xf32>
    %51 = vector.shape_cast %37 : vector<1x1xf32> to vector<1x1x1xf32>
    tpu.vector_store %arg6[%c0_21, %c0_22, %c1], %51 {strides = array<i32>} : memref<1x1x3xf32, #tpu.memory_space<vmem>>, vector<1x1x1xf32>,
    %c0_23 = arith.constant 0 : index
    %c0_24 = arith.constant 0 : index
    %c2 = arith.constant 2 : index
    %52 = vector.load %arg6[%c0_23, %c0_24, %c2] : memref<1x1x3xf32, #tpu.memory_space<vmem>>, vector<1x1x1xf32>
    %53 = vector.shape_cast %52 : vector<1x1x1xf32> to vector<1x1xf32>
    %54 = vector.shape_cast %45 : vector<1x1xf32> to vector<1x1x1xf32>
    tpu.vector_store %arg6[%c0_23, %c0_24, %c2], %54 {strides = array<i32>} : memref<1x1x3xf32, #tpu.memory_space<vmem>>, vector<1x1x1xf32>,
    return
  }
  func.func @transform_0(%arg0: i32) -> (i32, i32, i32) {
    %c0_i32 = arith.constant 0 : i32
    %c0_i32_0 = arith.constant 0 : i32
    %c0_i32_1 = arith.constant 0 : i32
    return %arg0, %c0_i32, %c0_i32_0 : i32, i32, i32
  }
  func.func @transform_1(%arg0: i32) -> (i32, i32, i32) {
    %c0_i32 = arith.constant 0 : i32
    %c0_i32_0 = arith.constant 0 : i32
    %c0_i32_1 = arith.constant 0 : i32
    return %arg0, %c0_i32, %c0_i32_0 : i32, i32, i32
  }
  func.func @transform_2(%arg0: i32) -> (i32, i32, i32) {
    %c0_i32 = arith.constant 0 : i32
    %c0_i32_0 = arith.constant 0 : i32
    %c0_i32_1 = arith.constant 0 : i32
    return %arg0, %c0_i32, %c0_i32_0 : i32, i32, i32
  }
  func.func @transform_3(%arg0: i32) -> (i32, i32, i32) {
    %c0_i32 = arith.constant 0 : i32
    %c0_i32_0 = arith.constant 0 : i32
    %c0_i32_1 = arith.constant 0 : i32
    return %arg0, %c0_i32, %c0_i32_0 : i32, i32, i32
  }
  func.func @transform_4(%arg0: i32) -> (i32, i32, i32) {
    %c0_i32 = arith.constant 0 : i32
    %c0_i32_0 = arith.constant 0 : i32
    %c0_i32_1 = arith.constant 0 : i32
    return %arg0, %c0_i32, %c0_i32_0 : i32, i32, i32
  }
  func.func @transform_5(%arg0: i32) -> (i32, i32, i32) {
    %c0_i32 = arith.constant 0 : i32
    %c0_i32_0 = arith.constant 0 : i32
    %c0_i32_1 = arith.constant 0 : i32
    return %arg0, %c0_i32, %c0_i32_0 : i32, i32, i32
  }
}

</mosaic_0001>

<bundles_post_ra>
// kernel: _forward.6
= control target key start
LH: loop header
LB: loop body
LE: loop exit
PB: predicated region body
PF: predicated region fallthrough
CT: control target
= control target key end

     0   :  { %s1254_s13 = smov 0   ;;  %s1721_s0 = inlined_call_operand.vmem [shape: f32[2,8,640], index: 0, kind: input, shape index: {}]   ;;  %s1722_s1 = inlined_call_operand.vmem [shape: f32[2,8,3], index: 1, kind: input, shape index: {}]   ;;  %s1723_s2 = inlined_call_operand.vmem [shape: f32[640,64], index: 2, kind: input, shape index: {}]   ;;  %s1724_s3 = inlined_call_operand.vmem [shape: f32[3,64], index: 3, kind: input, shape index: {}]   ;;  %s1725_s4 = inlined_call_operand.vmem [shape: f32[4,128], index: 4, kind: input, shape index: {}]   ;;  %s1726_s5 = inlined_call_operand.vmem [shape: f32[129,64], index: 5, kind: input, shape index: {}]   ;;  %s1727_s6 = inlined_call_operand.vmem [shape: f32[4,128], index: 6, kind: input, shape index: {}]   ;;  %s1728_s7 = inlined_call_operand.vmem [shape: f32[129,64], index: 7, kind: input, shape index: {}]   ;;  %s1729_s8 = inlined_call_operand.vmem [shape: f32[2,8,64], index: 8, kind: output, shape index: {0}]   ;;  %s1730_s9 = inlined_call_operand.vmem [shape: f32[2,8,64], index: 9, kind: output, shape index: {1}]   ;;  %s1731_s10 = inlined_call_operand.vmem [shape: f32[2,8,64], index: 10, kind: output, shape index: {2}]  }
   0x1 LB: > { %s1017_s14 = sadd.s32 4294967295, %s1192_s13   ;;  %p1021_p0 = scmp.ge.s32.totalorder %s1192_s13, 1  ;;  %s1192_s13 = sphi %s1254_s13, %s21_s13  }
   0x2   : > { %p326_p1 = scmp.lt.s32.totalorder %s1192_s13, 3 }
   0x4   : > { %p327_p2 = pnand %p1021_p0, %p326_p1 }
   0x5   : > { %v419_v0 = vld [vmem:[%s1723_s2 + $0x80] sm:$0xff] (!%p327_p2)  ;;  %v420_v1 = vld [vmem:[%s1723_s2 + $0x88] sm:$0xff] (!%p327_p2)  ;;  %v421_v11 = vld [vmem:[%s1723_s2 + $0x90] sm:$0xff] (!%p327_p2)  ;;  %v1194_v12 = vmov (!%p327_p2), 0   ;;  %v1195_v13 = vmov (!%p327_p2), 2   ;;  %p1319_p3 = scmp.lt.s32.totalorder (!%p327_p2), %s1017_s14, 1 }
   0x6   : > { %330 = sbr.rel (%p327_p2) target bundleno = 600 (0x258), region = 52  ;;  %v403_v2 = vld [vmem:[%s1723_s2] sm:$0xff] (!%p327_p2)  ;;  %v496_v3 = vpack.c.bf16 (!%p327_p2), %v420_v1, %v419_v0  ;;  %v404_v4 = vld [vmem:[%s1723_s2 + $0x8] sm:$0xff] (!%p327_p2)  ;;  %1176 = vset.pattern.permute.xlu0 (!%p327_p2), %v1194_v12  ;;  %1178 = vset.pattern.permute.xlu1 (!%p327_p2), %v1195_v13  ;;  %v422_v15 = vld [vmem:[%s1723_s2 + $0x98] sm:$0xff] (!%p327_p2)  ;;  %vm1198_vm0 = vmmov (!%p327_p2), 0   ;;  %vm652_vm1 = vcmask (!%p327_p2), 523264  }
   0x7   : > { %v451_v5 = vld [vmem:[%s1723_s2 + $0x180] sm:$0xff] (!%p327_p2)  ;;  %v452_v6 = vld [vmem:[%s1723_s2 + $0x188] sm:$0xff] (!%p327_p2)  ;;  %v488_v7 = vpack.c.bf16 (!%p327_p2), %v404_v4, %v403_v2  ;;  %v405_v16 = vld [vmem:[%s1723_s2 + $0x10] sm:$0xff] (!%p327_p2)  ;;  %v497_v18 = vpack.c.bf16 (!%p327_p2), %v422_v15, %v421_v11 }
   0x8   : > { %v512_v8 = vpack.c.bf16 (!%p327_p2), %v452_v6, %v451_v5  ;;  %v435_v9 = vld [vmem:[%s1723_s2 + $0x100] sm:$0xff] (!%p327_p2)  ;;  %v436_v10 = vld [vmem:[%s1723_s2 + $0x108] sm:$0xff] (!%p327_p2)  ;;  %1031 = vmatprep.subr.bf16.mxu0 (!%p327_p2), %v496_v3  ;;  %v406_v17 = vld [vmem:[%s1723_s2 + $0x18] sm:$0xff] (!%p327_p2) }
   0x9   : > { %v504_v14 = vpack.c.bf16 (!%p327_p2), %v436_v10, %v435_v9  ;;  %1032 = vmatpush3.bf16.msra.mxu0 (!%p327_p2), %v488_v7  ;;  %v489_v19 = vpack.c.bf16 (!%p327_p2), %v406_v17, %v405_v16  ;;  %v453_v20 = vld [vmem:[%s1723_s2 + $0x190] sm:$0xff] (!%p327_p2)  ;;  %v454_v21 = vld [vmem:[%s1723_s2 + $0x198] sm:$0xff] (!%p327_p2)  ;;  %v423_v25 = vld [vmem:[%s1723_s2 + $0xa0] sm:$0xff] (!%p327_p2) }
   0xa   : > { %1053 = vmatprep.subr.bf16.mxu1 (!%p327_p2), %v512_v8  ;;  %v437_v22 = vld [vmem:[%s1723_s2 + $0x110] sm:$0xff] (!%p327_p2)  ;;  %v513_v23 = vpack.c.bf16 (!%p327_p2), %v454_v21, %v453_v20  ;;  %v438_v24 = vld [vmem:[%s1723_s2 + $0x118] sm:$0xff] (!%p327_p2)  ;;  %v424_v26 = vld [vmem:[%s1723_s2 + $0xa8] sm:$0xff] (!%p327_p2)  ;;  %1033 = vmatprep.subr.bf16.mxu0 (!%p327_p2), %v497_v18 }
   0xb   : > { %1054 = vmatpush3.bf16.msra.mxu1 (!%p327_p2), %v504_v14  ;;  %v505_v27 = vpack.c.bf16 (!%p327_p2), %v438_v24, %v437_v22  ;;  %v498_v28 = vpack.c.bf16 (!%p327_p2), %v424_v26, %v423_v25  ;;  %v407_v29 = vld [vmem:[%s1723_s2 + $0x20] sm:$0xff] (!%p327_p2)  ;;  %v408_v30 = vld [vmem:[%s1723_s2 + $0x28] sm:$0xff] (!%p327_p2)  ;;  %v425_v37 = vld [vmem:[%s1723_s2 + $0xb0] sm:$0xff] (!%p327_p2) }
   0xc   : > { %v455_v31 = vld [vmem:[%s1723_s2 + $0x1a0] sm:$0xff] (!%p327_p2)  ;;  %1055 = vmatprep.subr.bf16.mxu1 (!%p327_p2), %v513_v23  ;;  %v456_v32 = vld [vmem:[%s1723_s2 + $0x1a8] sm:$0xff] (!%p327_p2)  ;;  %v490_v35 = vpack.c.bf16 (!%p327_p2), %v408_v30, %v407_v29  ;;  %v426_v38 = vld [vmem:[%s1723_s2 + $0xb8] sm:$0xff] (!%p327_p2) }
   0xd   : > { %v439_v33 = vld [vmem:[%s1723_s2 + $0x120] sm:$0xff]  ;;  %v440_v34 = vld [vmem:[%s1723_s2 + $0x128] sm:$0xff]  ;;  %1034 = vmatpush3.bf16.msra.mxu0 %v489_v19  ;;  %v514_v36 = vpack.c.bf16 %v456_v32, %v455_v31  ;;  %v409_v39 = vld [vmem:[%s1723_s2 + $0x30] sm:$0xff]  ;;  %v499_v41 = vpack.c.bf16 %v426_v38, %v425_v37  ;;  %s1734_s14 = smov (!%p1319_p3, %s1017_s14), 1 }
   0xe   : > { %1035 = vmatprep.subr.bf16.mxu0 %v498_v28  ;;  %v506_v40 = vpack.c.bf16 %v440_v34, %v439_v33  ;;  %v410_v42 = vld [vmem:[%s1723_s2 + $0x38] sm:$0xff]  ;;  %v457_v43 = vld [vmem:[%s1723_s2 + $0x1b0] sm:$0xff]  ;;  %v427_v48 = vld [vmem:[%s1723_s2 + $0xc0] sm:$0xff]  ;;  %s1162_s23 = smul.u32 40, %s1734_s14  ;;  %s1458_s15 = sshll.u32 %s1734_s14, 3 }
   0xf   : > { %1056 = vmatpush3.bf16.msra.mxu1 %v505_v27  ;;  %v458_v44 = vld [vmem:[%s1723_s2 + $0x1b8] sm:$0xff]  ;;  %v441_v46 = vld [vmem:[%s1723_s2 + $0x130] sm:$0xff]  ;;  %v428_v49 = vld [vmem:[%s1723_s2 + $0xc8] sm:$0xff]  ;;  %v491_v50 = vpack.c.bf16 %v410_v42, %v409_v39  ;;  %s383_s22 = scalar_lea.vmem %s1722_s1, %s1458_s15  ;;  %s387_s17 = scalar_lea.vmem %s1729_s8, %s1458_s15 }
  0x10   : > { %1057 = vmatprep.subr.bf16.mxu1 %v514_v36  ;;  %v515_v45 = vpack.c.bf16 %v458_v44, %v457_v43  ;;  %v442_v47 = vld [vmem:[%s1723_s2 + $0x138] sm:$0xff]  ;;  %v459_v51 = vld [vmem:[%s1723_s2 + $0x1c0] sm:$0xff]  ;;  %v460_v52 = vld [vmem:[%s1723_s2 + $0x1c8] sm:$0xff]  ;;  %v500_v54 = vpack.c.bf16 %v428_v49, %v427_v48  ;;  %s1420_s25 = scalar_lea.vmem %s1721_s0, %s1162_s23  ;;  %s395_s23 = scalar_lea.vmem %s1731_s10, %s1458_s15 }
  0x11   : > { %1036 = vmatpush3.bf16.msra.mxu0 %v490_v35  ;;  %v507_v53 = vpack.c.bf16 %v442_v47, %v441_v46  ;;  %v411_v55 = vld [vmem:[%s1723_s2 + $0x40] sm:$0xff]  ;;  %v412_v56 = vld [vmem:[%s1723_s2 + $0x48] sm:$0xff]  ;;  %v516_v58 = vpack.c.bf16 %v460_v52, %v459_v51  ;;  %v429_v60 = vld [vmem:[%s1723_s2 + $0xd0] sm:$0xff]  ;;  %v1196_v47 = vmov 0.0  }
  0x12   : > { %1037 = vmatprep.subr.bf16.mxu0 %v499_v41  ;;  %v443_v57 = vld [vmem:[%s1723_s2 + $0x140] sm:$0xff]  ;;  %v444_v59 = vld [vmem:[%s1723_s2 + $0x148] sm:$0xff]  ;;  %v430_v61 = vld [vmem:[%s1723_s2 + $0xd8] sm:$0xff]  ;;  %v492_v0 = vpack.c.bf16 %v412_v56, %v411_v55 }
  0x13   : > { %1058 = vmatpush3.bf16.msra.mxu1 %v506_v40  ;;  %v461_v62 = vld [vmem:[%s1723_s2 + $0x1d0] sm:$0xff]  ;;  %v462_v63 = vld [vmem:[%s1723_s2 + $0x1d8] sm:$0xff]  ;;  %v508_v1 = vpack.c.bf16 %v444_v59, %v443_v57  ;;  %v501_v2 = vpack.c.bf16 %v430_v61, %v429_v60  ;;  %v431_v8 = vld [vmem:[%s1723_s2 + $0xe0] sm:$0xff] }
  0x14   : > { %1059 = vmatprep.subr.bf16.mxu1 %v515_v45  ;;  %v413_v3 = vld [vmem:[%s1723_s2 + $0x50] sm:$0xff]  ;;  %v414_v4 = vld [vmem:[%s1723_s2 + $0x58] sm:$0xff]  ;;  %v517_v6 = vpack.c.bf16 %v462_v63, %v461_v62  ;;  %v432_v9 = vld [vmem:[%s1723_s2 + $0xe8] sm:$0xff] }
  0x15   : > { %1038 = vmatpush3.bf16.msra.mxu0 %v491_v50  ;;  %v445_v5 = vld [vmem:[%s1723_s2 + $0x150] sm:$0xff]  ;;  %v446_v7 = vld [vmem:[%s1723_s2 + $0x158] sm:$0xff]  ;;  %v463_v10 = vld [vmem:[%s1723_s2 + $0x1e0] sm:$0xff]  ;;  %v493_v12 = vpack.c.bf16 %v414_v4, %v413_v3  ;;  %v502_v17 = vpack.c.bf16 %v432_v9, %v431_v8  ;;  %v1197_v50 = vmov 1  }
  0x16   : > { %1039 = vmatprep.subr.bf16.mxu0 %v500_v54  ;;  %v464_v11 = vld [vmem:[%s1723_s2 + $0x1e8] sm:$0xff]  ;;  %v415_v14 = vld [vmem:[%s1723_s2 + $0x60] sm:$0xff]  ;;  %v509_v16 = vpack.c.bf16 %v446_v7, %v445_v5  ;;  %v433_v23 = vld [vmem:[%s1723_s2 + $0xf0] sm:$0xff]  ;;  %v528_v7 = vlaneseq }
  0x17   : > { %1060 = vmatpush3.bf16.msra.mxu1 %v507_v53  ;;  %v398_v15 = vld [vmem:[%s1420_s25 + $0x8] sm:$0xff]  ;;  %v447_v19 = vld [vmem:[%s1723_s2 + $0x160] sm:$0xff]  ;;  %v518_v22 = vpack.c.bf16 %v464_v11, %v463_v10  ;;  %v434_v24 = vld [vmem:[%s1723_s2 + $0xf8] sm:$0xff] }
  0x18   : > { %1061 = vmatprep.subr.bf16.mxu1 %v516_v58  ;;  %v416_v18 = vld [vmem:[%s1723_s2 + $0x68] sm:$0xff]  ;;  %v484_v21 = vpack.c.bf16 %v398_v15, %v398_v15  ;;  %v400_v25 = vld [vmem:[%s1420_s25 + $0x18] sm:$0xff]  ;;  %v465_v26 = vld [vmem:[%s1723_s2 + $0x1f0] sm:$0xff]  ;;  %v503_v31 = vpack.c.bf16 %v434_v24, %v433_v23  ;;  %v529_v8 = vshrl.u32 %v528_v7, 7 }
  0x19   : > { %1040 = vmatpush3.bf16.msra.mxu0 %v492_v0  ;;  %v448_v20 = vld [vmem:[%s1723_s2 + $0x168] sm:$0xff]  ;;  %v466_v27 = vld [vmem:[%s1723_s2 + $0x1f8] sm:$0xff]  ;;  %v486_v28 = vpack.c.bf16 %v400_v25, %v400_v25  ;;  %v494_v29 = vpack.c.bf16 %v416_v18, %v415_v14  ;;  %v417_v32 = vld [vmem:[%s1723_s2 + $0x70] sm:$0xff] }
  0x1a   : > { %1041 = vmatprep.subr.bf16.mxu0 %v501_v2  ;;  %564 = vmatprep.mubr.bf16.mxu0 %v484_v21  ;;  %v510_v30 = vpack.c.bf16 %v448_v20, %v447_v19  ;;  %v418_v33 = vld [vmem:[%s1723_s2 + $0x78] sm:$0xff]  ;;  %v519_v34 = vpack.c.bf16 %v466_v27, %v465_v26  ;;  %v449_v35 = vld [vmem:[%s1723_s2 + $0x170] sm:$0xff]  ;;  %v397_v38 = vld [vmem:[%s1420_s25] sm:$0xff]  ;;  %v1564_v14 = vsub.s32 1, %v529_v8  ;;  %v1566_v15 = vsub.s32 0, %v529_v8 }
  0x1b   : > { %1062 = vmatpush3.bf16.msra.mxu1 %v508_v1  ;;  %v450_v36 = vld [vmem:[%s1723_s2 + $0x178] sm:$0xff]  ;;  %604 = vmatprep.mubr.bf16.mxu1 %v486_v28  ;;  %v495_v37 = vpack.c.bf16 %v418_v33, %v417_v32  ;;  %v678_v39 = vld [vmem:[%s383_s22] sm:$0xff]  ;;  %v468_v42 = vld [vmem:[%s1723_s2 + $0x208] sm:$0xff]  ;;  %v483_v44 = vpack.c.bf16 %v397_v38, %v397_v38  ;;  %v1577_v19 = vsub.s32 2, %v529_v8 }
  0x1c   : > { %1063 = vmatprep.subr.bf16.mxu1 %v517_v6  ;;  %v511_v40 = vpack.c.bf16 %v450_v36, %v449_v35  ;;  %v467_v41 = vld [vmem:[%s1723_s2 + $0x200] sm:$0xff]  ;;  %v399_v43 = vld [vmem:[%s1420_s25 + $0x10] sm:$0xff]  ;;  %699 = vperm.xlu0 %1176, %v678_v39   ;;  %v470_v49 = vld [vmem:[%s1723_s2 + $0x218] sm:$0xff] }
  0x1d   : > { %1042 = vmatpush3.bf16.msra.mxu0 %v493_v12  ;;  %718 = vperm.xlu1 %1178, %v678_v39   ;;  %v520_v45 = vpack.c.bf16 %v468_v42, %v467_v41  ;;  %v485_v46 = vpack.c.bf16 %v399_v43, %v399_v43  ;;  %v469_v48 = vld [vmem:[%s1723_s2 + $0x210] sm:$0xff]  ;;  %v471_v52 = vld [vmem:[%s1723_s2 + $0x220] sm:$0xff]  ;;  %v472_v53 = vld [vmem:[%s1723_s2 + $0x228] sm:$0xff] }
  0x1e   : > { %1043 = vmatprep.subr.bf16.mxu0 %v502_v17  ;;  %v521_v51 = vpack.c.bf16 %v470_v49, %v469_v48  ;;  %v522_v54 = vpack.c.bf16 %v472_v53, %v471_v52  ;;  %v473_v55 = vld [vmem:[%s1723_s2 + $0x230] sm:$0xff]  ;;  %v474_v56 = vld [vmem:[%s1723_s2 + $0x238] sm:$0xff]  ;;  %v476_v58 = vld [vmem:[%s1723_s2 + $0x248] sm:$0xff] }
  0x1f   : > { %1064 = vmatpush3.bf16.msra.mxu1 %v509_v16  ;;  %v523_v57 = vpack.c.bf16 %v474_v56, %v473_v55  ;;  %v477_v60 = vld [vmem:[%s1723_s2 + $0x250] sm:$0xff]  ;;  %v478_v61 = vld [vmem:[%s1723_s2 + $0x258] sm:$0xff]  ;;  %v479_v63 = vld [vmem:[%s1723_s2 + $0x260] sm:$0xff] }
  0x20   : > { %1065 = vmatprep.subr.bf16.mxu1 %v518_v22  ;;  %1177 = vset.pattern.permute.xlu0 %v1197_v50  ;;  %v525_v62 = vpack.c.bf16 %v478_v61, %v477_v60  ;;  %v480_v0 = vld [vmem:[%s1723_s2 + $0x268] sm:$0xff]  ;;  %v481_v2 = vld [vmem:[%s1723_s2 + $0x270] sm:$0xff]  ;;  %v482_v3 = vld [vmem:[%s1723_s2 + $0x278] sm:$0xff] }
  0x21   : > { %1044 = vmatpush3.bf16.msra.mxu0 %v494_v29  ;;  %708 = vperm.xlu0 %1177, %v678_v39   ;;  %v526_v1 = vpack.c.bf16 %v480_v0, %v479_v63  ;;  %v527_v4 = vpack.c.bf16 %v482_v3, %v481_v2  ;;  %v401_v5 = vld [vmem:[%s1420_s25 + $0x20] sm:$0xff]  ;;  %v681_v16 = vld [vmem:[%s1726_s5 + $0x8] sm:$0xff]  ;;  %v682_v23 = vld [vmem:[%s1726_s5 + $0x10] sm:$0xff]  ;;  %s391_s25 = scalar_lea.vmem %s1730_s9, %s1458_s15 }
  0x22   : > { %1045 = vmatprep.subr.bf16.mxu0 %v503_v31  ;;  %v487_v6 = vpack.c.bf16 %v401_v5, %v401_v5  ;;  %v1553_v9 = vld [vmem:[%s1724_s3] sm:$0x7]  ;;  %v793_v18 = vld [vmem:[%s1728_s7 + $0x8] sm:$0xff]  ;;  %v683_v24 = vld [vmem:[%s1726_s5 + $0x18] sm:$0xff] }
  0x23   : > { %1066 = vmatpush3.bf16.msra.mxu1 %v510_v30  ;;  %v679_v10 = vld [vmem:[%s1725_s4] sm:$0xf]  ;;  %v670_v22 = vrot.slane %v1553_v9, %v1564_v14  ;;  %v794_v25 = vld [vmem:[%s1728_s7 + $0x10] sm:$0xff]  ;;  %v795_v29 = vld [vmem:[%s1728_s7 + $0x18] sm:$0xff]  ;;  %v675_v30 = vrot.slane %v1553_v9, %v1577_v19  ;;  %v739_v31 = vpack.c.bf16 %v683_v24, %v682_v23 }
  0x24   : > { %1067 = vmatprep.subr.bf16.mxu1 %v519_v34  ;;  %v791_v11 = vld [vmem:[%s1727_s6] sm:$0xf]  ;;  %v705_v26 = vrot.slane %v679_v10, %v1566_v15  ;;  %v838_v32 = vpack.c.bf16 %v795_v29, %v794_v25  ;;  %v724_v33 = vrot.slane %v679_v10, %v1577_v19  ;;  %v714_v35 = vrot.slane %v679_v10, %v1564_v14  ;;  %v685_v39 = vld [vmem:[%s1726_s5 + $0x28] sm:$0xff]  ;;  %v686_v50 = vld [vmem:[%s1726_s5 + $0x30] sm:$0xff] }
  0x25   : > { %1046 = vmatpush3.bf16.msra.mxu0 %v495_v37  ;;  %1179 = vset.pattern.permute.xlu0 %v1195_v13  ;;  %v475_v13 = vld [vmem:[%s1723_s2 + $0x240] sm:$0xff]  ;;  %v812_v27 = vrot.slane %v791_v11, %v1566_v15  ;;  %v817_v36 = vrot.slane %v791_v11, %v1564_v14  ;;  %v823_v37 = vrot.slane %v791_v11, %v1577_v19  ;;  %v797_v41 = vld [vmem:[%s1728_s7 + $0x28] sm:$0xff]  ;;  %v798_v55 = vld [vmem:[%s1728_s7 + $0x30] sm:$0xff] }
  0x26   : > { %1102 = vmatprep.subr.bf16.mxu0 %v1196_v47  ;;  %v524_v59 = vpack.c.bf16 %v476_v58, %v475_v13  ;;  %v680_v12 = vld [vmem:[%s1726_s5] sm:$0xff]  ;;  %v799_v56 = vld [vmem:[%s1728_s7 + $0x38] sm:$0xff]  ;;  %v801_v3 = vld [vmem:[%s1728_s7 + $0x48] sm:$0xff] }
  0x27   : > { %1068 = vmatpush3.bf16.msra.mxu1 %v511_v40  ;;  %v792_v17 = vld [vmem:[%s1728_s7] sm:$0xff]  ;;  %v738_v20 = vpack.c.bf16 %v681_v16, %v680_v12  ;;  %v840_v61 = vpack.c.bf16 %v799_v56, %v798_v55  ;;  %v802_v16 = vld [vmem:[%s1728_s7 + $0x50] sm:$0xff]  ;;  %v693_v23 = vld [vmem:[%s1726_s5 + $0x68] sm:$0xff] }
  0x28   : > { %1122 = vmatprep.subr.bf16.mxu1 %v1196_v47  ;;  %565 = vmatmul.mubr.bf16.vlgmr.msra.gmra.mrb[0].mxu0 %v483_v44  ;;  %v837_v21 = vpack.c.bf16 %v793_v18, %v792_v17  ;;  %v684_v34 = vld [vmem:[%s1726_s5 + $0x20] sm:$0xff]  ;;  %v729_v44 = vsub.s32 3, %v529_v8  ;;  %v690_v8 = vld [vmem:[%s1726_s5 + $0x50] sm:$0xff]  ;;  %v803_v17 = vld [vmem:[%s1728_s7 + $0x58] sm:$0xff] }
  0x29   : > { %1103 = vmatpush3.bf16.msra.mxu0 %v520_v45  ;;  %1118 = vmatprep.mubr.msk.bf16.mxu0 %vm1198_vm0, %v1196_v47  ;;  %v796_v40 = vld [vmem:[%s1728_s7 + $0x20] sm:$0xff]  ;;  %v740_v48 = vpack.c.bf16 %v685_v39, %v684_v34  ;;  %v805_v25 = vld [vmem:[%s1728_s7 + $0x68] sm:$0xff]  ;;  %v695_v29 = vld [vmem:[%s1726_s5 + $0x78] sm:$0xff] }
  0x2a   : > { %605 = vmatmul.mubr.bf16.vlgmr.msra.gmra.mrb[0].mxu1 %v485_v46  ;;  %1104 = vmatprep.subr.bf16.mxu0 %v1196_v47  ;;  %v839_v49 = vpack.c.bf16 %v797_v41, %v796_v40  ;;  %v730_v58 = vrot.slane %v679_v10, %v729_v44  ;;  %v800_v2 = vld [vmem:[%s1728_s7 + $0x40] sm:$0xff]  ;;  %v691_v10 = vld [vmem:[%s1726_s5 + $0x58] sm:$0xff] }
  0x2b   : > { %1138 = vmatprep.mubr.msk.bf16.mxu1 %vm1198_vm0, %v1196_v47  ;;  %1123 = vmatpush3.bf16.msra.mxu1 %v738_v20  ;;  %v841_v7 = vpack.c.bf16 %v801_v3, %v800_v2  ;;  %v743_v18 = vpack.c.bf16 %v691_v10, %v690_v8  ;;  %v842_v20 = vpack.c.bf16 %v803_v17, %v802_v16  ;;  %v804_v24 = vld [vmem:[%s1728_s7 + $0x60] sm:$0xff] }
  0x2c   : > { %1124 = vmatprep.subr.bf16.mxu1 %v1196_v47 }
  0x2d   : > { %1105 = vmatpush3.bf16.msra.mxu0 %v521_v51 }
  0x2e   : > { %1106 = vmatprep.subr.bf16.mxu0 %v1196_v47 }
  0x2f   : > { %1125 = vmatpush3.bf16.msra.mxu1 %v739_v31  ;;  %v806_v31 = vld [vmem:[%s1728_s7 + $0x70] sm:$0xff] }
  0x30   : > { %1126 = vmatprep.subr.bf16.mxu1 %v1196_v47 }
  0x31   : > { %1107 = vmatpush3.bf16.msra.mxu0 %v522_v54  ;;  %v687_v54 = vld [vmem:[%s1726_s5 + $0x38] sm:$0xff] }
  0x32   : > { %1108 = vmatprep.subr.bf16.mxu0 %v1196_v47  ;;  %v741_v60 = vpack.c.bf16 %v687_v54, %v686_v50 }
  0x33   : > { %1127 = vmatpush3.bf16.msra.mxu1 %v740_v48 }
  0x34   : > { %1128 = vmatprep.subr.bf16.mxu1 %v1196_v47 }
  0x35   : > { %1109 = vmatpush3.bf16.msra.mxu0 %v523_v57 }
  0x36   : > { %1110 = vmatprep.subr.bf16.mxu0 %v1196_v47 }
  0x37   : > { %1129 = vmatpush3.bf16.msra.mxu1 %v741_v60 }
  0x38   : > { %1130 = vmatprep.subr.bf16.mxu1 %v1196_v47 }
  0x39   : > { %1111 = vmatpush3.bf16.msra.mxu0 %v524_v59  ;;  %v829_v59 = vrot.slane %v791_v11, %v729_v44 }
  0x3a   : > { %1112 = vmatprep.subr.bf16.mxu0 %v1196_v47 }
  0x3d   : > { %1113 = vmatpush3.bf16.msra.mxu0 %v525_v62  ;;  %v688_v62 = vld [vmem:[%s1726_s5 + $0x40] sm:$0xff] }
  0x3e   : > { %1114 = vmatprep.subr.bf16.mxu0 %v1196_v47 }
  0x41   : > { %1115 = vmatpush3.bf16.msra.mxu0 %v526_v1  ;;  %v689_v1 = vld [vmem:[%s1726_s5 + $0x48] sm:$0xff] }
  0x42   : > { %1116 = vmatprep.subr.bf16.mxu0 %v1196_v47 }
  0x45   : > { %1117 = vmatpush3.bf16.msra.mxu0 %v527_v4 }
  0x46   : > { %1142 = vmatprep.subr.bf16.mxu0 %v1196_v47 }
  0x48   : > { %1119 = vmatmul.mubr.bf16.vlgmr.msra.gmra.mrb[4].mxu0 %v487_v6  ;;  %v742_v6 = vpack.c.bf16 %v689_v1, %v688_v62  ;;  %v1027_v62 = vld [vmem:[%s1726_s5 + $0x80] ss:$0 sm:$0xff] }
  0x49   : > { %1158 = vmatprep.mubr.msk.bf16.mxu0 %vm1198_vm0, %v1196_v47  ;;  %1143 = vmatpush3.bf16.msra.mxu0 %v837_v21  ;;  %v692_v21 = vld [vmem:[%s1726_s5 + $0x60] sm:$0xff] }
  0x4a   : > { %1144 = vmatprep.subr.bf16.mxu0 %v1196_v47  ;;  %1131 = vmatpush3.bf16.msra.mxu1 %v742_v6 }
  0x4b   : > { %1132 = vmatprep.subr.bf16.mxu1 %v1196_v47 }
  0x4d   : > { %1145 = vmatpush3.bf16.msra.mxu0 %v838_v32  ;;  %v807_v32 = vld [vmem:[%s1728_s7 + $0x78] sm:$0xff] }
  0x4e   : > { %1146 = vmatprep.subr.bf16.mxu0 %v1196_v47  ;;  %1133 = vmatpush3.bf16.msra.mxu1 %v743_v18 }
  0x4f   : > { %1134 = vmatprep.subr.bf16.mxu1 %v1196_v47 }
  0x51   : > { %1147 = vmatpush3.bf16.msra.mxu0 %v839_v49 }
  0x52   : > { %1148 = vmatprep.subr.bf16.mxu0 %v1196_v47 }
  0x55   : > { %1149 = vmatpush3.bf16.msra.mxu0 %v840_v61 }
  0x56   : > { %1150 = vmatprep.subr.bf16.mxu0 %v1196_v47 }
  0x59   : > { %1151 = vmatpush3.bf16.msra.mxu0 %v841_v7 }
  0x5a   : > { %1152 = vmatprep.subr.bf16.mxu0 %v1196_v47 }
  0x5d   : > { %1153 = vmatpush3.bf16.msra.mxu0 %v842_v20 }
  0x5e   : > { %1154 = vmatprep.subr.bf16.mxu0 %v1196_v47 }
  0x9b   : > { %v700_v28 = vpop.permute.xlu0 %699 }
  0x9c   : > { %v719_v38 = vpop.permute.xlu1 %718  ;;  %v706_v42 = vmul.f32 %v705_v26, %v700_v28  ;;  %v813_v43 = vmul.f32 %v812_v27, %v700_v28  ;;  %v744_v26 = vpack.c.bf16 %v693_v23, %v692_v21  ;;  %v843_v27 = vpack.c.bf16 %v805_v25, %v804_v24  ;;  %v694_v28 = vld [vmem:[%s1726_s5 + $0x70] sm:$0xff] }
  0x9d   : > { %v725_v46 = vmul.f32 %v724_v33, %v719_v38  ;;  %v824_v53 = vmul.f32 %v823_v37, %v719_v38  ;;  %v745_v34 = vpack.c.bf16 %v695_v29, %v694_v28 }
  0x9e   : > { %1135 = vmatpush3.bf16.msra.mxu1 %v744_v26  ;;  %1155 = vmatpush3.bf16.msra.mxu0 %v843_v27 }
  0x9f   : > { %1136 = vmatprep.subr.bf16.mxu1 %v1196_v47  ;;  %1156 = vmatprep.subr.bf16.mxu0 %v1196_v47 }
  0xa0   : > { %v709_v45 = vpop.permute.xlu0 %708 }
  0xa1   : > { %v715_v51 = vmul.f32 %v714_v35, %v709_v45  ;;  %v818_v52 = vmul.f32 %v817_v36, %v709_v45  ;;  %v844_v35 = vpack.c.bf16 %v807_v32, %v806_v31 }
  0xa2   : > { %1137 = vmatpush3.bf16.msra.mxu1 %v745_v34 }
  0xa3   : > { %v716_v57 = vadd.f32 %v715_v51, %v706_v42  ;;  %v819_v13 = vadd.f32 %v818_v52, %v813_v43  ;;  %1157 = vmatpush3.bf16.msra.mxu0 %v844_v35 }
  0xa5   : > { %v726_v63 = vadd.f32 %v725_v46, %v716_v57  ;;  %v825_v0 = vadd.f32 %v824_v53, %v819_v13  ;;  %v531_v46 = vrot.slane %v1553_v9, %v1566_v15 }
  0xa7   : > { %v731_v4 = vadd.f32 %v730_v58, %v726_v63  ;;  %v830_v5 = vadd.f32 %v829_v59, %v825_v0  ;;  %v1028_v63 = vld [vmem:[%s1728_s7 + $0x80] ss:$0 sm:$0xff] }
  0xa9   : > { %v733_v11 = vmul.f32 0.70710677, %v731_v4  ;;  %v832_v12 = vmul.f32 0.70710677, %v830_v5  ;;  %v732_v33 = vmul.f32 0.5, %v731_v4  ;;  %v831_v37 = vmul.f32 0.5, %v830_v5 }
  0xab   : > { %1180 = verf.f32 %v733_v11 }
  0xac   : > { %1182 = verf.f32 %v832_v12 }
  0xb5   : > { %v1181_v36 = vpop.eup %1180 }
  0xb6   : > { %v1183_v38 = vpop.eup %1182  ;;  %v735_v39 = vadd.f32 1.0, %v1181_v36 }
  0xb7   : > { %v834_v40 = vadd.f32 1.0, %v1183_v38 }
  0xb8   : > { %v736_v41 = vmul.f32 %v735_v39, %v732_v33 }
  0xb9   : > { %v835_v42 = vmul.f32 %v834_v40, %v831_v37 }
  0xba   : > { %v737_v43 = vpack.c.bf16 %v736_v41, %v736_v41 }
  0xbb   : > { %v836_v44 = vpack.c.bf16 %v835_v42, %v835_v42 }
  0xbc   : > { %1139 = vmatmul.mubr.bf16.vlgmr.msra.gmra.mrb[4].mxu1 %v737_v43 }
  0xbd   : > { %1159 = vmatmul.mubr.bf16.vlgmr.msra.gmra.mrb[8].mxu0 %v836_v44 }
  0xfb   : > { %v1047_v45 = vpop.f32.mrb[0].mxu0 }
  0xfc   : > { %v1048_v48 = vpop.f32.mrb[1].mxu0 }
  0xfd   : > { %v1069_v49 = vpop.f32.mrb[0].mxu1  ;;  %v1049_v50 = vadd.f32 %v1048_v48, %v1047_v45  ;;  %v1050_v51 = vpop.f32.mrb[2].mxu0 }
  0xfe   : > { %v1070_v47 = vpop.f32.mrb[1].mxu1  ;;  %v1051_v52 = vpop.f32.mrb[3].mxu0 }
  0xff   : > { %v1071_v53 = vadd.f32 %v1070_v47, %v1069_v49  ;;  %v1072_v54 = vpop.f32.mrb[2].mxu1  ;;  %v567_v55 = vadd.f32 %v1049_v50, %v531_v46 }
 0x100   : > { %v1073_v56 = vpop.f32.mrb[3].mxu1 }
 0x101   : > { %v607_v57 = vadd.f32 %v1071_v53, %v567_v55 }
 0x11b   : > { %v646_v13 = vpop.f32.mrb[4].mxu0 }
 0x11c   : > { %v647_v58 = vadd.f32 %v646_v13, %v607_v57  ;;  %v1120_v59 = vpop.f32.mrb[5].mxu0 }
 0x11d   : > { %v649_v60 = vpop.f32.mrb[6].mxu0 }
 0x11e   : > { %v1121_v61 = vpop.f32.mrb[7].mxu0  ;;  %v653_v15 = vsel %vm652_vm1, %v647_v58, 0.0 }
 0x11f   : > { %654 = vadd.xlane.f32.xlu1 %v653_v15 }
 0x18f   : > { %v784_v0 = vpop.f32.mrb[4].mxu1 }
 0x190   : > { %v785_v1 = vadd.f32 %v1027_v62, %v784_v0  ;;  %v883_v2 = vpop.f32.mrb[8].mxu0  ;;  %v1140_v3 = vpop.f32.mrb[5].mxu1 }
 0x191   : > { %v884_v4 = vadd.f32 %v1028_v63, %v883_v2  ;;  %v1160_v5 = vpop.f32.mrb[9].mxu0  ;;  %v787_v6 = vpop.f32.mrb[6].mxu1 }
 0x192   : > { %790 = vst.msk [vmem:[%s391_s25] sm:$0xff] %vm652_vm1, %v785_v1  ;;  %v886_v7 = vpop.f32.mrb[10].mxu0  ;;  %v1141_v8 = vpop.f32.mrb[7].mxu1 }
 0x193   : > { %889 = vst.msk [vmem:[%s395_s23] sm:$0xff] %vm652_vm1, %v884_v4  ;;  %v1161_v10 = vpop.f32.mrb[11].mxu0 }
 0x1ac   : > { %v655_v11 = vpop.xlane.xlu1 %654 }
 0x1ad   : > { %v657_v12 = vmul.f32 0.015625, %v655_v11 }
 0x1af   : > { %v658_v16 = vsub.f32 %v647_v58, %v657_v12 }
 0x1b1   : > { %v659_v17 = vmul.f32 %v658_v16, %v658_v16 }
 0x1b3   : > { %v660_v18 = vsel %vm652_vm1, %v659_v17, 0.0 }
 0x1b4   : > { %661 = vadd.xlane.f32.xlu0 %v660_v18 }
 0x241   : > { %v662_v20 = vpop.xlane.xlu0 %661 }
 0x242   : > { %v663_v21 = vmul.f32 0.015625, %v662_v20 }
 0x244   : > { %v664_v23 = vadd.f32 1e-05, %v663_v21 }
 0x246   : > { %1184 = vrsqrt.f32 %v664_v23 }
 0x250   : > { %v1185_v24 = vpop.eup %1184 }
 0x251   : > { %v666_v25 = vmul.f32 %v1185_v24, %v658_v16 }
 0x253   : > { %v671_v26 = vmul.f32 %v670_v22, %v666_v25 }
 0x255   : > { %v676_v27 = vadd.f32 %v675_v30, %v671_v26 }
 0x257   : > { %677 = vst.msk [vmem:[%s387_s17] sm:$0xff] %vm652_vm1, %v676_v27 }
 0x258 PF: > { %s21_s13 = sadd.s32 1, %s1192_s13  }
 0x259   : > { %p18_p4 = scmp.ge.s32.totalorder %s21_s13, 4  }
 0x25b   :  { %20 = sbr.rel (!%p18_p4) target bundleno = 1 (0x1), region = 109 }

// kernel: _forward.7
= control target key start
LH: loop header
LB: loop body
LE: loop exit
PB: predicated region body
PF: predicated region fallthrough
CT: control target
= control target key end

     0   :  { %s1666_s18 = smov 0   ;;  %s1668_s19 = smov 0   ;;  %s1973_s0 = inlined_call_operand.vmem [shape: f32[2,6,64], index: 0, kind: input, shape index: {}]   ;;  %s1974_s1 = inlined_call_operand.vmem [shape: f32[2,200,256], index: 1, kind: input, shape index: {}]   ;;  %s1975_s2 = inlined_call_operand.vmem [shape: f32[2,64], index: 2, kind: input, shape index: {}]   ;;  %s1976_s3 = inlined_call_operand.vmem [shape: f32[64,64], index: 3, kind: input, shape index: {}]   ;;  %s1977_s4 = inlined_call_operand.vmem [shape: f32[1,64], index: 4, kind: input, shape index: {}]   ;;  %s1978_s5 = inlined_call_operand.vmem [shape: f32[2,6,64], index: 5, kind: output, shape index: {}]  }
   0x1   :  { %s1670_s20 = smov 0   ;;  %s1672_s21 = smov 0  }
   0x2   :  { %s1674_s22 = smov 0  }
   0x3 LB: > { %s24_s23 = sadd.s32 1, %s1614_s20  ;;  %s27_s24 = sadd.s32 1, %s1618_s21  ;;  %s1622_s22 = sphi %s1674_s22, %s15_s22   ;;  %s1618_s21 = sphi %s1672_s21, %s1982_s21   ;;  %s1614_s20 = sphi %s1670_s20, %s1981_s20   ;;  %s1610_s19 = sphi %s1668_s19, %s1980_s19   ;;  %s1606_s18 = sphi %s1666_s18, %s1979_s18  }
   0x4   : > { %p25_p0 = scmp.ge.s32.totalorder %s24_s23, 2  ;;  %p1368_p1 = scmp.ge.s32.totalorder %s1622_s22, 1 }
   0x5   : > { %p208_p2 = scmp.lt.s32.totalorder %s1622_s22, 5 }
   0x6   : > { %s1984_s23 = smov (%p25_p0, %s24_s23), 0  ;;  %s1986_s24 = smov (!%p25_p0, %s27_s24), %s1618_s21 }
   0x7   : > { %p209_p3 = pnand %p1368_p1, %p208_p2  ;;  %p29_p4 = scmp.ge.s32.totalorder %s1986_s24, 2 }
   0x8   : > { %p239_p5 = scmp.lt.s32.totalorder (!%p209_p3), %s1610_s19, 1  ;;  %p243_p6 = scmp.lt.s32.totalorder (!%p209_p3), %s1606_s18, 1 }
   0x9   : > { %s1988_s24 = smov (%p29_p4, %s1986_s24), 0  ;;  %212 = sbr.rel (%p209_p3) target bundleno = 4239 (0x108f), region = 40 }
   0xa   : > { %p1372_p7 = scmp.ne.s32.totalorder (!%p209_p3), %s1606_s18, 0 }
  0x10   : > { %s1990_s19 = smov (!%p239_p5, %s1610_s19), 1  ;;  %256 = sbr.rel (%p1372_p7) target bundleno = 23 (0x17), region = 44 }
  0x11   : > { %s244_s25 = scalar_select %p243_p6, %s1606_s18, 1 }
  0x12   : > { %s1369_s26 = sshll.u32 %s1990_s19, 3  ;;  %vm258_vm0 = vcmask (!%p1372_p7), 521216  }
  0x13   : > { %s242_s29 = scalar_lea.vmem %s1973_s0, %s1369_s26  ;;  %s1505_s30 = smul.u32 400, %s244_s25 }
  0x14   : > { %s1706_s8 = scalar_lea.vmem %s1978_s5, %s1369_s26  ;;  %v257_v0 = vld [vmem:[%s242_s29] sm:$0x3f] (!%p1372_p7) }
  0x15   : > { %s1711_s11 = scalar_lea.vmem %s1974_s1, %s1505_s30  ;;  %259 = vst.msk [vmem:[#allocation2] sm:$0x3f] (!%p1372_p7), %vm258_vm0, %v257_v0 }
  0x17 PF: > { %vm311_vm1 = vcmask 521216   ;;  %v262_v8 = vld [vmem:[%s1711_s11 + $0x8] sm:$0xff]  ;;  %v264_v9 = vld [vmem:[%s1711_s11 + $0x18] sm:$0xff]  ;;  %v261_v10 = vld [vmem:[%s1711_s11] sm:$0xff]  ;;  %v1624_v15 = vmov 0   ;;  %v326_v35 = vlaneseq  ;;  %vm353_vm2 = vcmask 523264  }
  0x18   : > { %v1723_v11 = vpack.c.bf16 %v264_v9, %v262_v8  ;;  %v263_v12 = vld [vmem:[%s1711_s11 + $0x10] sm:$0xff]  ;;  %v266_v13 = vld [vmem:[%s1711_s11 + $0x28] sm:$0xff]  ;;  %v268_v14 = vld [vmem:[%s1711_s11 + $0x38] sm:$0xff]  ;;  %389 = vmatprep.mubr.bf16.mxu0 %v1624_v15  ;;  %v1625_v48 = vmov 0.0   ;;  %vm1626_vm3 = vmmov 0   ;;  %vm468_vm4 = vcmask 1042432  }
  0x19   : > { %v337_v16 = vpack.c.bf16 %v263_v12, %v261_v10  ;;  %v1729_v17 = vpack.c.bf16 %v268_v14, %v266_v13  ;;  %v265_v18 = vld [vmem:[%s1711_s11 + $0x20] sm:$0xff]  ;;  %v267_v19 = vld [vmem:[%s1711_s11 + $0x30] sm:$0xff]  ;;  %v270_v20 = vld [vmem:[%s1711_s11 + $0x48] sm:$0xff]  ;;  %v1749_v37 = vshrl.u32 %v326_v35, 7  ;;  %1427 = vmatprep.subr.bf16.mxu1 %v1625_v48  ;;  %1429 = vmatprep.mubr.msk.bf16.mxu1 %vm1626_vm3, %v1625_v48  ;;  %s1627_s12 = smov 112   ;;  %s1628_s13 = smov 64  }
  0x1a   : > { %357 = vmatprep.subr.bf16.mxu0 %v1723_v11  ;;  %v272_v21 = vld [vmem:[%s1711_s11 + $0x58] sm:$0xff]  ;;  %v339_v22 = vpack.c.bf16 %v267_v19, %v265_v18  ;;  %v269_v24 = vld [vmem:[%s1711_s11 + $0x40] sm:$0xff]  ;;  %v271_v25 = vld [vmem:[%s1711_s11 + $0x50] sm:$0xff]  ;;  %s1629_s14 = smov 48   ;;  %vm402_vm5 = vcmask 130048   ;;  %vm450_vm6 = vcmask 46080  }
  0x1b   : > { %358 = vmatpush1.bf16.msra.mxu0 %v337_v16  ;;  %v1737_v23 = vpack.c.bf16 %v272_v21, %v270_v20  ;;  %v274_v26 = vld [vmem:[%s1711_s11 + $0x68] sm:$0xff]  ;;  %v276_v27 = vld [vmem:[%s1711_s11 + $0x78] sm:$0xff]  ;;  %v341_v28 = vpack.c.bf16 %v271_v25, %v269_v24  ;;  %v273_v30 = vld [vmem:[%s1711_s11 + $0x60] sm:$0xff]  ;;  %v328_v38 = vsub.s32 0, %v1749_v37  ;;  %v333_v40 = vsub.s32 1, %v1749_v37  ;;  %s1630_s15 = smov 32  }
  0x1c   : > { %v1714_v1 = vld [vmem:[#allocation2] sm:$0x3f]  ;;  %359 = vmatprep.subr.bf16.mxu0 %v1729_v17  ;;  %v1744_v29 = vpack.c.bf16 %v276_v27, %v274_v26  ;;  %v275_v31 = vld [vmem:[%s1711_s11 + $0x70] sm:$0xff]  ;;  %v347_v49 = vsub.s32 2, %v1749_v37  ;;  %v1767_v50 = vld [vmem:[%s1711_s11 + $0x188] sm:$0xff]  ;;  %s1631_s16 = smov 96  }
  0x1d   : > { %v312_v2 = vsel %vm311_vm1, %v1714_v1, 0.0  ;;  %v343_v32 = vpack.c.bf16 %v275_v31, %v273_v30  ;;  %v1753_v39 = vld [vmem:[%s1711_s11 + $0x180] sm:$0xff]  ;;  %vm464_vm7 = vcmask 48128   ;;  %s1632_s17 = smov 16   ;;  %s1633_s19 = smov 80  }
  0x1e   : > { %313 = vadd.xlane.f32.xlu0 %v312_v2  ;;  %v329_v41 = vrot.slane %v1753_v39, %v328_v38  ;;  %v334_v44 = vrot.slane %v1753_v39, %v333_v40  ;;  %v348_v51 = vrot.slane %v1753_v39, %v347_v49  ;;  %v352_v52 = vrot.slane %v1767_v50, %v347_v49  ;;  %p1387_p8 = scmp.ne.s32.totalorder %s1606_s18, 1 }
  0x1f   : > { %360 = vmatpush1.bf16.msra.mxu0 %v339_v22  ;;  %vm1635_vm8 = vmmov (!%p1387_p8), 0  }
  0x20   : > { %361 = vmatprep.subr.bf16.mxu0 %v1737_v23 }
  0x23   : > { %362 = vmatpush1.bf16.msra.mxu0 %v341_v28 }
  0x24   : > { %363 = vmatprep.subr.bf16.mxu0 %v1744_v29 }
  0x27   : > { %364 = vmatpush1.bf16.msra.mxu0 %v343_v32 }
  0x28   : > { %1421 = vmatprep.subr.bf16.mxu0 %v1625_v48 }
  0xab   : > { %v314_v3 = vpop.xlane.xlu0 %313 }
  0xac   : > { %v316_v4 = vmul.f32 0.015625, %v314_v3 }
  0xae   : > { %v317_v5 = vsub.f32 %v1714_v1, %v316_v4 }
  0xb0   : > { %v318_v6 = vmul.f32 %v317_v5, %v317_v5 }
  0xb2   : > { %v319_v7 = vsel %vm311_vm1, %v318_v6, 0.0 }
  0xb3   : > { %320 = vadd.xlane.f32.xlu0 %v319_v7 }
 0x140   : > { %v321_v33 = vpop.xlane.xlu0 %320 }
 0x141   : > { %v322_v34 = vmul.f32 0.015625, %v321_v33 }
 0x143   : > { %v323_v36 = vadd.f32 1e-05, %v322_v34 }
 0x145   : > { %1558 = vrsqrt.f32 %v323_v36 }
 0x14f   : > { %v1559_v42 = vpop.eup %1558 }
 0x150   : > { %v325_v43 = vmul.f32 %v1559_v42, %v317_v5 }
 0x152   : > { %v330_v45 = vmul.f32 %v329_v41, %v325_v43 }
 0x154   : > { %v335_v46 = vadd.f32 %v334_v44, %v330_v45 }
 0x156   : > { %v336_v47 = vpack.c.bf16 %v335_v46, %v335_v46 }
 0x158   : > { %1373 = vmatmul.mubr.msk.bf16.vlgmr.msra.gmra.mrb[0].mxu0 %vm353_vm2, %v336_v47 }
 0x159   : > { %1423 = vmatprep.mubr.msk.bf16.mxu0 %vm1626_vm3, %v1625_v48 }
 0x22b   : > { %v391_v53 = vpop.f32.mrb[0].mxu0 }
 0x22c   : > { %v392_v54 = vadd.f32 %v391_v53, %v348_v51  ;;  %v393_v55 = vpop.f32.mrb[1].mxu0 }
 0x22d   : > { %v394_v56 = vadd.f32 %v393_v55, %v352_v52  ;;  %v395_v57 = vpop.f32.mrb[2].mxu0 }
 0x22e   : > { %v1775_v58 = vpack.c.bf16 %v392_v54, %v392_v54  ;;  %v396_v59 = vpop.f32.mrb[3].mxu0 }
 0x22f   : > { %v1777_v60 = vpack.c.bf16 %v394_v56, %v394_v56 }
 0x230   : > { %513 = vrot.lane.b32.xlu0 %v1775_v58, %s1627_s12  ;;  %400 = vrot.lane.b32.xlu1 %v1775_v58, %s1628_s13 }
 0x231   : > { %v470_v61 = vsel %vm468_vm4, %v1777_v60, 0 }
 0x232   : > { %1428 = vmatpush3.bf16.msra.mxu1 %v470_v61 }
 0x233   : > { %1439 = vmatprep.subr.bf16.mxu1 %v1625_v48 }
 0x234   : > { %515 = vrot.lane.b32.xlu1 %v1775_v58, %s1629_s14 }
 0x2a2   : > { %v401_v62 = vpop.permute.xlu1 %400  ;;  %v514_v3 = vpop.permute.xlu0 %513 }
 0x2a3   : > { %v407_v63 = vsel %vm402_vm5, %v401_v62, 0 }
 0x2a4   : > { %1422 = vmatpush3.bf16.xpose.msra.mxu0 %v407_v63 }
 0x2a5   : > { %1433 = vmatprep.subr.bf16.mxu0 %v1625_v48 }
 0x2a6   : > { %v516_v0 = vpop.permute.xlu1 %515 }
 0x2a7   : > { %v521_v2 = vsel %vm402_vm5, %v516_v0, 0 }
 0x2ab   : > { %1424 = vmatmul.mubr.msk.bf16.vlgmr.msra.gmra.mrb[4].mxu0 %vm402_vm5, %v1775_v58 }
 0x2ac   : > { %1434 = vmatpush3.bf16.xpose.msra.mxu0 %v521_v2  ;;  %1435 = vmatprep.mubr.msk.bf16.mxu0 %vm1626_vm3, %v1625_v48 }
 0x2ad   : > { %1445 = vmatprep.subr.bf16.mxu0 %v1625_v48 }
 0x2b3   : > { %1436 = vmatmul.mubr.msk.bf16.vlgmr.msra.gmra.mrb[8].mxu0 %vm402_vm5, %v514_v3 }
 0x2b4   : > { %1447 = vmatprep.mubr.msk.bf16.mxu0 %vm1626_vm3, %v1625_v48 }
 0x37e   : > { %v443_v4 = vpop.f32.mrb[4].mxu0 }
 0x37f   : > { %v449_v5 = vmul.f32 0.25, %v443_v4  ;;  %v1425_v6 = vpop.f32.mrb[5].mxu0 }
 0x380   : > { %v446_v7 = vpop.f32.mrb[6].mxu0 }
 0x381   : > { %v1426_v8 = vpop.f32.mrb[7].mxu0  ;;  %v451_v9 = vsel %vm450_vm6, %v449_v5, -inf }
 0x382   : > { %452 = vmax.xlane.f32.xlu1 %v451_v9 }
 0x386   : > { %v557_v10 = vpop.f32.mrb[8].mxu0 }
 0x387   : > { %v563_v12 = vmul.f32 0.25, %v557_v10  ;;  %v1437_v13 = vpop.f32.mrb[9].mxu0 }
 0x388   : > { %v560_v14 = vpop.f32.mrb[10].mxu0 }
 0x389   : > { %v1438_v16 = vpop.f32.mrb[11].mxu0  ;;  %v564_v18 = vsel %vm450_vm6, %v563_v12, -inf }
 0x38a   : > { %565 = vmax.xlane.f32.xlu0 %v564_v18 }
 0x3a0   : > { %627 = vrot.lane.b32.xlu0 %v1729_v17, %s1628_s13 }
 0x40f   : > { %v453_v19 = vpop.xlane.xlu1 %452 }
 0x410   : > { %v454_v20 = vsub.f32 %v449_v5, %v453_v19 }
 0x412   : > { %v455_v21 = vmul.f32 1.442695, %v454_v20 }
 0x414   : > { %1560 = vpow2.f32 %v455_v21 }
 0x417   : > { %v566_v22 = vpop.xlane.xlu0 %565 }
 0x418   : > { %v567_v24 = vsub.f32 %v563_v12, %v566_v22 }
 0x41a   : > { %v568_v25 = vmul.f32 1.442695, %v567_v24 }
 0x41b   : > { %v628_v44 = vpop.permute.xlu0 %627 }
 0x41c   : > { %1562 = vpow2.f32 %v568_v25  ;;  %1446 = vmatpush3.bf16.msra.mxu0 %v628_v44 }
 0x41d   : > { %1457 = vmatprep.subr.bf16.mxu0 %v1625_v48 }
 0x41e   : > { %v1561_v26 = vpop.eup %1560 }
 0x41f   : > { %v457_v27 = vsel %vm450_vm6, %v1561_v26, 0.0 }
 0x420   : > { %458 = vadd.xlane.f32.xlu1 %v457_v27 }
 0x426   : > { %v1563_v28 = vpop.eup %1562 }
 0x427   : > { %v570_v30 = vsel %vm450_vm6, %v1563_v28, 0.0 }
 0x428   : > { %571 = vadd.xlane.f32.xlu1 %v570_v30 }
 0x439   : > { %577 = vrot.lane.b32.xlu1 %v1777_v60, %s1627_s12 }
 0x43d   : > { %722 = vrot.lane.b32.xlu1 %v1775_v58, %s1630_s15 }
 0x441   : > { %720 = vrot.lane.b32.xlu1 %v1775_v58, %s1631_s16 }
 0x4ad   : > { %v459_v17 = vpop.xlane.xlu1 %458 }
 0x4ae   : > { %1564 = vrcp.f32 %v459_v17 }
 0x4b5   : > { %v572_v31 = vpop.xlane.xlu1 %571 }
 0x4b6   : > { %1566 = vrcp.f32 %v572_v31 }
 0x4b8   : > { %v1565_v32 = vpop.eup %1564 }
 0x4b9   : > { %v461_v33 = vmul.f32 %v1565_v32, %v1561_v26  ;;  %v578_v34 = vpop.permute.xlu1 %577 }
 0x4ba   : > { %v583_v36 = vsel %vm468_vm4, %v578_v34, 0 }
 0x4bb   : > { %v462_v35 = vpack.c.bf16 %v461_v33, %v461_v33 }
 0x4bd   : > { %1430 = vmatmul.mubr.msk.bf16.vlgmr.msra.gmra.mrb[0].mxu1 %vm464_vm7, %v462_v35  ;;  %v723_v51 = vpop.permute.xlu1 %722 }
 0x4be   : > { %1440 = vmatpush3.bf16.msra.mxu1 %v583_v36  ;;  %1441 = vmatprep.mubr.msk.bf16.mxu1 %vm1626_vm3, %v1625_v48  ;;  %v728_v56 = vsel %vm402_vm5, %v723_v51, 0 }
 0x4bf   : > { %1451 = vmatprep.subr.bf16.mxu1 %v1625_v48 }
 0x4c0   : > { %v1567_v41 = vpop.eup %1566 }
 0x4c1   : > { %v574_v42 = vmul.f32 %v1567_v41, %v1563_v28  ;;  %v721_v59 = vpop.permute.xlu1 %720 }
 0x4c3   : > { %v575_v43 = vpack.c.bf16 %v574_v42, %v574_v42 }
 0x4c5   : > { %1442 = vmatmul.mubr.msk.bf16.vlgmr.msra.gmra.mrb[4].mxu1 %vm464_vm7, %v575_v43 }
 0x4c6   : > { %1453 = vmatprep.mubr.msk.bf16.mxu1 %vm1626_vm3, %v1625_v48 }
 0x590   : > { %v506_v45 = vpop.f32.mrb[0].mxu1 }
 0x591   : > { %v1431_v46 = vpop.f32.mrb[1].mxu1  ;;  %v512_v13 = vpack.c.bf16 %v506_v45, %v506_v45 }
 0x592   : > { %v509_v47 = vpop.f32.mrb[2].mxu1 }
 0x593   : > { %v1432_v49 = vpop.f32.mrb[3].mxu1 }
 0x598   : > { %v619_v52 = vpop.f32.mrb[4].mxu1 }
 0x599   : > { %v625_v53 = vpack.c.bf16 %v619_v52, %v619_v52  ;;  %v1443_v54 = vpop.f32.mrb[5].mxu1 }
 0x59a   : > { %v622_v55 = vpop.f32.mrb[6].mxu1 }
 0x59b   : > { %v1444_v57 = vpop.f32.mrb[7].mxu1  ;;  %1448 = vmatmul.mubr.msk.bf16.vlgmr.msra.gmra.mrb[12].mxu0 %vm402_vm5, %v625_v53 }
 0x59c   : > { %1458 = vmatpush3.bf16.xpose.msra.mxu0 %v728_v56  ;;  %1459 = vmatprep.mubr.msk.bf16.mxu0 %vm1626_vm3, %v1625_v48 }
 0x59d   : > { %1469 = vmatprep.subr.bf16.mxu0 %v1625_v48 }
 0x5a3   : > { %1460 = vmatmul.mubr.msk.bf16.vlgmr.msra.gmra.mrb[16].mxu0 %vm402_vm5, %v721_v59 }
 0x5a4   : > { %1471 = vmatprep.mubr.msk.bf16.mxu0 %vm1626_vm3, %v1625_v48 }
 0x66e   : > { %v667_v61 = vpop.f32.mrb[12].mxu0 }
 0x66f   : > { %v1449_v62 = vpop.f32.mrb[13].mxu0 }
 0x670   : > { %v670_v63 = vpop.f32.mrb[14].mxu0 }
 0x671   : > { %v1450_v0 = vpop.f32.mrb[15].mxu0 }
 0x676   : > { %v764_v2 = vpop.f32.mrb[16].mxu0 }
 0x677   : > { %v770_v3 = vmul.f32 0.25, %v764_v2  ;;  %v1461_v4 = vpop.f32.mrb[17].mxu0 }
 0x678   : > { %v767_v5 = vpop.f32.mrb[18].mxu0 }
 0x679   : > { %v1462_v6 = vpop.f32.mrb[19].mxu0  ;;  %v771_v7 = vsel %vm450_vm6, %v770_v3, -inf }
 0x67a   : > { %772 = vmax.xlane.f32.xlu1 %v771_v7  ;;  %v1043_v6 = vsub.s32 4, %v1749_v37 }
 0x68b   : > { %674 = vrot.lane.b32.xlu1 %v1723_v11, %s1628_s13 }
 0x68f   : > { %882 = vrot.lane.b32.xlu1 %v1775_v58, %s1632_s17 }
 0x693   : > { %880 = vrot.lane.b32.xlu1 %v1775_v58, %s1633_s19 }
 0x707   : > { %v773_v8 = vpop.xlane.xlu1 %772 }
 0x708   : > { %v774_v9 = vsub.f32 %v770_v3, %v773_v8 }
 0x70a   : > { %v775_v10 = vmul.f32 1.442695, %v774_v9 }
 0x70b   : > { %v675_v12 = vpop.permute.xlu1 %674 }
 0x70c   : > { %1568 = vpow2.f32 %v775_v10  ;;  %1452 = vmatpush3.bf16.msra.mxu1 %v675_v12 }
 0x70d   : > { %1463 = vmatprep.subr.bf16.mxu1 %v1625_v48 }
 0x70f   : > { %1454 = vmatmul.mubr.msk.bf16.vlgmr.msra.gmra.mrb[8].mxu1 %vm402_vm5, %v512_v13  ;;  %v883_v21 = vpop.permute.xlu1 %882 }
 0x710   : > { %1465 = vmatprep.mubr.msk.bf16.mxu1 %vm1626_vm3, %v1625_v48  ;;  %v888_v24 = vsel %vm402_vm5, %v883_v21, 0  ;;  %v280_v21 = vld [vmem:[%s1711_s11 + $0x98] sm:$0xff] }
 0x713   : > { %v881_v25 = vpop.permute.xlu1 %880 }
 0x716   : > { %v1569_v11 = vpop.eup %1568 }
 0x717   : > { %v777_v14 = vsel %vm450_vm6, %v1569_v11, 0.0 }
 0x718   : > { %778 = vadd.xlane.f32.xlu0 %v777_v14 }
 0x72e   : > { %783 = vrot.lane.b32.xlu0 %v1777_v60, %s1631_s16 }
 0x7a5   : > { %v779_v58 = vpop.xlane.xlu0 %778 }
 0x7a6   : > { %1570 = vrcp.f32 %v779_v58 }
 0x7a9   : > { %v784_v16 = vpop.permute.xlu0 %783 }
 0x7aa   : > { %v789_v18 = vsel %vm468_vm4, %v784_v16, 0 }
 0x7ab   : > { %1464 = vmatpush3.bf16.msra.mxu1 %v789_v18 }
 0x7ac   : > { %1475 = vmatprep.subr.bf16.mxu1 %v1625_v48 }
 0x7b0   : > { %v1571_v19 = vpop.eup %1570 }
 0x7b1   : > { %v781_v20 = vmul.f32 %v1571_v19, %v1569_v11 }
 0x7b3   : > { %v782_v22 = vpack.c.bf16 %v781_v20, %v781_v20 }
 0x7b5   : > { %1466 = vmatmul.mubr.msk.bf16.vlgmr.msra.gmra.mrb[12].mxu1 %vm464_vm7, %v782_v22 }
 0x7b6   : > { %1476 = vmatpush3.bf16.xpose.msra.mxu1 %v888_v24  ;;  %1477 = vmatprep.mubr.msk.bf16.mxu1 %vm1626_vm3, %v1625_v48  ;;  %v277_v24 = vld [vmem:[%s1711_s11 + $0x80] sm:$0xff] }
 0x7b7   : > { %1487 = vmatprep.subr.bf16.mxu1 %v1625_v48 }
 0x7bd   : > { %1478 = vmatmul.mubr.msk.bf16.vlgmr.msra.gmra.mrb[16].mxu1 %vm402_vm5, %v881_v25  ;;  %v279_v25 = vld [vmem:[%s1711_s11 + $0x90] sm:$0xff] }
 0x7be   : > { %1489 = vmatprep.mubr.msk.bf16.mxu1 %vm1626_vm3, %v1625_v48 }
 0x7e2   : > { %v714_v26 = vpop.f32.mrb[8].mxu1 }
 0x7e3   : > { %v715_v27 = vadd.f32 %v714_v26, %v667_v61  ;;  %v1455_v28 = vpop.f32.mrb[9].mxu1  ;;  %v1070_v26 = vpack.c.bf16 %v279_v25, %v277_v24 }
 0x7e4   : > { %v717_v30 = vpop.f32.mrb[10].mxu1  ;;  %v284_v28 = vld [vmem:[%s1711_s11 + $0xb8] sm:$0xff] }
 0x7e5   : > { %v1456_v17 = vpop.f32.mrb[11].mxu1 }
 0x7e6   : > { %v281_v17 = vld [vmem:[%s1711_s11 + $0xa0] sm:$0xff] }
 0x888   : > { %v825_v31 = vpop.f32.mrb[12].mxu1 }
 0x889   : > { %v1467_v32 = vpop.f32.mrb[13].mxu1  ;;  %v831_v51 = vpack.c.bf16 %v825_v31, %v825_v31  ;;  %v283_v31 = vld [vmem:[%s1711_s11 + $0xb0] sm:$0xff] }
 0x88a   : > { %v828_v33 = vpop.f32.mrb[14].mxu1  ;;  %v1072_v32 = vpack.c.bf16 %v283_v31, %v281_v17 }
 0x88b   : > { %v1468_v34 = vpop.f32.mrb[15].mxu1  ;;  %v286_v33 = vld [vmem:[%s1711_s11 + $0xc8] sm:$0xff] }
 0x88c   : > { %v288_v34 = vld [vmem:[%s1711_s11 + $0xd8] sm:$0xff] }
 0x890   : > { %v924_v35 = vpop.f32.mrb[16].mxu1 }
 0x891   : > { %v930_v36 = vmul.f32 0.25, %v924_v35  ;;  %v1479_v41 = vpop.f32.mrb[17].mxu1  ;;  %v1075_v35 = vpack.c.bf16 %v288_v34, %v286_v33 }
 0x892   : > { %v927_v42 = vpop.f32.mrb[18].mxu1  ;;  %v287_v41 = vld [vmem:[%s1711_s11 + $0xd0] sm:$0xff] }
 0x893   : > { %v1480_v43 = vpop.f32.mrb[19].mxu1  ;;  %v931_v44 = vsel %vm450_vm6, %v930_v36, -inf }
 0x894   : > { %932 = vmax.xlane.f32.xlu0 %v931_v44  ;;  %v290_v43 = vld [vmem:[%s1711_s11 + $0xe8] sm:$0xff]  ;;  %v292_v44 = vld [vmem:[%s1711_s11 + $0xf8] sm:$0xff] }
 0x8aa   : > { %833 = vrot.lane.b32.xlu0 %v1737_v23, %s1628_s13 }
 0x8ae   : > { %993 = vrot.lane.b32.xlu0 %v1744_v29, %s1628_s13 }
 0x921   : > { %v933_v45 = vpop.xlane.xlu0 %932 }
 0x922   : > { %v934_v46 = vsub.f32 %v930_v36, %v933_v45  ;;  %v285_v36 = vld [vmem:[%s1711_s11 + $0xc0] sm:$0xff] }
 0x923   : > { %v1074_v42 = vpack.c.bf16 %v287_v41, %v285_v36  ;;  %v289_v45 = vld [vmem:[%s1711_s11 + $0xe0] sm:$0xff] }
 0x924   : > { %v935_v47 = vmul.f32 1.442695, %v934_v46  ;;  %v1077_v46 = vpack.c.bf16 %v292_v44, %v290_v43 }
 0x925   : > { %v834_v49 = vpop.permute.xlu0 %833 }
 0x926   : > { %1572 = vpow2.f32 %v935_v47  ;;  %1470 = vmatpush3.bf16.msra.mxu0 %v834_v49  ;;  %v291_v47 = vld [vmem:[%s1711_s11 + $0xf0] sm:$0xff] }
 0x927   : > { %1481 = vmatprep.subr.bf16.mxu0 %v1625_v48  ;;  %v1076_v49 = vpack.c.bf16 %v291_v47, %v289_v45  ;;  %v1152_v47 = vsub.s32 7, %v1749_v37 }
 0x929   : > { %1472 = vmatmul.mubr.msk.bf16.vlgmr.msra.gmra.mrb[20].mxu0 %vm402_vm5, %v831_v51  ;;  %v994_v29 = vpop.permute.xlu0 %993  ;;  %v294_v51 = vld [vmem:[%s1711_s11 + $0x108] sm:$0xff] }
 0x92a   : > { %1483 = vmatprep.mubr.msk.bf16.mxu0 %vm1626_vm3, %v1625_v48  ;;  %1488 = vmatpush3.bf16.msra.mxu1 %v994_v29 }
 0x930   : > { %v1573_v52 = vpop.eup %1572 }
 0x931   : > { %v937_v23 = vsel %vm450_vm6, %v1573_v52, 0.0 }
 0x932   : > { %938 = vadd.xlane.f32.xlu1 %v937_v23  ;;  %v293_v23 = vld [vmem:[%s1711_s11 + $0x100] sm:$0xff] }
 0x943   : > { %943 = vrot.lane.b32.xlu1 %v1777_v60, %s1633_s19 }
 0x9bf   : > { %v939_v53 = vpop.xlane.xlu1 %938 }
 0x9c0   : > { %1574 = vrcp.f32 %v939_v53  ;;  %v295_v53 = vld [vmem:[%s1711_s11 + $0x110] sm:$0xff] }
 0x9c3   : > { %v944_v54 = vpop.permute.xlu1 %943 }
 0x9c4   : > { %v949_v55 = vsel %vm468_vm4, %v944_v54, 0  ;;  %v1142_v54 = vpack.c.bf16 %v295_v53, %v293_v23 }
 0x9c5   : > { %1482 = vmatpush3.bf16.msra.mxu0 %v949_v55 }
 0x9ca   : > { %v1575_v56 = vpop.eup %1574 }
 0x9cb   : > { %v941_v57 = vmul.f32 %v1575_v56, %v1573_v52  ;;  %v296_v52 = vld [vmem:[%s1711_s11 + $0x118] sm:$0xff] }
 0x9cc   : > { %v1143_v29 = vpack.c.bf16 %v296_v52, %v294_v51 }
 0x9cd   : > { %v942_v59 = vpack.c.bf16 %v941_v57, %v941_v57 }
 0x9ce   : > { %1154 = vmatprep.subr.bf16.mxu1 %v1143_v29 }
 0x9cf   : > { %1484 = vmatmul.mubr.msk.bf16.vlgmr.msra.gmra.mrb[24].mxu0 %vm464_vm7, %v942_v59  ;;  %v1061_v59 = vsub.s32 5, %v1749_v37 }
 0x9d0   : > { %1121 = vmatprep.mubr.bf16.mxu0 %v1624_v15  ;;  %v1044_v15 = vrot.slane %v1753_v39, %v1043_v6 }
 0x9fc   : > { %v873_v48 = vpop.f32.mrb[20].mxu0 }
 0x9fd   : > { %v879_v61 = vadd.f32 %v873_v48, %v715_v27  ;;  %v1473_v62 = vpop.f32.mrb[21].mxu0  ;;  %v282_v27 = vld [vmem:[%s1711_s11 + $0xa8] sm:$0xff]  ;;  %v1066_v48 = vsub.s32 6, %v1749_v37 }
 0x9fe   : > { %v876_v63 = vpop.f32.mrb[22].mxu0  ;;  %v1073_v30 = vpack.c.bf16 %v284_v28, %v282_v27 }
 0x9ff   : > { %v1474_v60 = vpop.f32.mrb[23].mxu0 }
 0xa00   : > { %v1067_v60 = vrot.slane %v1753_v39, %v1066_v48 }
 0xaa2   : > { %v985_v0 = vpop.f32.mrb[24].mxu0 }
 0xaa3   : > { %v991_v2 = vpack.c.bf16 %v985_v0, %v985_v0  ;;  %v1485_v3 = vpop.f32.mrb[25].mxu0 }
 0xaa4   : > { %v988_v4 = vpop.f32.mrb[26].mxu0 }
 0xaa5   : > { %v1486_v5 = vpop.f32.mrb[27].mxu0  ;;  %1490 = vmatmul.mubr.msk.bf16.vlgmr.msra.gmra.mrb[20].mxu1 %vm402_vm5, %v991_v2  ;;  %v298_v4 = vld [vmem:[%s1711_s11 + $0x128] sm:$0xff] }
 0xaa6   : > { %1155 = vmatpush1.bf16.xpose.msra.mxu1 %v1142_v54  ;;  %v300_v5 = vld [vmem:[%s1711_s11 + $0x138] sm:$0xff] }
 0xaa7   : > { %v1145_v6 = vpack.c.bf16 %v300_v5, %v298_v4  ;;  %v1229_v4 = vld [vmem:[%s1976_s3 + $0x28] sm:$0xff] (!%p1387_p8) }
 0xaa9   : > { %1156 = vmatprep.subr.bf16.mxu1 %v1145_v6  ;;  %v1230_v6 = vld [vmem:[%s1976_s3 + $0x30] sm:$0xff] (!%p1387_p8) }
 0xb78   : > { %v1033_v7 = vpop.f32.mrb[20].mxu1 }
 0xb79   : > { %v1039_v8 = vadd.f32 %v1033_v7, %v879_v61  ;;  %v1491_v9 = vpop.f32.mrb[21].mxu1  ;;  %v1062_v61 = vrot.slane %v1753_v39, %v1061_v59  ;;  %v297_v7 = vld [vmem:[%s1711_s11 + $0x120] sm:$0xff] }
 0xb7a   : > { %v1036_v10 = vpop.f32.mrb[22].mxu1  ;;  %v302_v9 = vld [vmem:[%s1711_s11 + $0x148] sm:$0xff] }
 0xb7b   : > { %v1040_v12 = vadd.f32 %v1039_v8, %v1714_v1  ;;  %v1492_v13 = vpop.f32.mrb[23].mxu1  ;;  %v278_v1 = vld [vmem:[%s1711_s11 + $0x88] sm:$0xff]  ;;  %v299_v8 = vld [vmem:[%s1711_s11 + $0x130] sm:$0xff]  ;;  %v304_v10 = vld [vmem:[%s1711_s11 + $0x158] sm:$0xff] }
 0xb7c   : > { %v1071_v22 = vpack.c.bf16 %v280_v21, %v278_v1  ;;  %v301_v13 = vld [vmem:[%s1711_s11 + $0x140] sm:$0xff]  ;;  %v307_v1 = vld [vmem:[%s1711_s11 + $0x170] sm:$0xff] }
 0xb7d   : > { %v1868_v11 = vadd.f32 %v1044_v15, %v1040_v12  ;;  %v1144_v15 = vpack.c.bf16 %v299_v8, %v297_v7  ;;  %v1147_v12 = vpack.c.bf16 %v304_v10, %v302_v9  ;;  %v1231_v7 = vld [vmem:[%s1976_s3 + $0x38] sm:$0xff] (!%p1387_p8) }
 0xb7e   : > { %1089 = vmatprep.subr.bf16.mxu0 %v1071_v22  ;;  %v1080_v22 = vsub.s32 3, %v1749_v37  ;;  %v1236_v8 = vpack.c.bf16 (!%p1387_p8), %v1231_v7, %v1230_v6 }
 0xb7f   : > { %v1046_v14 = vsel %vm311_vm1, %v1868_v11, 0.0  ;;  %1090 = vmatpush1.bf16.msra.mxu0 %v1070_v26  ;;  %1157 = vmatpush1.bf16.xpose.msra.mxu1 %v1144_v15 }
 0xb80   : > { %1047 = vadd.xlane.f32.xlu1 %v1046_v14  ;;  %1091 = vmatprep.subr.bf16.mxu0 %v1073_v30  ;;  %v303_v14 = vld [vmem:[%s1711_s11 + $0x150] sm:$0xff]  ;;  %v1081_v24 = vrot.slane %v1753_v39, %v1080_v22  ;;  %v1085_v25 = vrot.slane %v1767_v50, %v1080_v22 }
 0xb81   : > { %1158 = vmatprep.subr.bf16.mxu1 %v1147_v12  ;;  %v1200_v12 = vld [vmem:[%s1975_s2] sm:$0x3] (!%p1387_p8) }
 0xb83   : > { %1092 = vmatpush1.bf16.msra.mxu0 %v1072_v32 }
 0xb84   : > { %1093 = vmatprep.subr.bf16.mxu0 %v1075_v35 }
 0xb87   : > { %1094 = vmatpush1.bf16.msra.mxu0 %v1074_v42 }
 0xb88   : > { %1095 = vmatprep.subr.bf16.mxu0 %v1077_v46 }
 0xb8b   : > { %1096 = vmatpush1.bf16.msra.mxu0 %v1076_v49  ;;  %v1153_v49 = vrot.slane %v1753_v39, %v1152_v47 }
 0xc0d   : > { %v1048_v58 = vpop.xlane.xlu1 %1047 }
 0xc0e   : > { %v1049_v16 = vmul.f32 0.015625, %v1048_v58  ;;  %v1146_v58 = vpack.c.bf16 %v303_v14, %v301_v13  ;;  %v1217_v13 = vrot.slane (!%p1387_p8), %v1200_v12, %v328_v38 }
 0xc10   : > { %v1050_v18 = vsub.f32 %v1868_v11, %v1049_v16  ;;  %1159 = vmatpush1.bf16.xpose.msra.mxu1 %v1146_v58  ;;  %v306_v16 = vld [vmem:[%s1711_s11 + $0x168] sm:$0xff] }
 0xc12   : > { %v1051_v19 = vmul.f32 %v1050_v18, %v1050_v18 }
 0xc14   : > { %v1052_v20 = vsel %vm311_vm1, %v1051_v19, 0.0 }
 0xc15   : > { %1053 = vadd.xlane.f32.xlu0 %v1052_v20  ;;  %v305_v20 = vld [vmem:[%s1711_s11 + $0x160] sm:$0xff] }
 0xc16   : > { %v1148_v21 = vpack.c.bf16 %v307_v1, %v305_v20  ;;  %v1388_v1 = vld [vmem:[%s1977_s4] ss:$0 sm:$0xff] (!%p1387_p8) }
 0xca2   : > { %v1054_v55 = vpop.xlane.xlu0 %1053 }
 0xca3   : > { %v1055_v56 = vmul.f32 0.015625, %v1054_v55 }
 0xca5   : > { %v1056_v57 = vadd.f32 1e-05, %v1055_v56 }
 0xca7   : > { %1576 = vrsqrt.f32 %v1056_v57 }
 0xcb1   : > { %v1577_v62 = vpop.eup %1576 }
 0xcb2   : > { %v1058_v63 = vmul.f32 %v1577_v62, %v1050_v18  ;;  %v308_v18 = vld [vmem:[%s1711_s11 + $0x178] sm:$0xff]  ;;  %v1226_v62 = vld [vmem:[%s1976_s3 + $0x10] sm:$0xff] (!%p1387_p8) }
 0xcb3   : > { %v1149_v19 = vpack.c.bf16 %v308_v18, %v306_v16  ;;  %v1222_v16 = vrot.slane (!%p1387_p8), %v1200_v12, %v333_v40 }
 0xcb4   : > { %v1063_v0 = vmul.f32 %v1062_v61, %v1058_v63  ;;  %v1225_v61 = vld [vmem:[%s1976_s3 + $0x8] sm:$0xff] (!%p1387_p8)  ;;  %v1634_v63 = vmov (!%p1387_p8), 0.0  }
 0xcb5   : > { %1160 = vmatprep.subr.bf16.mxu1 %v1149_v19  ;;  %1493 = vmatprep.subr.bf16.mxu0 (!%p1387_p8), %v1634_v63 }
 0xcb6   : > { %v1068_v2 = vadd.f32 %v1067_v60, %v1063_v0  ;;  %1161 = vmatpush1.bf16.xpose.msra.mxu1 %v1148_v21  ;;  %v1227_v0 = vld [vmem:[%s1976_s3 + $0x18] sm:$0xff] (!%p1387_p8) }
 0xcb8   : > { %v1069_v3 = vpack.c.bf16 %v1068_v2, %v1068_v2  ;;  %v1234_v2 = vpack.c.bf16 (!%p1387_p8), %v1227_v0, %v1226_v62 }
 0xcba   : > { %1386 = vmatmul.mubr.msk.bf16.vlgmr.msra.gmra.mrb[28].mxu0 %vm353_vm2, %v1069_v3  ;;  %v1228_v3 = vld [vmem:[%s1976_s3 + $0x20] sm:$0xff] (!%p1387_p8) }
 0xcbb   : > { %1501 = vmatprep.mubr.msk.bf16.mxu0 (!%p1387_p8), %vm1635_vm8, %v1634_v63  ;;  %v1235_v5 = vpack.c.bf16 (!%p1387_p8), %v1229_v4, %v1228_v3 }
 0xd8d   : > { %v1123_v26 = vpop.f32.mrb[28].mxu0 }
 0xd8e   : > { %v1124_v27 = vadd.f32 %v1123_v26, %v1081_v24  ;;  %v1125_v28 = vpop.f32.mrb[29].mxu0 }
 0xd8f   : > { %v1126_v30 = vadd.f32 %v1125_v28, %v1085_v25  ;;  %v1127_v17 = vpop.f32.mrb[30].mxu0 }
 0xd90   : > { %v1132_v31 = vmul.f32 0.70710677, %v1124_v27  ;;  %v1128_v32 = vpop.f32.mrb[31].mxu0  ;;  %v1130_v36 = vmul.f32 0.5, %v1124_v27 }
 0xd91   : > { %v1133_v33 = vmul.f32 0.70710677, %v1126_v30  ;;  %v1131_v42 = vmul.f32 0.5, %v1126_v30 }
 0xd92   : > { %1578 = verf.f32 %v1132_v31 }
 0xd93   : > { %1580 = verf.f32 %v1133_v33 }
 0xd9c   : > { %v1579_v34 = vpop.eup %1578 }
 0xd9d   : > { %v1581_v35 = vpop.eup %1580  ;;  %v1136_v41 = vadd.f32 1.0, %v1579_v34 }
 0xd9e   : > { %v1137_v43 = vadd.f32 1.0, %v1581_v35 }
 0xd9f   : > { %v1138_v44 = vmul.f32 %v1136_v41, %v1130_v36 }
 0xda0   : > { %v1139_v45 = vmul.f32 %v1137_v43, %v1131_v42 }
 0xda1   : > { %v1140_v50 = vpack.c.bf16 %v1138_v44, %v1138_v44 }
 0xda2   : > { %v1141_v46 = vpack.c.bf16 %v1139_v45, %v1139_v45 }
 0xda4   : > { %1186 = vmatprep.mubr.bf16.mxu1 %v1141_v46 }
 0xda5   : > { %1187 = vmatmul.mubr.bf16.vlgmr.msra.gmra.mrb[24].mxu1 %v1140_v50 }
 0xe77   : > { %1199 = sbr.rel (%p1387_p8) target bundleno = 4239 (0x108f), region = 48 }
 0xe78   : > { %v1188_v51 = vpop.f32.mrb[24].mxu1 }
 0xe79   : > { %v1189_v52 = vadd.f32 %v1188_v51, %v1153_v49  ;;  %v1190_v23 = vpop.f32.mrb[25].mxu1 }
 0xe7a   : > { %v1191_v29 = vpop.f32.mrb[26].mxu1 }
 0xe7b   : > { %v1194_v53 = vadd.f32 %v1189_v52, %v1868_v11  ;;  %v1192_v54 = vpop.f32.mrb[27].mxu1  ;;  %v1224_v11 = vld [vmem:[%s1976_s3] sm:$0xff] (!%p1387_p8) }
 0xe7c   : > { %v1233_v60 = vpack.c.bf16 (!%p1387_p8), %v1225_v61, %v1224_v11 }
 0xe7d   : > { %1195 = vst.msk [vmem:[#allocation2] sm:$0x3f] %vm311_vm1, %v1194_v53  ;;  %v1201_v55 = vsel (!%p1387_p8), %vm311_vm1, %v1194_v53, 0.0 }
 0xe7e   : > { %1202 = vadd.xlane.f32.xlu0 %v1201_v55  ;;  %1494 = vmatpush3.bf16.msra.mxu0 %v1233_v60 }
 0xe7f   : > { %1495 = vmatprep.subr.bf16.mxu0 %v1634_v63 }
 0xe82   : > { %1496 = vmatpush3.bf16.msra.mxu0 %v1234_v2 }
 0xe83   : > { %1497 = vmatprep.subr.bf16.mxu0 %v1634_v63 }
 0xe86   : > { %1498 = vmatpush3.bf16.msra.mxu0 %v1235_v5 }
 0xe87   : > { %1499 = vmatprep.subr.bf16.mxu0 %v1634_v63 }
 0xe8a   : > { %1500 = vmatpush3.bf16.msra.mxu0 %v1236_v8 }
 0xf0b   : > { %v1203_v56 = vpop.xlane.xlu0 %1202 }
 0xf0c   : > { %v1204_v57 = vmul.f32 0.015625, %v1203_v56 }
 0xf0e   : > { %v1205_v59 = vsub.f32 %v1194_v53, %v1204_v57 }
 0xf10   : > { %v1206_v48 = vmul.f32 %v1205_v59, %v1205_v59 }
 0xf12   : > { %v1207_v39 = vsel %vm311_vm1, %v1206_v48, 0.0 }
 0xf13   : > { %1208 = vadd.xlane.f32.xlu0 %v1207_v39 }
 0xfa0   : > { %v1209_v15 = vpop.xlane.xlu0 %1208 }
 0xfa1   : > { %v1210_v9 = vmul.f32 0.015625, %v1209_v15 }
 0xfa3   : > { %v1211_v10 = vadd.f32 1e-05, %v1210_v9 }
 0xfa5   : > { %1582 = vrsqrt.f32 %v1211_v10 }
 0xfaf   : > { %v1583_v14 = vpop.eup %1582 }
 0xfb0   : > { %v1213_v58 = vmul.f32 %v1583_v14, %v1205_v59 }
 0xfb2   : > { %v1218_v18 = vmul.f32 %v1217_v13, %v1213_v58 }
 0xfb4   : > { %v1223_v19 = vadd.f32 %v1222_v16, %v1218_v18 }
 0xfb6   : > { %v1232_v20 = vpack.c.bf16 %v1223_v19, %v1223_v19 }
 0xfb8   : > { %1502 = vmatmul.mubr.msk.bf16.vlgmr.msra.gmra.mrb[0].mxu0 %vm353_vm2, %v1232_v20 }
0x108b   : > { %v1281_v21 = vpop.f32.mrb[0].mxu0 }
0x108c   : > { %v1282_v22 = vadd.f32 %v1388_v1, %v1281_v21  ;;  %v1503_v24 = vpop.f32.mrb[1].mxu0 }
0x108d   : > { %v1284_v25 = vpop.f32.mrb[2].mxu0 }
0x108e   : > { %1287 = vst.msk [vmem:[%s1706_s8] sm:$0x3f] %vm311_vm1, %v1282_v22  ;;  %v1504_v38 = vpop.f32.mrb[3].mxu0 }
0x108f PF: > { %s15_s22 = sadd.s32 1, %s1622_s22   ;;  %s1979_s18 = smov %s1614_s20 }
0x1090   : > { %p12_p9 = scmp.ge.s32.totalorder %s15_s22, 6   ;;  %s1980_s19 = smov %s1618_s21 }
0x1091   : > { %s1981_s20 = smov %s1984_s23  ;;  %s1982_s21 = smov %s1988_s24 }
0x1092   :  { %14 = sbr.rel (!%p12_p9) target bundleno = 3 (0x3), region = 81 }

// kernel: _forward.8
= control target key start
LH: loop header
LB: loop body
LE: loop exit
PB: predicated region body
PF: predicated region fallthrough
CT: control target
= control target key end

     0   :  { %s2066_s18 = smov 0   ;;  %s2068_s19 = smov 0   ;;  %s2577_s0 = inlined_call_operand.vmem [shape: f32[2,9,64], index: 0, kind: input, shape index: {}]   ;;  %s2578_s1 = inlined_call_operand.vmem [shape: f32[2,200,256], index: 1, kind: input, shape index: {}]   ;;  %s2579_s2 = inlined_call_operand.vmem [shape: f32[2,64], index: 2, kind: input, shape index: {}]   ;;  %s2580_s3 = inlined_call_operand.vmem [shape: f32[64,775], index: 3, kind: input, shape index: {}]   ;;  %s2581_s4 = inlined_call_operand.vmem [shape: f32[1,775], index: 4, kind: input, shape index: {}]   ;;  %s2582_s5 = inlined_call_operand.vmem [shape: f32[2,3,775], index: 5, kind: output, shape index: {}]  }
   0x1   :  { %s2070_s20 = smov 0   ;;  %s2072_s21 = smov 0  }
   0x2   :  { %s2074_s22 = smov 0  }
   0x3 LB: > { %s24_s23 = sadd.s32 1, %s2012_s20  ;;  %s27_s24 = sadd.s32 1, %s2016_s21  ;;  %s2020_s22 = sphi %s2074_s22, %s15_s22   ;;  %s2016_s21 = sphi %s2072_s21, %s2586_s21   ;;  %s2012_s20 = sphi %s2070_s20, %s2585_s20   ;;  %s2008_s19 = sphi %s2068_s19, %s2584_s19   ;;  %s2004_s18 = sphi %s2066_s18, %s2583_s18  }
   0x4   : > { %p25_p0 = scmp.ge.s32.totalorder %s24_s23, 2  ;;  %p1735_p1 = scmp.ge.s32.totalorder %s2020_s22, 1 }
   0x5   : > { %p209_p2 = scmp.lt.s32.totalorder %s2020_s22, 5 }
   0x6   : > { %s2588_s23 = smov (%p25_p0, %s24_s23), 0  ;;  %s2590_s24 = smov (!%p25_p0, %s27_s24), %s2016_s21 }
   0x7   : > { %p210_p3 = pnand %p1735_p1, %p209_p2  ;;  %p29_p4 = scmp.ge.s32.totalorder %s2590_s24, 2 }
   0x8   : > { %p242_p5 = scmp.lt.s32.totalorder (!%p210_p3), %s2008_s19, 1  ;;  %p247_p6 = scmp.lt.s32.totalorder (!%p210_p3), %s2004_s18, 1 }
   0x9   : > { %s2592_s24 = smov (%p29_p4, %s2590_s24), 0  ;;  %213 = sbr.rel (%p210_p3) target bundleno = 4284 (0x10bc), region = 40 }
   0xa   : > { %p1740_p7 = scmp.ne.s32.totalorder (!%p210_p3), %s2004_s18, 0 }
  0x10   : > { %s2594_s19 = smov (!%p242_p5, %s2008_s19), 1  ;;  %261 = sbr.rel (%p1740_p7) target bundleno = 23 (0x17), region = 44 }
  0x11   : > { %s248_s25 = scalar_select %p247_p6, %s2004_s18, 1 }
  0x12   : > { %s1762_s26 = sshll.u32 %s2594_s19, 4  ;;  %s1877_s27 = smul.u32 28, %s2594_s19  ;;  %vm264_vm0 = vcmask (!%p1740_p7), 523264   ;;  %vm266_vm1 = vcmask (!%p1740_p7), 516096  }
  0x13   : > { %s246_s30 = scalar_lea.vmem %s2577_s0, %s1762_s26  ;;  %s1876_s6 = smul.u32 400, %s248_s25 }
  0x14   : > { %s2106_s9 = scalar_lea.vmem %s2582_s5, %s1877_s27  ;;  %v262_v0 = vld [vmem:[%s246_s30] sm:$0xff] (!%p1740_p7)  ;;  %v263_v1 = vld [vmem:[%s246_s30 + $0x8] sm:$0x1] (!%p1740_p7) }
  0x15   : > { %s2111_s12 = scalar_lea.vmem %s2578_s1, %s1876_s6  ;;  %265 = vst.msk [vmem:[#allocation2] sm:$0xff] (!%p1740_p7), %vm264_vm0, %v262_v0 }
  0x16   : > { %267 = vst.msk [vmem:[#allocation2 + $0x8] sm:$0x1] (!%p1740_p7), %vm266_vm1, %v263_v1 }
  0x17 PF: > { %vm320_vm2 = vcmask 523264   ;;  %vm324_vm3 = vcmask 516096   ;;  %v271_v16 = vld [vmem:[%s2111_s12 + $0x8] sm:$0xff]  ;;  %v273_v17 = vld [vmem:[%s2111_s12 + $0x18] sm:$0xff]  ;;  %v270_v19 = vld [vmem:[%s2111_s12] sm:$0xff]  ;;  %v2022_v39 = vmov 0   ;;  %v349_v45 = vlaneseq }
  0x18   : > { %v2128_v18 = vpack.c.bf16 %v273_v17, %v271_v16  ;;  %v272_v20 = vld [vmem:[%s2111_s12 + $0x10] sm:$0xff]  ;;  %v275_v22 = vld [vmem:[%s2111_s12 + $0x28] sm:$0xff]  ;;  %v277_v23 = vld [vmem:[%s2111_s12 + $0x38] sm:$0xff]  ;;  %413 = vmatprep.mubr.bf16.mxu0 %v2022_v39  ;;  %v2023_v63 = vmov 0.0   ;;  %vm2024_vm4 = vmmov 0   ;;  %vm507_vm5 = vcmask 1043456  }
  0x19   : > { %v362_v21 = vpack.c.bf16 %v272_v20, %v270_v19  ;;  %v2135_v24 = vpack.c.bf16 %v277_v23, %v275_v22  ;;  %v274_v25 = vld [vmem:[%s2111_s12 + $0x20] sm:$0xff]  ;;  %v276_v26 = vld [vmem:[%s2111_s12 + $0x30] sm:$0xff]  ;;  %v279_v28 = vld [vmem:[%s2111_s12 + $0x48] sm:$0xff]  ;;  %v2155_v48 = vshrl.u32 %v349_v45, 7  ;;  %1798 = vmatprep.subr.bf16.mxu1 %v2023_v63  ;;  %1800 = vmatprep.mubr.msk.bf16.mxu1 %vm2024_vm4, %v2023_v63  ;;  %vm508_vm6 = vcmask 1044480   ;;  %s2026_s13 = smov 48  }
  0x1a   : > { %381 = vmatprep.subr.bf16.mxu0 %v2128_v18  ;;  %v364_v27 = vpack.c.bf16 %v276_v26, %v274_v25  ;;  %v281_v29 = vld [vmem:[%s2111_s12 + $0x58] sm:$0xff]  ;;  %v278_v31 = vld [vmem:[%s2111_s12 + $0x40] sm:$0xff]  ;;  %v280_v32 = vld [vmem:[%s2111_s12 + $0x50] sm:$0xff]  ;;  %s2027_s14 = smov 64   ;;  %s2028_s15 = smov 112   ;;  %vm428_vm7 = vcmask 130048  }
  0x1b   : > { %382 = vmatpush1.bf16.msra.mxu0 %v362_v21  ;;  %v2142_v30 = vpack.c.bf16 %v281_v29, %v279_v28  ;;  %v366_v33 = vpack.c.bf16 %v280_v32, %v278_v31  ;;  %v283_v34 = vld [vmem:[%s2111_s12 + $0x68] sm:$0xff]  ;;  %v285_v35 = vld [vmem:[%s2111_s12 + $0x78] sm:$0xff]  ;;  %v282_v36 = vld [vmem:[%s2111_s12 + $0x60] sm:$0xff]  ;;  %v2158_v49 = vsub.s32 0, %v2155_v48  ;;  %v2166_v54 = vsub.s32 1, %v2155_v48  ;;  %s2029_s16 = smov 32  }
  0x1c   : > { %v2114_v2 = vld [vmem:[#allocation2] sm:$0xff]  ;;  %383 = vmatprep.subr.bf16.mxu0 %v2135_v24  ;;  %v2150_v37 = vpack.c.bf16 %v285_v35, %v283_v34  ;;  %v284_v38 = vld [vmem:[%s2111_s12 + $0x70] sm:$0xff]  ;;  %v2174_v0 = vsub.s32 2, %v2155_v48  ;;  %v2177_v1 = vld [vmem:[%s2111_s12 + $0x188] sm:$0xff]  ;;  %vm478_vm8 = vcmask 72704   ;;  %vm482_vm9 = vcmask 65536  }
  0x1d   : > { %v2116_v3 = vld [vmem:[#allocation2 + $0x8] sm:$0x1]  ;;  %v321_v4 = vsel %vm320_vm2, %v2114_v2, 0.0  ;;  %v368_v40 = vpack.c.bf16 %v284_v38, %v282_v36  ;;  %v2161_v50 = vld [vmem:[%s2111_s12 + $0x180] sm:$0xff]  ;;  %s2030_s17 = smov 96   ;;  %s2031_s19 = smov 16  }
  0x1e   : > { %322 = vadd.xlane.f32.xlu0 %v321_v4  ;;  %v325_v5 = vsel %vm324_vm3, %v2116_v3, 0.0  ;;  %v352_v53 = vrot.slane %v2161_v50, %v2158_v49  ;;  %v358_v58 = vrot.slane %v2161_v50, %v2166_v54  ;;  %v373_v4 = vrot.slane %v2161_v50, %v2174_v0  ;;  %s2032_s25 = smov 80   ;;  %p1755_p8 = scmp.ne.s32.totalorder %s2004_s18, 1 }
  0x1f   : > { %384 = vmatpush1.bf16.msra.mxu0 %v364_v27  ;;  %vm1324_vm10 = vcmask (!%p1755_p8), 518144   ;;  %vm2035_vm11 = vmmov (!%p1755_p8), 0   ;;  %vm1651_vm12 = vcmask (!%p1755_p8), 51200  }
  0x20   : > { %385 = vmatprep.subr.bf16.mxu0 %v2142_v30 }
  0x22   : > { %326 = vadd.xlane.f32.xlu0 %v325_v5 }
  0x23   : > { %386 = vmatpush1.bf16.msra.mxu0 %v366_v33 }
  0x24   : > { %387 = vmatprep.subr.bf16.mxu0 %v2150_v37 }
  0x27   : > { %388 = vmatpush1.bf16.msra.mxu0 %v368_v40 }
  0x28   : > { %1792 = vmatprep.subr.bf16.mxu0 %v2023_v63 }
  0xab   : > { %v323_v6 = vpop.xlane.xlu0 %322 }
  0xac   : > { %v329_v7 = vmul.f32 0.015625, %v323_v6  ;;  %v377_v6 = vrot.slane %v2177_v1, %v2174_v0 }
  0xae   : > { %v331_v8 = vsub.f32 %v2114_v2, %v329_v7 }
  0xaf   : > { %v327_v9 = vpop.xlane.xlu0 %326 }
  0xb0   : > { %v330_v10 = vmul.f32 0.015625, %v327_v9  ;;  %v333_v11 = vmul.f32 %v331_v8, %v331_v8  ;;  %v2025_v9 = vmov 65535  }
  0xb2   : > { %v332_v12 = vsub.f32 %v2116_v3, %v330_v10  ;;  %v335_v13 = vsel %vm320_vm2, %v333_v11, 0.0  ;;  %v509_v10 = vsel %vm507_vm5, 4294967295, %v2025_v9 }
  0xb3   : > { %336 = vadd.xlane.f32.xlu1 %v335_v13  ;;  %v2189_v17 = vsel %vm508_vm6, %v509_v10, 0 }
  0xb4   : > { %v334_v14 = vmul.f32 %v332_v12, %v332_v12 }
  0xb6   : > { %v338_v15 = vsel %vm324_vm3, %v334_v14, 0.0 }
  0xb7   : > { %339 = vadd.xlane.f32.xlu1 %v338_v15 }
 0x140   : > { %v337_v41 = vpop.xlane.xlu1 %336 }
 0x141   : > { %v341_v42 = vmul.f32 0.015625, %v337_v41 }
 0x143   : > { %v343_v43 = vadd.f32 1e-05, %v341_v42 }
 0x144   : > { %v340_v44 = vpop.xlane.xlu1 %339 }
 0x145   : > { %1932 = vrsqrt.f32 %v343_v43  ;;  %v342_v46 = vmul.f32 0.015625, %v340_v44 }
 0x147   : > { %v344_v47 = vadd.f32 1e-05, %v342_v46 }
 0x149   : > { %1934 = vrsqrt.f32 %v344_v47 }
 0x14f   : > { %v1933_v51 = vpop.eup %1932 }
 0x150   : > { %v347_v52 = vmul.f32 %v1933_v51, %v331_v8 }
 0x152   : > { %v353_v57 = vmul.f32 %v352_v53, %v347_v52 }
 0x153   : > { %v1935_v55 = vpop.eup %1934 }
 0x154   : > { %v348_v56 = vmul.f32 %v1935_v55, %v332_v12  ;;  %v359_v60 = vadd.f32 %v358_v58, %v353_v57 }
 0x156   : > { %v354_v59 = vmul.f32 %v352_v53, %v348_v56 }
 0x158   : > { %v360_v61 = vadd.f32 %v358_v58, %v354_v59 }
 0x15a   : > { %v361_v62 = vpack.c.bf16 %v360_v61, %v359_v60 }
 0x15c   : > { %1741 = vmatmul.mubr.msk.bf16.vlgmr.msra.gmra.mrb[0].mxu0 %vm320_vm2, %v361_v62 }
 0x15d   : > { %1794 = vmatprep.mubr.msk.bf16.mxu0 %vm2024_vm4, %v2023_v63 }
 0x22f   : > { %v415_v5 = vpop.f32.mrb[0].mxu0 }
 0x230   : > { %v417_v7 = vpop.f32.mrb[1].mxu0  ;;  %v416_v11 = vadd.f32 %v415_v5, %v373_v4 }
 0x231   : > { %v419_v8 = vpop.f32.mrb[2].mxu0  ;;  %v418_v14 = vadd.f32 %v417_v7, %v377_v6 }
 0x232   : > { %v420_v12 = vadd.f32 %v419_v8, %v373_v4  ;;  %v421_v13 = vpop.f32.mrb[3].mxu0 }
 0x233   : > { %v422_v15 = vadd.f32 %v421_v13, %v377_v6 }
 0x234   : > { %v2187_v16 = vpack.c.bf16 %v420_v12, %v416_v11 }
 0x235   : > { %v2191_v19 = vpack.c.bf16 %v422_v15, %v418_v14 }
 0x236   : > { %558 = vrot.lane.b32.xlu1 %v2187_v16, %s2026_s13  ;;  %426 = vrot.lane.b32.xlu0 %v2187_v16, %s2027_s14 }
 0x237   : > { %v512_v20 = vand.u32 %v2189_v17, %v2191_v19 }
 0x239   : > { %1799 = vmatpush3.bf16.msra.mxu1 %v512_v20 }
 0x23a   : > { %556 = vrot.lane.b32.xlu1 %v2187_v16, %s2028_s15  ;;  %1810 = vmatprep.subr.bf16.mxu1 %v2023_v63 }
 0x2a8   : > { %v427_v21 = vpop.permute.xlu0 %426  ;;  %v559_v23 = vpop.permute.xlu1 %558 }
 0x2a9   : > { %v433_v22 = vsel %vm428_vm7, %v427_v21, 0  ;;  %v564_v25 = vsel %vm428_vm7, %v559_v23, 0 }
 0x2aa   : > { %1793 = vmatpush3.bf16.xpose.msra.mxu0 %v433_v22 }
 0x2ab   : > { %1804 = vmatprep.subr.bf16.mxu0 %v2023_v63 }
 0x2ac   : > { %v557_v26 = vpop.permute.xlu1 %556 }
 0x2b1   : > { %1795 = vmatmul.mubr.msk.bf16.vlgmr.msra.gmra.mrb[4].mxu0 %vm428_vm7, %v2187_v16 }
 0x2b2   : > { %1805 = vmatpush3.bf16.xpose.msra.mxu0 %v564_v25  ;;  %1806 = vmatprep.mubr.msk.bf16.mxu0 %vm2024_vm4, %v2023_v63 }
 0x2b3   : > { %1816 = vmatprep.subr.bf16.mxu0 %v2023_v63 }
 0x2b9   : > { %1807 = vmatmul.mubr.msk.bf16.vlgmr.msra.gmra.mrb[8].mxu0 %vm428_vm7, %v557_v26 }
 0x2ba   : > { %1818 = vmatprep.mubr.msk.bf16.mxu0 %vm2024_vm4, %v2023_v63 }
 0x384   : > { %v469_v27 = vpop.f32.mrb[4].mxu0 }
 0x385   : > { %v476_v28 = vmul.f32 0.25, %v469_v27  ;;  %v1796_v29 = vpop.f32.mrb[5].mxu0 }
 0x386   : > { %v472_v31 = vpop.f32.mrb[6].mxu0 }
 0x387   : > { %v477_v32 = vmul.f32 0.25, %v472_v31  ;;  %v1797_v33 = vpop.f32.mrb[7].mxu0  ;;  %v479_v34 = vsel %vm478_vm8, %v476_v28, -inf }
 0x388   : > { %480 = vmax.xlane.f32.xlu1 %v479_v34 }
 0x389   : > { %v483_v35 = vsel %vm482_vm9, %v477_v32, -inf }
 0x38a   : > { %484 = vmax.xlane.f32.xlu0 %v483_v35 }
 0x38c   : > { %v600_v36 = vpop.f32.mrb[8].mxu0 }
 0x38d   : > { %v607_v38 = vmul.f32 0.25, %v600_v36  ;;  %v1808_v40 = vpop.f32.mrb[9].mxu0 }
 0x38e   : > { %v603_v41 = vpop.f32.mrb[10].mxu0 }
 0x38f   : > { %v608_v42 = vmul.f32 0.25, %v603_v41  ;;  %v1809_v43 = vpop.f32.mrb[11].mxu0  ;;  %v609_v44 = vsel %vm478_vm8, %v607_v38, -inf }
 0x390   : > { %610 = vmax.xlane.f32.xlu0 %v609_v44 }
 0x391   : > { %v612_v45 = vsel %vm482_vm9, %v608_v42, -inf }
 0x394   : > { %613 = vmax.xlane.f32.xlu0 %v612_v45 }
 0x415   : > { %v481_v46 = vpop.xlane.xlu1 %480 }
 0x416   : > { %v486_v47 = vsub.f32 %v476_v28, %v481_v46 }
 0x417   : > { %v485_v51 = vpop.xlane.xlu0 %484 }
 0x418   : > { %v488_v52 = vmul.f32 1.442695, %v486_v47  ;;  %v487_v53 = vsub.f32 %v477_v32, %v485_v51 }
 0x41a   : > { %1936 = vpow2.f32 %v488_v52  ;;  %v490_v55 = vmul.f32 1.442695, %v487_v53 }
 0x41c   : > { %1938 = vpow2.f32 %v490_v55 }
 0x41d   : > { %v611_v56 = vpop.xlane.xlu0 %610 }
 0x41e   : > { %v615_v57 = vsub.f32 %v607_v38, %v611_v56 }
 0x420   : > { %v617_v58 = vmul.f32 1.442695, %v615_v57 }
 0x421   : > { %v614_v59 = vpop.xlane.xlu0 %613 }
 0x422   : > { %1940 = vpow2.f32 %v617_v58  ;;  %v616_v60 = vsub.f32 %v608_v42, %v614_v59 }
 0x424   : > { %v1937_v61 = vpop.eup %1936  ;;  %v619_v62 = vmul.f32 1.442695, %v616_v60 }
 0x425   : > { %v492_v4 = vsel %vm478_vm8, %v1937_v61, 0.0 }
 0x426   : > { %v1939_v5 = vpop.eup %1938  ;;  %1942 = vpow2.f32 %v619_v62  ;;  %493 = vadd.xlane.f32.xlu1 %v492_v4 }
 0x427   : > { %v495_v6 = vsel %vm482_vm9, %v1939_v5, 0.0 }
 0x428   : > { %496 = vadd.xlane.f32.xlu0 %v495_v6 }
 0x42c   : > { %v1941_v7 = vpop.eup %1940 }
 0x42d   : > { %v621_v8 = vsel %vm478_vm8, %v1941_v7, 0.0 }
 0x42e   : > { %622 = vadd.xlane.f32.xlu1 %v621_v8 }
 0x430   : > { %v1943_v9 = vpop.eup %1942 }
 0x431   : > { %v624_v10 = vsel %vm482_vm9, %v1943_v9, 0.0 }
 0x432   : > { %625 = vadd.xlane.f32.xlu0 %v624_v10 }
 0x43f   : > { %633 = vrot.lane.b32.xlu1 %v2191_v19, %s2028_s15 }
 0x443   : > { %781 = vrot.lane.b32.xlu1 %v2187_v16, %s2029_s16 }
 0x447   : > { %779 = vrot.lane.b32.xlu1 %v2187_v16, %s2030_s17 }
 0x448   : > { %684 = vrot.lane.b32.xlu0 %v2135_v24, %s2027_s14 }
 0x4b3   : > { %v494_v11 = vpop.xlane.xlu1 %493 }
 0x4b4   : > { %1944 = vrcp.f32 %v494_v11 }
 0x4b5   : > { %v497_v12 = vpop.xlane.xlu0 %496 }
 0x4b6   : > { %1946 = vrcp.f32 %v497_v12 }
 0x4bb   : > { %v623_v13 = vpop.xlane.xlu1 %622 }
 0x4bc   : > { %1948 = vrcp.f32 %v623_v13 }
 0x4be   : > { %v1945_v14 = vpop.eup %1944 }
 0x4bf   : > { %v626_v15 = vpop.xlane.xlu0 %625  ;;  %v634_v21 = vpop.permute.xlu1 %633  ;;  %v499_v22 = vmul.f32 %v1945_v14, %v1937_v61 }
 0x4c0   : > { %v1947_v20 = vpop.eup %1946  ;;  %1950 = vrcp.f32 %v626_v15  ;;  %v639_v26 = vand.u32 %v634_v21, %v2189_v17 }
 0x4c1   : > { %v501_v23 = vmul.f32 %v1947_v20, %v1939_v5 }
 0x4c3   : > { %v502_v25 = vpack.c.bf16 %v501_v23, %v499_v22  ;;  %v685_v32 = vpop.permute.xlu0 %684  ;;  %v782_v42 = vpop.permute.xlu1 %781 }
 0x4c4   : > { %1817 = vmatpush3.bf16.msra.mxu0 %v685_v32  ;;  %v787_v46 = vsel %vm428_vm7, %v782_v42, 0 }
 0x4c5   : > { %1801 = vmatmul.mubr.msk.bf16.vlgmr.msra.gmra.mrb[0].mxu1 %vm478_vm8, %v502_v25  ;;  %1828 = vmatprep.subr.bf16.mxu0 %v2023_v63 }
 0x4c6   : > { %1811 = vmatpush3.bf16.msra.mxu1 %v639_v26  ;;  %1812 = vmatprep.mubr.msk.bf16.mxu1 %vm2024_vm4, %v2023_v63  ;;  %v1949_v24 = vpop.eup %1948 }
 0x4c7   : > { %1822 = vmatprep.subr.bf16.mxu1 %v2023_v63  ;;  %v628_v28 = vmul.f32 %v1949_v24, %v1941_v7  ;;  %v780_v47 = vpop.permute.xlu1 %779 }
 0x4ca   : > { %v1951_v27 = vpop.eup %1950 }
 0x4cb   : > { %v630_v29 = vmul.f32 %v1951_v27, %v1943_v9 }
 0x4cd   : > { %v631_v31 = vpack.c.bf16 %v630_v29, %v628_v28 }
 0x4cf   : > { %1813 = vmatmul.mubr.msk.bf16.vlgmr.msra.gmra.mrb[4].mxu1 %vm478_vm8, %v631_v31 }
 0x4d0   : > { %1824 = vmatprep.mubr.msk.bf16.mxu1 %vm2024_vm4, %v2023_v63 }
 0x598   : > { %v548_v33 = vpop.f32.mrb[0].mxu1 }
 0x599   : > { %v1802_v34 = vpop.f32.mrb[1].mxu1 }
 0x59a   : > { %v551_v35 = vpop.f32.mrb[2].mxu1 }
 0x59b   : > { %v555_v36 = vpack.c.bf16 %v551_v35, %v548_v33  ;;  %v1803_v38 = vpop.f32.mrb[3].mxu1 }
 0x5a2   : > { %v675_v40 = vpop.f32.mrb[4].mxu1 }
 0x5a3   : > { %v1814_v41 = vpop.f32.mrb[5].mxu1 }
 0x5a4   : > { %v678_v43 = vpop.f32.mrb[6].mxu1 }
 0x5a5   : > { %v682_v44 = vpack.c.bf16 %v678_v43, %v675_v40  ;;  %v1815_v45 = vpop.f32.mrb[7].mxu1 }
 0x5a7   : > { %1819 = vmatmul.mubr.msk.bf16.vlgmr.msra.gmra.mrb[12].mxu0 %vm428_vm7, %v682_v44 }
 0x5a8   : > { %1829 = vmatpush3.bf16.xpose.msra.mxu0 %v787_v46  ;;  %1830 = vmatprep.mubr.msk.bf16.mxu0 %vm2024_vm4, %v2023_v63 }
 0x5a9   : > { %1840 = vmatprep.subr.bf16.mxu0 %v2023_v63 }
 0x5af   : > { %1831 = vmatmul.mubr.msk.bf16.vlgmr.msra.gmra.mrb[16].mxu0 %vm428_vm7, %v780_v47 }
 0x5b0   : > { %1842 = vmatprep.mubr.msk.bf16.mxu0 %vm2024_vm4, %v2023_v63 }
 0x67a   : > { %v724_v51 = vpop.f32.mrb[12].mxu0 }
 0x67b   : > { %v1820_v52 = vpop.f32.mrb[13].mxu0 }
 0x67c   : > { %v2244_v53 = vpop.f32.mrb[14].mxu0 }
 0x67d   : > { %v1821_v55 = vpop.f32.mrb[15].mxu0 }
 0x682   : > { %v823_v56 = vpop.f32.mrb[16].mxu0 }
 0x683   : > { %v830_v57 = vmul.f32 0.25, %v823_v56  ;;  %v1832_v58 = vpop.f32.mrb[17].mxu0 }
 0x684   : > { %v826_v59 = vpop.f32.mrb[18].mxu0 }
 0x685   : > { %v831_v60 = vmul.f32 0.25, %v826_v59  ;;  %v1833_v61 = vpop.f32.mrb[19].mxu0  ;;  %v832_v62 = vsel %vm478_vm8, %v830_v57, -inf }
 0x686   : > { %833 = vmax.xlane.f32.xlu1 %v832_v62 }
 0x687   : > { %v835_v4 = vsel %vm482_vm9, %v831_v60, -inf }
 0x688   : > { %836 = vmax.xlane.f32.xlu0 %v835_v4 }
 0x697   : > { %732 = vrot.lane.b32.xlu1 %v2128_v18, %s2027_s14 }
 0x69b   : > { %957 = vrot.lane.b32.xlu1 %v2187_v16, %s2031_s19 }
 0x69f   : > { %955 = vrot.lane.b32.xlu1 %v2187_v16, %s2032_s25 }
 0x713   : > { %v834_v5 = vpop.xlane.xlu1 %833 }
 0x714   : > { %v838_v6 = vsub.f32 %v830_v57, %v834_v5 }
 0x715   : > { %v837_v7 = vpop.xlane.xlu0 %836 }
 0x716   : > { %v840_v8 = vmul.f32 1.442695, %v838_v6  ;;  %v839_v9 = vsub.f32 %v831_v60, %v837_v7 }
 0x717   : > { %v733_v10 = vpop.permute.xlu1 %732 }
 0x718   : > { %1952 = vpow2.f32 %v840_v8  ;;  %v842_v11 = vmul.f32 1.442695, %v839_v9  ;;  %1823 = vmatpush3.bf16.msra.mxu1 %v733_v10 }
 0x719   : > { %1834 = vmatprep.subr.bf16.mxu1 %v2023_v63 }
 0x71a   : > { %1954 = vpow2.f32 %v842_v11 }
 0x71b   : > { %1825 = vmatmul.mubr.msk.bf16.vlgmr.msra.gmra.mrb[8].mxu1 %vm428_vm7, %v555_v36  ;;  %v958_v24 = vpop.permute.xlu1 %957 }
 0x71c   : > { %1836 = vmatprep.mubr.msk.bf16.mxu1 %vm2024_vm4, %v2023_v63  ;;  %v963_v28 = vsel %vm428_vm7, %v958_v24, 0  ;;  %v1135_v24 = vsub.s32 4, %v2155_v48 }
 0x71f   : > { %v956_v29 = vpop.permute.xlu1 %955 }
 0x722   : > { %v1953_v18 = vpop.eup %1952 }
 0x723   : > { %v844_v16 = vsel %vm478_vm8, %v1953_v18, 0.0 }
 0x724   : > { %v1955_v12 = vpop.eup %1954  ;;  %845 = vadd.xlane.f32.xlu0 %v844_v16 }
 0x725   : > { %v847_v13 = vsel %vm482_vm9, %v1955_v12, 0.0 }
 0x728   : > { %848 = vadd.xlane.f32.xlu0 %v847_v13 }
 0x73e   : > { %855 = vrot.lane.b32.xlu0 %v2191_v19, %s2030_s17 }
 0x7b1   : > { %v846_v14 = vpop.xlane.xlu0 %845 }
 0x7b2   : > { %1956 = vrcp.f32 %v846_v14 }
 0x7b5   : > { %v849_v15 = vpop.xlane.xlu0 %848 }
 0x7b6   : > { %1958 = vrcp.f32 %v849_v15 }
 0x7b9   : > { %v856_v20 = vpop.permute.xlu0 %855 }
 0x7ba   : > { %v861_v21 = vand.u32 %v856_v20, %v2189_v17 }
 0x7bc   : > { %1835 = vmatpush3.bf16.msra.mxu1 %v861_v21  ;;  %v1957_v22 = vpop.eup %1956 }
 0x7bd   : > { %1846 = vmatprep.subr.bf16.mxu1 %v2023_v63  ;;  %v851_v25 = vmul.f32 %v1957_v22, %v1953_v18 }
 0x7c0   : > { %v1959_v23 = vpop.eup %1958 }
 0x7c1   : > { %v853_v26 = vmul.f32 %v1959_v23, %v1955_v12 }
 0x7c3   : > { %v854_v27 = vpack.c.bf16 %v853_v26, %v851_v25 }
 0x7c5   : > { %1837 = vmatmul.mubr.msk.bf16.vlgmr.msra.gmra.mrb[12].mxu1 %vm478_vm8, %v854_v27 }
 0x7c6   : > { %1847 = vmatpush3.bf16.xpose.msra.mxu1 %v963_v28  ;;  %1848 = vmatprep.mubr.msk.bf16.mxu1 %vm2024_vm4, %v2023_v63 }
 0x7c7   : > { %1858 = vmatprep.subr.bf16.mxu1 %v2023_v63 }
 0x7cd   : > { %1849 = vmatmul.mubr.msk.bf16.vlgmr.msra.gmra.mrb[16].mxu1 %vm428_vm7, %v956_v29 }
 0x7ce   : > { %1860 = vmatprep.mubr.msk.bf16.mxu1 %vm2024_vm4, %v2023_v63 }
 0x7ee   : > { %v772_v31 = vpop.f32.mrb[8].mxu1 }
 0x7ef   : > { %v773_v32 = vadd.f32 %v772_v31, %v724_v51  ;;  %v1826_v33 = vpop.f32.mrb[9].mxu1 }
 0x7f0   : > { %v775_v34 = vpop.f32.mrb[10].mxu1 }
 0x7f1   : > { %v776_v35 = vadd.f32 %v775_v34, %v2244_v53  ;;  %v1827_v36 = vpop.f32.mrb[11].mxu1 }
 0x898   : > { %v897_v38 = vpop.f32.mrb[12].mxu1 }
 0x899   : > { %v1838_v40 = vpop.f32.mrb[13].mxu1 }
 0x89a   : > { %v900_v41 = vpop.f32.mrb[14].mxu1 }
 0x89b   : > { %v904_v42 = vpack.c.bf16 %v900_v41, %v897_v38  ;;  %v1839_v43 = vpop.f32.mrb[15].mxu1 }
 0x8a0   : > { %v999_v44 = vpop.f32.mrb[16].mxu1 }
 0x8a1   : > { %v1006_v45 = vmul.f32 0.25, %v999_v44  ;;  %v1850_v46 = vpop.f32.mrb[17].mxu1 }
 0x8a2   : > { %v1002_v47 = vpop.f32.mrb[18].mxu1 }
 0x8a3   : > { %v1007_v52 = vmul.f32 0.25, %v1002_v47  ;;  %v1851_v55 = vpop.f32.mrb[19].mxu1  ;;  %v1008_v56 = vsel %vm478_vm8, %v1006_v45, -inf }
 0x8a4   : > { %1009 = vmax.xlane.f32.xlu1 %v1008_v56  ;;  %v287_v56 = vld [vmem:[%s2111_s12 + $0x88] sm:$0xff] }
 0x8a5   : > { %v1011_v51 = vsel %vm482_vm9, %v1007_v52, -inf }
 0x8a6   : > { %1012 = vmax.xlane.f32.xlu0 %v1011_v51  ;;  %v289_v51 = vld [vmem:[%s2111_s12 + $0x98] sm:$0xff] }
 0x8b5   : > { %906 = vrot.lane.b32.xlu1 %v2142_v30, %s2027_s14 }
 0x8b9   : > { %1082 = vrot.lane.b32.xlu1 %v2150_v37, %s2027_s14 }
 0x931   : > { %v1010_v53 = vpop.xlane.xlu1 %1009 }
 0x932   : > { %v1014_v57 = vsub.f32 %v1006_v45, %v1010_v53  ;;  %v1179_v53 = vpack.c.bf16 %v289_v51, %v287_v56  ;;  %v311_v56 = vld [vmem:[%s2111_s12 + $0x148] sm:$0xff]  ;;  %v313_v51 = vld [vmem:[%s2111_s12 + $0x158] sm:$0xff] }
 0x933   : > { %v1013_v58 = vpop.xlane.xlu0 %1012 }
 0x934   : > { %v1016_v59 = vmul.f32 1.442695, %v1014_v57  ;;  %v1015_v60 = vsub.f32 %v1007_v52, %v1013_v58  ;;  %v286_v57 = vld [vmem:[%s2111_s12 + $0x80] sm:$0xff]  ;;  %v288_v58 = vld [vmem:[%s2111_s12 + $0x90] sm:$0xff] }
 0x935   : > { %v907_v61 = vpop.permute.xlu1 %906 }
 0x936   : > { %1960 = vpow2.f32 %v1016_v59  ;;  %v1018_v62 = vmul.f32 1.442695, %v1015_v60  ;;  %1841 = vmatpush3.bf16.msra.mxu0 %v907_v61  ;;  %v1178_v59 = vpack.c.bf16 %v288_v58, %v286_v57  ;;  %v291_v60 = vld [vmem:[%s2111_s12 + $0xa8] sm:$0xff]  ;;  %v293_v61 = vld [vmem:[%s2111_s12 + $0xb8] sm:$0xff]  ;;  %v310_v57 = vld [vmem:[%s2111_s12 + $0x140] sm:$0xff] }
 0x937   : > { %1852 = vmatprep.subr.bf16.mxu0 %v2023_v63  ;;  %v312_v58 = vld [vmem:[%s2111_s12 + $0x150] sm:$0xff] }
 0x938   : > { %1962 = vpow2.f32 %v1018_v62  ;;  %v1181_v62 = vpack.c.bf16 %v293_v61, %v291_v60  ;;  %v315_v60 = vld [vmem:[%s2111_s12 + $0x168] sm:$0xff]  ;;  %v317_v61 = vld [vmem:[%s2111_s12 + $0x178] sm:$0xff] }
 0x939   : > { %1843 = vmatmul.mubr.msk.bf16.vlgmr.msra.gmra.mrb[20].mxu0 %vm428_vm7, %v904_v42  ;;  %v1083_v6 = vpop.permute.xlu1 %1082 }
 0x93a   : > { %1854 = vmatprep.mubr.msk.bf16.mxu0 %vm2024_vm4, %v2023_v63  ;;  %1859 = vmatpush3.bf16.msra.mxu1 %v1083_v6  ;;  %v297_v6 = vld [vmem:[%s2111_s12 + $0xd8] sm:$0xff] }
 0x940   : > { %v1961_v30 = vpop.eup %1960 }
 0x941   : > { %v1020_v37 = vsel %vm478_vm8, %v1961_v30, 0.0 }
 0x942   : > { %v1963_v4 = vpop.eup %1962  ;;  %1021 = vadd.xlane.f32.xlu0 %v1020_v37  ;;  %v292_v37 = vld [vmem:[%s2111_s12 + $0xb0] sm:$0xff] }
 0x943   : > { %v1023_v5 = vsel %vm482_vm9, %v1963_v4, 0.0 }
 0x946   : > { %1024 = vadd.xlane.f32.xlu0 %v1023_v5  ;;  %v295_v5 = vld [vmem:[%s2111_s12 + $0xc8] sm:$0xff] }
 0x95c   : > { %1031 = vrot.lane.b32.xlu0 %v2191_v19, %s2032_s25 }
 0x9cf   : > { %v1022_v7 = vpop.xlane.xlu0 %1021 }
 0x9d0   : > { %1964 = vrcp.f32 %v1022_v7  ;;  %v1183_v7 = vpack.c.bf16 %v297_v6, %v295_v5  ;;  %v2350_v5 = vsub.s32 3, %v2155_v48 }
 0x9d2   : > { %v1189_v6 = vrot.slane %v2161_v50, %v2350_v5 }
 0x9d3   : > { %v1025_v8 = vpop.xlane.xlu0 %1024 }
 0x9d4   : > { %1966 = vrcp.f32 %v1025_v8  ;;  %v294_v8 = vld [vmem:[%s2111_s12 + $0xc0] sm:$0xff] }
 0x9d7   : > { %v1032_v9 = vpop.permute.xlu0 %1031 }
 0x9d8   : > { %v1037_v63 = vand.u32 %v1032_v9, %v2189_v17  ;;  %v296_v9 = vld [vmem:[%s2111_s12 + $0xd0] sm:$0xff] }
 0x9da   : > { %1853 = vmatpush3.bf16.msra.mxu0 %v1037_v63  ;;  %v1965_v10 = vpop.eup %1964  ;;  %v1182_v63 = vpack.c.bf16 %v296_v9, %v294_v8 }
 0x9db   : > { %v1027_v18 = vmul.f32 %v1965_v10, %v1961_v30  ;;  %1197 = vmatprep.subr.bf16.mxu0 %v1179_v53  ;;  %v290_v30 = vld [vmem:[%s2111_s12 + $0xa0] sm:$0xff]  ;;  %v299_v10 = vld [vmem:[%s2111_s12 + $0xe8] sm:$0xff]  ;;  %v1267_v53 = vpack.c.bf16 %v313_v51, %v311_v56 }
 0x9de   : > { %v1967_v11 = vpop.eup %1966 }
 0x9df   : > { %v1029_v16 = vmul.f32 %v1967_v11, %v1963_v4  ;;  %v1180_v4 = vpack.c.bf16 %v292_v37, %v290_v30  ;;  %v301_v11 = vld [vmem:[%s2111_s12 + $0xf8] sm:$0xff]  ;;  %v314_v30 = vld [vmem:[%s2111_s12 + $0x160] sm:$0xff]  ;;  %v316_v37 = vld [vmem:[%s2111_s12 + $0x170] sm:$0xff] }
 0x9e1   : > { %v1030_v12 = vpack.c.bf16 %v1029_v16, %v1027_v18  ;;  %v298_v18 = vld [vmem:[%s2111_s12 + $0xe0] sm:$0xff]  ;;  %v1185_v16 = vpack.c.bf16 %v301_v11, %v299_v10 }
 0x9e3   : > { %1855 = vmatmul.mubr.msk.bf16.vlgmr.msra.gmra.mrb[24].mxu0 %vm478_vm8, %v1030_v12  ;;  %v300_v12 = vld [vmem:[%s2111_s12 + $0xf0] sm:$0xff] }
 0x9e4   : > { %1229 = vmatprep.mubr.bf16.mxu0 %v2022_v39  ;;  %v1136_v39 = vrot.slane %v2161_v50, %v1135_v24  ;;  %1198 = vmatpush1.bf16.msra.mxu0 %v1178_v59  ;;  %v1266_v59 = vpack.c.bf16 %v312_v58, %v310_v57 }
 0x9e5   : > { %1199 = vmatprep.subr.bf16.mxu0 %v1181_v62  ;;  %v1269_v62 = vpack.c.bf16 %v317_v61, %v315_v60  ;;  %v1351_v60 = vld [vmem:[%s2580_s3 + $0x18] sm:$0xff] (!%p1755_p8) }
 0x9e8   : > { %1200 = vmatpush1.bf16.msra.mxu0 %v1180_v4  ;;  %v1268_v4 = vpack.c.bf16 %v316_v37, %v314_v30  ;;  %v1348_v30 = vld [vmem:[%s2580_s3] sm:$0xff] (!%p1755_p8)  ;;  %v1355_v37 = vld [vmem:[%s2580_s3 + $0x38] sm:$0xff] (!%p1755_p8) }
 0x9e9   : > { %1201 = vmatprep.subr.bf16.mxu0 %v1183_v7  ;;  %v1193_v7 = vrot.slane %v2177_v1, %v2350_v5 }
 0x9ec   : > { %1202 = vmatpush1.bf16.msra.mxu0 %v1182_v63 }
 0x9ed   : > { %1203 = vmatprep.subr.bf16.mxu0 %v1185_v16 }
 0xa0c   : > { %v946_v19 = vpop.f32.mrb[20].mxu0 }
 0xa0d   : > { %v953_v13 = vadd.f32 %v946_v19, %v773_v32  ;;  %v1844_v14 = vpop.f32.mrb[21].mxu0  ;;  %v1184_v19 = vpack.c.bf16 %v300_v12, %v298_v18 }
 0xa0e   : > { %v949_v15 = vpop.f32.mrb[22].mxu0  ;;  %v305_v14 = vld [vmem:[%s2111_s12 + $0x118] sm:$0xff] }
 0xa0f   : > { %v954_v20 = vadd.f32 %v949_v15, %v776_v35  ;;  %v1845_v21 = vpop.f32.mrb[23].mxu0  ;;  %1204 = vmatpush1.bf16.msra.mxu0 %v1184_v19  ;;  %v302_v15 = vld [vmem:[%s2111_s12 + $0x100] sm:$0xff] }
 0xa10   : > { %v304_v21 = vld [vmem:[%s2111_s12 + $0x110] sm:$0xff] }
 0xab6   : > { %v1073_v22 = vpop.f32.mrb[24].mxu0 }
 0xab7   : > { %v1856_v23 = vpop.f32.mrb[25].mxu0 }
 0xab8   : > { %v1076_v25 = vpop.f32.mrb[26].mxu0 }
 0xab9   : > { %v1080_v17 = vpack.c.bf16 %v1076_v25, %v1073_v22  ;;  %v1857_v26 = vpop.f32.mrb[27].mxu0  ;;  %v1262_v22 = vpack.c.bf16 %v304_v21, %v302_v15 }
 0xabb   : > { %1861 = vmatmul.mubr.msk.bf16.vlgmr.msra.gmra.mrb[20].mxu1 %vm428_vm7, %v1080_v17 }
 0xb8e   : > { %v1122_v27 = vpop.f32.mrb[20].mxu1 }
 0xb8f   : > { %v1129_v28 = vadd.f32 %v1122_v27, %v953_v13  ;;  %v1862_v29 = vpop.f32.mrb[21].mxu1  ;;  %v303_v13 = vld [vmem:[%s2111_s12 + $0x108] sm:$0xff] }
 0xb90   : > { %v1125_v31 = vpop.f32.mrb[22].mxu1 }
 0xb91   : > { %v1131_v32 = vadd.f32 %v1129_v28, %v2114_v2  ;;  %v1130_v33 = vadd.f32 %v1125_v31, %v954_v20  ;;  %v1863_v34 = vpop.f32.mrb[23].mxu1  ;;  %v1263_v20 = vpack.c.bf16 %v305_v14, %v303_v13  ;;  %v1173_v31 = vsub.s32 6, %v2155_v48 }
 0xb93   : > { %v2295_v35 = vadd.f32 %v1136_v39, %v1131_v32  ;;  %v1132_v36 = vadd.f32 %v1130_v33, %v2116_v3  ;;  %1274 = vmatprep.subr.bf16.mxu1 %v1263_v20 }
 0xb94   : > { %1275 = vmatpush1.bf16.xpose.msra.mxu1 %v1262_v22 }
 0xb95   : > { %v2298_v38 = vadd.f32 %v1136_v39, %v1132_v36  ;;  %v1139_v40 = vsel %vm320_vm2, %v2295_v35, 0.0  ;;  %v1167_v39 = vsub.s32 5, %v2155_v48 }
 0xb96   : > { %1140 = vadd.xlane.f32.xlu1 %v1139_v40 }
 0xb97   : > { %v1142_v41 = vsel %vm324_vm3, %v2298_v38, 0.0  ;;  %v1168_v29 = vrot.slane %v2161_v50, %v1167_v39 }
 0xb98   : > { %1143 = vadd.xlane.f32.xlu0 %v1142_v41  ;;  %v1174_v41 = vrot.slane %v2161_v50, %v1173_v31 }
 0xc23   : > { %v1141_v2 = vpop.xlane.xlu1 %1140 }
 0xc24   : > { %v1145_v42 = vmul.f32 0.015625, %v1141_v2 }
 0xc25   : > { %v1144_v43 = vpop.xlane.xlu0 %1143 }
 0xc26   : > { %v1147_v44 = vsub.f32 %v2295_v35, %v1145_v42  ;;  %v1146_v3 = vmul.f32 0.015625, %v1144_v43 }
 0xc28   : > { %v1148_v45 = vsub.f32 %v2298_v38, %v1146_v3  ;;  %v1149_v46 = vmul.f32 %v1147_v44, %v1147_v44 }
 0xc2a   : > { %v1151_v47 = vsel %vm320_vm2, %v1149_v46, 0.0  ;;  %v1150_v52 = vmul.f32 %v1148_v45, %v1148_v45  ;;  %v307_v46 = vld [vmem:[%s2111_s12 + $0x128] sm:$0xff] }
 0xc2b   : > { %1152 = vadd.xlane.f32.xlu0 %v1151_v47 }
 0xc2c   : > { %v1154_v55 = vsel %vm324_vm3, %v1150_v52, 0.0  ;;  %v306_v52 = vld [vmem:[%s2111_s12 + $0x120] sm:$0xff] }
 0xc2d   : > { %1155 = vadd.xlane.f32.xlu1 %v1154_v55 }
 0xcb8   : > { %v1153_v23 = vpop.xlane.xlu0 %1152 }
 0xcb9   : > { %v1157_v25 = vmul.f32 0.015625, %v1153_v23 }
 0xcba   : > { %v1156_v17 = vpop.xlane.xlu1 %1155 }
 0xcbb   : > { %v1159_v26 = vadd.f32 1e-05, %v1157_v25  ;;  %v1158_v27 = vmul.f32 0.015625, %v1156_v17 }
 0xcbd   : > { %1968 = vrsqrt.f32 %v1159_v26  ;;  %v1160_v28 = vadd.f32 1e-05, %v1158_v27 }
 0xcbf   : > { %1970 = vrsqrt.f32 %v1160_v28 }
 0xcc7   : > { %v1969_v32 = vpop.eup %1968 }
 0xcc8   : > { %v1163_v33 = vmul.f32 %v1969_v32, %v1147_v44  ;;  %v309_v44 = vld [vmem:[%s2111_s12 + $0x138] sm:$0xff] }
 0xcc9   : > { %v1971_v34 = vpop.eup %1970  ;;  %v1265_v47 = vpack.c.bf16 %v309_v44, %v307_v46 }
 0xcca   : > { %v1169_v36 = vmul.f32 %v1168_v29, %v1163_v33  ;;  %v1164_v40 = vmul.f32 %v1971_v34, %v1148_v45  ;;  %v308_v45 = vld [vmem:[%s2111_s12 + $0x130] sm:$0xff] }
 0xccb   : > { %v1264_v55 = vpack.c.bf16 %v308_v45, %v306_v52  ;;  %1276 = vmatprep.subr.bf16.mxu1 %v1265_v47 }
 0xccc   : > { %v1170_v2 = vmul.f32 %v1168_v29, %v1164_v40  ;;  %v1175_v42 = vadd.f32 %v1174_v41, %v1169_v36 }
 0xccd   : > { %1277 = vmatpush1.bf16.xpose.msra.mxu1 %v1264_v55 }
 0xcce   : > { %v1176_v43 = vadd.f32 %v1174_v41, %v1170_v2  ;;  %1278 = vmatprep.subr.bf16.mxu1 %v1267_v53 }
 0xcd0   : > { %v1177_v3 = vpack.c.bf16 %v1176_v43, %v1175_v42  ;;  %v1272_v42 = vsub.s32 7, %v2155_v48 }
 0xcd2   : > { %1754 = vmatmul.mubr.msk.bf16.vlgmr.msra.gmra.mrb[28].mxu0 %vm320_vm2, %v1177_v3  ;;  %v1273_v43 = vrot.slane %v2161_v50, %v1272_v42  ;;  %v1400_v42 = vld [vmem:[%s2580_s3 + $0x1a0] sm:$0xff] (!%p1755_p8) }
 0xcd5   : > { %1279 = vmatpush1.bf16.xpose.msra.mxu1 %v1266_v59  ;;  %v1356_v59 = vld [vmem:[%s2580_s3 + $0x40] sm:$0xff] (!%p1755_p8) }
 0xcd6   : > { %1280 = vmatprep.subr.bf16.mxu1 %v1269_v62  ;;  %v1358_v62 = vld [vmem:[%s2580_s3 + $0x50] sm:$0xff] (!%p1755_p8) }
 0xcdd   : > { %1281 = vmatpush1.bf16.xpose.msra.mxu1 %v1268_v4  ;;  %v1408_v4 = vpack.c.bf16 (!%p1755_p8), %v1358_v62, %v1351_v60 }
 0xcdf   : > { %1514 = vmatprep.subr.bf16.mxu1 (!%p1755_p8), %v1408_v4 }
 0xda5   : > { %v1231_v8 = vpop.f32.mrb[28].mxu0 }
 0xda6   : > { %v1232_v9 = vadd.f32 %v1231_v8, %v1189_v6  ;;  %v1233_v63 = vpop.f32.mrb[29].mxu0  ;;  %v1357_v8 = vld [vmem:[%s2580_s3 + $0x48] sm:$0xff] (!%p1755_p8) }
 0xda7   : > { %v1234_v10 = vadd.f32 %v1233_v63, %v1193_v7  ;;  %v1235_v11 = vpop.f32.mrb[30].mxu0  ;;  %v1363_v63 = vld [vmem:[%s2580_s3 + $0x78] sm:$0xff] (!%p1755_p8) }
 0xda8   : > { %v1244_v18 = vmul.f32 0.70710677, %v1232_v9  ;;  %v1236_v16 = vadd.f32 %v1235_v11, %v1189_v6  ;;  %v1237_v12 = vpop.f32.mrb[31].mxu0  ;;  %v1240_v17 = vmul.f32 0.5, %v1232_v9  ;;  %v1405_v6 = vpack.c.bf16 (!%p1755_p8), %v1355_v37, %v1348_v30  ;;  %v1365_v11 = vld [vmem:[%s2580_s3 + $0x88] sm:$0xff] (!%p1755_p8)  ;;  %v1352_v37 = vld [vmem:[%s2580_s3 + $0x20] sm:$0xff] (!%p1755_p8) }
 0xda9   : > { %v1245_v19 = vmul.f32 0.70710677, %v1234_v10  ;;  %v1238_v13 = vadd.f32 %v1237_v12, %v1193_v7  ;;  %v1241_v28 = vmul.f32 0.5, %v1234_v10  ;;  %v1350_v7 = vld [vmem:[%s2580_s3 + $0x10] sm:$0xff] (!%p1755_p8) }
 0xdaa   : > { %1972 = verf.f32 %v1244_v18  ;;  %v1246_v14 = vmul.f32 0.70710677, %v1236_v16  ;;  %v1242_v26 = vmul.f32 0.5, %v1236_v16  ;;  %v1407_v9 = vpack.c.bf16 (!%p1755_p8), %v1357_v8, %v1350_v7  ;;  %v1370_v10 = vld [vmem:[%s2580_s3 + $0xb0] sm:$0xff] (!%p1755_p8)  ;;  %v1372_v16 = vld [vmem:[%s2580_s3 + $0xc0] sm:$0xff] (!%p1755_p8)  ;;  %v1361_v8 = vld [vmem:[%s2580_s3 + $0x68] sm:$0xff] (!%p1755_p8) }
 0xdab   : > { %1974 = verf.f32 %v1245_v19  ;;  %v1247_v15 = vmul.f32 0.70710677, %v1238_v13  ;;  %v1243_v29 = vmul.f32 0.5, %v1238_v13  ;;  %v1413_v18 = vpack.c.bf16 (!%p1755_p8), %v1370_v10, %v1363_v63  ;;  %v1362_v12 = vld [vmem:[%s2580_s3 + $0x70] sm:$0xff] (!%p1755_p8)  ;;  %v1369_v19 = vld [vmem:[%s2580_s3 + $0xa8] sm:$0xff] (!%p1755_p8) }
 0xdac   : > { %1976 = verf.f32 %v1246_v14  ;;  %v1415_v13 = vpack.c.bf16 (!%p1755_p8), %v1372_v16, %v1365_v11  ;;  %v1412_v14 = vpack.c.bf16 (!%p1755_p8), %v1369_v19, %v1362_v12  ;;  %v1354_v7 = vld [vmem:[%s2580_s3 + $0x30] sm:$0xff] (!%p1755_p8)  ;;  %v1373_v19 = vld [vmem:[%s2580_s3 + $0xc8] sm:$0xff] (!%p1755_p8) }
 0xdad   : > { %1978 = verf.f32 %v1247_v15  ;;  %v1364_v15 = vld [vmem:[%s2580_s3 + $0x80] sm:$0xff] (!%p1755_p8)  ;;  %v1411_v11 = vpack.c.bf16 (!%p1755_p8), %v1361_v8, %v1354_v7 }
 0xdb4   : > { %v1973_v20 = vpop.eup %1972 }
 0xdb5   : > { %v1975_v21 = vpop.eup %1974  ;;  %v1252_v22 = vadd.f32 1.0, %v1973_v20  ;;  %v1371_v20 = vld [vmem:[%s2580_s3 + $0xb8] sm:$0xff] (!%p1755_p8) }
 0xdb6   : > { %v1977_v1 = vpop.eup %1976  ;;  %v1253_v23 = vadd.f32 1.0, %v1975_v21  ;;  %v1414_v21 = vpack.c.bf16 (!%p1755_p8), %v1371_v20, %v1364_v15  ;;  %v1381_v15 = vld [vmem:[%s2580_s3 + $0x108] sm:$0xff] (!%p1755_p8)  ;;  %v1388_v20 = vld [vmem:[%s2580_s3 + $0x140] sm:$0xff] (!%p1755_p8) }
 0xdb7   : > { %v1979_v25 = vpop.eup %1978  ;;  %v1254_v27 = vadd.f32 1.0, %v1977_v1  ;;  %v1256_v33 = vmul.f32 %v1252_v22, %v1240_v17  ;;  %v1377_v22 = vld [vmem:[%s2580_s3 + $0xe8] sm:$0xff] (!%p1755_p8)  ;;  %v1384_v1 = vld [vmem:[%s2580_s3 + $0x120] sm:$0xff] (!%p1755_p8)  ;;  %v1386_v17 = vld [vmem:[%s2580_s3 + $0x130] sm:$0xff] (!%p1755_p8) }
 0xdb8   : > { %v1255_v32 = vadd.f32 1.0, %v1979_v25  ;;  %v1257_v36 = vmul.f32 %v1253_v23, %v1241_v28  ;;  %v1379_v23 = vld [vmem:[%s2580_s3 + $0xf8] sm:$0xff] (!%p1755_p8)  ;;  %v1420_v25 = vpack.c.bf16 (!%p1755_p8), %v1384_v1, %v1377_v22  ;;  %v1380_v1 = vld [vmem:[%s2580_s3 + $0x100] sm:$0xff] (!%p1755_p8) }
 0xdb9   : > { %v1258_v34 = vmul.f32 %v1254_v27, %v1242_v26  ;;  %v1376_v26 = vld [vmem:[%s2580_s3 + $0xe0] sm:$0xff] (!%p1755_p8)  ;;  %v1383_v27 = vld [vmem:[%s2580_s3 + $0x118] sm:$0xff] (!%p1755_p8)  ;;  %v1422_v28 = vpack.c.bf16 (!%p1755_p8), %v1386_v17, %v1379_v23  ;;  %v1424_v23 = vpack.c.bf16 (!%p1755_p8), %v1388_v20, %v1381_v15  ;;  %v1382_v17 = vld [vmem:[%s2580_s3 + $0x110] sm:$0xff] (!%p1755_p8) }
 0xdba   : > { %v1259_v40 = vmul.f32 %v1255_v32, %v1243_v29  ;;  %v1419_v29 = vpack.c.bf16 (!%p1755_p8), %v1383_v27, %v1376_v26  ;;  %v1378_v32 = vld [vmem:[%s2580_s3 + $0xf0] sm:$0xff] (!%p1755_p8)  ;;  %v1389_v26 = vld [vmem:[%s2580_s3 + $0x148] sm:$0xff] (!%p1755_p8)  ;;  %v1395_v27 = vld [vmem:[%s2580_s3 + $0x178] sm:$0xff] (!%p1755_p8) }
 0xdbb   : > { %v1260_v41 = vpack.c.bf16 %v1258_v34, %v1256_v33  ;;  %v1385_v33 = vld [vmem:[%s2580_s3 + $0x128] sm:$0xff] (!%p1755_p8) }
 0xdbc   : > { %v1261_v2 = vpack.c.bf16 %v1259_v40, %v1257_v36  ;;  %v1421_v34 = vpack.c.bf16 (!%p1755_p8), %v1385_v33, %v1378_v32  ;;  %v1391_v36 = vld [vmem:[%s2580_s3 + $0x158] sm:$0xff] (!%p1755_p8)  ;;  %v1398_v40 = vld [vmem:[%s2580_s3 + $0x190] sm:$0xff] (!%p1755_p8)  ;;  %v1425_v32 = vpack.c.bf16 (!%p1755_p8), %v1389_v26, %v1382_v17 }
 0xdbd   : > { %v1394_v33 = vld [vmem:[%s2580_s3 + $0x170] sm:$0xff] (!%p1755_p8) }
 0xdbe   : > { %1306 = vmatprep.mubr.bf16.mxu1 %v1261_v2  ;;  %v1427_v2 = vpack.c.bf16 (!%p1755_p8), %v1398_v40, %v1391_v36  ;;  %v1401_v36 = vld [vmem:[%s2580_s3 + $0x1a8] sm:$0xff] (!%p1755_p8)  ;;  %v1396_v40 = vld [vmem:[%s2580_s3 + $0x180] sm:$0xff] (!%p1755_p8) }
 0xdbf   : > { %1307 = vmatmul.mubr.bf16.vlgmr.msra.gmra.mrb[24].mxu1 %v1260_v41  ;;  %v1393_v41 = vld [vmem:[%s2580_s3 + $0x168] sm:$0xff] (!%p1755_p8) }
 0xdc0   : > { %1515 = vmatpush1.bf16.msra.mxu1 (!%p1755_p8), %v1407_v9  ;;  %v1374_v9 = vld [vmem:[%s2580_s3 + $0xd0] sm:$0xff] (!%p1755_p8) }
 0xdc1   : > { %1516 = vmatprep.subr.bf16.mxu1 (!%p1755_p8), %v1415_v13  ;;  %v1368_v13 = vld [vmem:[%s2580_s3 + $0xa0] sm:$0xff] (!%p1755_p8) }
 0xdc4   : > { %1517 = vmatpush1.bf16.msra.mxu1 (!%p1755_p8), %v1414_v21 }
 0xdc5   : > { %1518 = vmatprep.subr.bf16.mxu1 (!%p1755_p8), %v1422_v28  ;;  %v1402_v28 = vld [vmem:[%s2580_s3 + $0x1b0] sm:$0xff] (!%p1755_p8) }
 0xdc8   : > { %1519 = vmatpush1.bf16.msra.mxu1 (!%p1755_p8), %v1421_v34  ;;  %v1431_v34 = vpack.c.bf16 (!%p1755_p8), %v1402_v28, %v1395_v27 }
 0xe92   : > { %v1308_v3 = vpop.f32.mrb[24].mxu1 }
 0xe93   : > { %v1309_v46 = vadd.f32 %v1308_v3, %v1273_v43  ;;  %v1310_v44 = vpop.f32.mrb[25].mxu1  ;;  %1322 = sbr.rel (%p1755_p8) target bundleno = 4284 (0x10bc), region = 48  ;;  %v1397_v3 = vld [vmem:[%s2580_s3 + $0x188] sm:$0xff] (!%p1755_p8) }
 0xe94   : > { %v1311_v47 = vpop.f32.mrb[26].mxu1  ;;  %v1429_v44 = vpack.c.bf16 (!%p1755_p8), %v1400_v42, %v1393_v41  ;;  %v1403_v41 = vld [vmem:[%s2580_s3 + $0x1b8] sm:$0xff] (!%p1755_p8) }
 0xe95   : > { %v1315_v52 = vadd.f32 %v1309_v46, %v2295_v35  ;;  %v1312_v45 = vadd.f32 %v1311_v47, %v1273_v43  ;;  %v1313_v55 = vpop.f32.mrb[27].mxu1  ;;  %v1390_v43 = vld [vmem:[%s2580_s3 + $0x150] sm:$0xff] (!%p1755_p8)  ;;  %v2033_v46 = vmov (!%p1755_p8), 0   ;;  %v1432_v42 = vpack.c.bf16 (!%p1755_p8), %v1403_v41, %v1396_v40 }
 0xe96   : > { %1505 = vmatprep.mubr.bf16.mxu0 (!%p1755_p8), %v2033_v46  ;;  %v1426_v47 = vpack.c.bf16 (!%p1755_p8), %v1397_v3, %v1390_v43  ;;  %1546 = vmatprep.mubr.bf16.mxu1 (!%p1755_p8), %v2033_v46  ;;  %v1353_v55 = vld [vmem:[%s2580_s3 + $0x28] sm:$0xff] (!%p1755_p8)  ;;  %v1433_v43 = vld [vmem:[%s2581_s4] sm:$0x7f] (!%p1755_p8) }
 0xe97   : > { %1317 = vst.msk [vmem:[#allocation2] sm:$0xff] %vm320_vm2, %v1315_v52  ;;  %v1316_v56 = vadd.f32 %v1312_v45, %v2298_v38  ;;  %v1325_v51 = vsel (!%p1755_p8), %vm1324_vm10, %v1315_v52, 0.0  ;;  %v1349_v38 = vld [vmem:[%s2580_s3 + $0x8] sm:$0xff] (!%p1755_p8)  ;;  %v1399_v45 = vld [vmem:[%s2580_s3 + $0x198] sm:$0xff] (!%p1755_p8)  ;;  %1520 = vmatprep.subr.bf16.mxu1 (!%p1755_p8), %v1429_v44  ;;  %v1438_v3 = vrot.slane (!%p1755_p8), %v1433_v43, %v2158_v49  ;;  %v1442_v44 = vrot.slane (!%p1755_p8), %v1433_v43, %v2166_v54 }
 0xe98   : > { %1326 = vadd.xlane.f32.xlu0 (!%p1755_p8), %v1325_v51  ;;  %v1406_v61 = vpack.c.bf16 (!%p1755_p8), %v1356_v59, %v1349_v38  ;;  %v1360_v51 = vld [vmem:[%s2580_s3 + $0x60] sm:$0xff] (!%p1755_p8) }
 0xe99   : > { %1318 = vst.msk [vmem:[#allocation2 + $0x8] sm:$0x1] %vm324_vm3, %v1316_v56  ;;  %v1323_v59 = vld [vmem:[%s2579_s2] sm:$0x3] (!%p1755_p8) }
 0xe9a   : > { %1473 = vmatprep.subr.bf16.mxu0 %v1406_v61  ;;  %v1341_v60 = vrot.slane %v1323_v59, %v2158_v49  ;;  %v1346_v30 = vrot.slane %v1323_v59, %v2166_v54  ;;  %v1454_v54 = vrot.slane %v1433_v43, %v1135_v24 }
 0xe9b   : > { %1474 = vmatpush1.bf16.msra.mxu0 %v1405_v6  ;;  %v1359_v6 = vld [vmem:[%s2580_s3 + $0x58] sm:$0xff] }
 0xe9c   : > { %1475 = vmatprep.subr.bf16.mxu0 %v1413_v18  ;;  %v1409_v10 = vpack.c.bf16 %v1359_v6, %v1352_v37  ;;  %v1366_v18 = vld [vmem:[%s2580_s3 + $0x90] sm:$0xff] }
 0xe9d   : > { %v1416_v21 = vpack.c.bf16 %v1373_v19, %v1366_v18 }
 0xe9f   : > { %1476 = vmatpush1.bf16.msra.mxu0 %v1412_v14  ;;  %v1375_v14 = vld [vmem:[%s2580_s3 + $0xd8] sm:$0xff] }
 0xea0   : > { %1477 = vmatprep.subr.bf16.mxu0 %v1420_v25  ;;  %v1418_v22 = vpack.c.bf16 %v1375_v14, %v1368_v13  ;;  %v1387_v25 = vld [vmem:[%s2580_s3 + $0x138] sm:$0xff] }
 0xea3   : > { %1478 = vmatpush1.bf16.msra.mxu0 %v1419_v29  ;;  %v1423_v29 = vpack.c.bf16 %v1387_v25, %v1380_v1 }
 0xea4   : > { %1479 = vmatprep.subr.bf16.mxu0 %v1427_v2  ;;  %v1430_v2 = vpack.c.bf16 %v1401_v36, %v1394_v33 }
 0xea7   : > { %1480 = vmatpush1.bf16.msra.mxu0 %v1426_v47  ;;  %v1450_v47 = vrot.slane %v1433_v43, %v2350_v5  ;;  %v1462_v5 = vrot.slane %v1433_v43, %v1173_v31 }
 0xf25   : > { %v1327_v50 = vpop.xlane.xlu0 %1326 }
 0xf26   : > { %v1328_v53 = vmul.f32 0.015625, %v1327_v50  ;;  %v1410_v50 = vpack.c.bf16 %v1360_v51, %v1353_v55 }
 0xf28   : > { %v2363_v57 = vsub.f32 %v1315_v52, %v1328_v53  ;;  %v1392_v52 = vld [vmem:[%s2580_s3 + $0x160] sm:$0xff]  ;;  %1555 = vmatprep.subr.bf16.mxu0 %v1410_v50  ;;  %v2034_v53 = vmov 0.0  }
 0xf29   : > { %v1428_v56 = vpack.c.bf16 %v1399_v45, %v1392_v52 }
 0xf2a   : > { %v1330_v35 = vmul.f32 %v2363_v57, %v2363_v57 }
 0xf2b   : > { %1521 = vmatpush1.bf16.msra.mxu1 %v1428_v56 }
 0xf2c   : > { %v1331_v58 = vsel %vm1324_vm10, %v1330_v35, 0.0  ;;  %1864 = vmatprep.subr.bf16.mxu1 %v2034_v53 }
 0xf2d   : > { %1332 = vadd.xlane.f32.xlu0 %v1331_v58 }
 0xfba   : > { %v1333_v35 = vpop.xlane.xlu0 %1332 }
 0xfbb   : > { %v1334_v58 = vmul.f32 0.015625, %v1333_v35 }
 0xfbd   : > { %v1335_v38 = vadd.f32 1e-05, %v1334_v58 }
 0xfbf   : > { %1980 = vrsqrt.f32 %v1335_v38 }
 0xfc9   : > { %v1981_v61 = vpop.eup %1980 }
 0xfca   : > { %v1337_v62 = vmul.f32 %v1981_v61, %v2363_v57  ;;  %v1367_v57 = vld [vmem:[%s2580_s3 + $0x98] sm:$0xff]  ;;  %v1458_v61 = vrot.slane %v1433_v43, %v1167_v39 }
 0xfcb   : > { %v1417_v12 = vpack.c.bf16 %v1374_v9, %v1367_v57 }
 0xfcc   : > { %v1342_v4 = vmul.f32 %v1341_v60, %v1337_v62 }
 0xfce   : > { %v1347_v63 = vadd.f32 %v1346_v30, %v1342_v4 }
 0xfd0   : > { %v1404_v16 = vpack.c.bf16 %v1347_v63, %v1347_v63 }
 0xfd2   : > { %1756 = vmatmul.mubr.msk.bf16.vlgmr.msra.gmra.mrb[0].mxu0 %vm320_vm2, %v1404_v16  ;;  %1757 = vmatmul.mubr.msk.bf16.vlgmr.msra.gmra.mrb[0].mxu1 %vm320_vm2, %v1404_v16 }
 0xfd3   : > { %1556 = vmatpush1.bf16.msra.mxu0 %v1409_v10  ;;  %1865 = vmatpush3.bf16.msra.mxu1 %v1411_v11 }
 0xfd4   : > { %1557 = vmatprep.subr.bf16.mxu0 %v1417_v12  ;;  %1866 = vmatprep.subr.bf16.mxu1 %v2034_v53 }
 0xfd5   : > { %1587 = vmatprep.mubr.bf16.mxu0 %v2033_v46  ;;  %1872 = vmatprep.mubr.msk.bf16.mxu1 %vm2035_vm11, %v2034_v53  ;;  %v1446_v46 = vrot.slane %v1433_v43, %v2174_v0 }
 0xfd7   : > { %1558 = vmatpush1.bf16.msra.mxu0 %v1416_v21  ;;  %1867 = vmatpush3.bf16.msra.mxu1 %v1418_v22 }
 0xfd8   : > { %1559 = vmatprep.subr.bf16.mxu0 %v1424_v23  ;;  %1868 = vmatprep.subr.bf16.mxu1 %v2034_v53 }
 0xfdb   : > { %1560 = vmatpush1.bf16.msra.mxu0 %v1423_v29  ;;  %1869 = vmatpush3.bf16.msra.mxu1 %v1425_v32 }
 0xfdc   : > { %1561 = vmatprep.subr.bf16.mxu0 %v1431_v34  ;;  %1870 = vmatprep.subr.bf16.mxu1 %v2034_v53 }
 0xfdf   : > { %1562 = vmatpush1.bf16.msra.mxu0 %v1430_v2  ;;  %1871 = vmatpush3.bf16.msra.mxu1 %v1432_v42 }
 0xfe2   : > { %1758 = vmatmul.mubr.msk.bf16.vlgmr.msra.gmra.mrb[4].mxu0 %vm320_vm2, %v1404_v16  ;;  %1873 = vmatmul.mubr.msk.bf16.vlgmr.msra.gmra.mrb[4].mxu1 %vm320_vm2, %v1404_v16 }
0x10a5   : > { %v1507_v52 = vpop.f32.mrb[0].mxu0  ;;  %v1548_v45 = vpop.f32.mrb[0].mxu1 }
0x10a6   : > { %v1508_v55 = vadd.f32 %v1507_v52, %v1438_v3  ;;  %v1549_v56 = vadd.f32 %v1548_v45, %v1446_v46  ;;  %v1509_v51 = vpop.f32.mrb[1].mxu0  ;;  %v1550_v50 = vpop.f32.mrb[1].mxu1 }
0x10a7   : > { %v1510_v53 = vadd.f32 %v1509_v51, %v1442_v44  ;;  %v1551_v35 = vadd.f32 %v1550_v50, %v1450_v47  ;;  %v1511_v58 = vpop.f32.mrb[2].mxu0  ;;  %v1552_v38 = vpop.f32.mrb[2].mxu1 }
0x10a8   : > { %v1512_v59 = vpop.f32.mrb[3].mxu0  ;;  %v1553_v49 = vpop.f32.mrb[3].mxu1 }
0x10a9   : > { %v1642_v60 = vcombine.low %v1508_v55, %v1510_v53  ;;  %v1643_v0 = vcombine.low %v1549_v56, %v1551_v35 }
0x10ab   : > { %1648 = vst [vmem:[%s2106_s9] sm:$0x77] %v1642_v60  ;;  %1649 = vst [vmem:[%s2106_s9 + $0x8] sm:$0x77] %v1643_v0 }
0x10b5   : > { %v1589_v62 = vpop.f32.mrb[4].mxu0  ;;  %v1630_v30 = vpop.f32.mrb[4].mxu1 }
0x10b6   : > { %v1590_v37 = vadd.f32 %v1589_v62, %v1454_v54  ;;  %v1631_v4 = vadd.f32 %v1630_v30, %v1462_v5  ;;  %v1591_v6 = vpop.f32.mrb[5].mxu0  ;;  %v1874_v7 = vpop.f32.mrb[5].mxu1 }
0x10b7   : > { %v1592_v8 = vadd.f32 %v1591_v6, %v1458_v61  ;;  %v1593_v57 = vpop.f32.mrb[6].mxu0  ;;  %v1633_v9 = vpop.f32.mrb[6].mxu1 }
0x10b8   : > { %1652 = vst.msk [vmem:[%s2106_s9 + $0x18] sm:$0x7] %vm1651_vm12, %v1631_v4  ;;  %v1594_v63 = vpop.f32.mrb[7].mxu0  ;;  %v1875_v24 = vpop.f32.mrb[7].mxu1 }
0x10b9   : > { %v1644_v10 = vcombine.low %v1590_v37, %v1592_v8 }
0x10bb   : > { %1650 = vst [vmem:[%s2106_s9 + $0x10] sm:$0x77] %v1644_v10 }
0x10bc PF: > { %s15_s22 = sadd.s32 1, %s2020_s22   ;;  %s2583_s18 = smov %s2012_s20 }
0x10bd   : > { %p12_p9 = scmp.ge.s32.totalorder %s15_s22, 6   ;;  %s2584_s19 = smov %s2016_s21 }
0x10be   : > { %s2585_s20 = smov %s2588_s23  ;;  %s2586_s21 = smov %s2592_s24 }
0x10bf   :  { %14 = sbr.rel (!%p12_p9) target bundleno = 3 (0x3), region = 81 }

// kernel: _forward.9
= control target key start
LH: loop header
LB: loop body
LE: loop exit
PB: predicated region body
PF: predicated region fallthrough
CT: control target
= control target key end

     0   :  { %s893_s18 = smov 0   ;;  %s1057_s0 = inlined_call_operand.vmem [shape: f32[6,45,3], index: 0, kind: input, shape index: {}]   ;;  %s1058_s1 = inlined_call_operand.vmem [shape: f32[6,1,3], index: 1, kind: input, shape index: {}]   ;;  %s1059_s2 = inlined_call_operand.vmem [shape: f32[6,3,192], index: 2, kind: input, shape index: {}]   ;;  %s1060_s3 = inlined_call_operand.vmem [shape: f32[6,1,640], index: 3, kind: input, shape index: {}]   ;;  %s1061_s4 = inlined_call_operand.vmem [shape: f32[6,1,640], index: 4, kind: input, shape index: {}]   ;;  %s1062_s5 = inlined_call_operand.vmem [shape: f32[6,1,3], index: 5, kind: output, shape index: {}]  }
   0x1 LB: > { %s800_s19 = sadd.s32 4294967295, %s858_s18   ;;  %p804_p0 = scmp.ge.s32.totalorder %s858_s18, 1  ;;  %s858_s18 = sphi %s893_s18, %s15_s18  }
   0x2   : > { %p223_p1 = scmp.lt.s32.totalorder %s858_s18, 7 }
   0x4   : > { %p224_p2 = pnand %p804_p0, %p223_p1 }
   0x5   : > { %p265_p3 = scmp.lt.s32.totalorder (!%p224_p2), %s800_s19, 5  ;;  %v860_v0 = vmov (!%p224_p2), 1   ;;  %v861_v1 = vmov (!%p224_p2), 0   ;;  %v862_v12 = vmov (!%p224_p2), 2   ;;  %v340_v16 = vlaneseq (!%p224_p2) }
   0x6   : > { %227 = sbr.rel (%p224_p2) target bundleno = 380 (0x17c), region = 40  ;;  %826 = vset.pattern.permute.xlu1 (!%p224_p2), %v860_v0  ;;  %825 = vset.pattern.permute.xlu0 (!%p224_p2), %v861_v1  ;;  %vm538_vm0 = vcmask (!%p224_p2), 523264   ;;  %vm690_vm1 = vcmask (!%p224_p2), 1040384   ;;  %vm559_vm2 = vcmask (!%p224_p2), 1044480   ;;  %vm561_vm3 = vcmask (!%p224_p2), 520192  }
   0x7   : > { %v912_v17 = vshrl.u32 (!%p224_p2), %v340_v16, 7 }
   0x9   : > { %v918_v18 = vsub.s32 (!%p224_p2), 1, %v912_v17  ;;  %v412_v19 = vsub.s32 (!%p224_p2), 5, %v912_v17  ;;  %v922_v22 = vsub.s32 (!%p224_p2), 0, %v912_v17  ;;  %v346_v23 = vsub.s32 (!%p224_p2), 4, %v912_v17 }
   0xa   : > { %v926_v25 = vsub.s32 (!%p224_p2), 2, %v912_v17  ;;  %v490_v26 = vsub.s32 (!%p224_p2), 6, %v912_v17 }
   0xd   : > { %s1064_s19 = smov (!%p265_p3, %s800_s19), 5 }
   0xe   : > { %s812_s20 = smul.u32 48, %s1064_s19  ;;  %s272_s23 = scalar_lea.vmem %s1058_s1, %s1064_s19 }
   0xf   : > { %v808_v2 = vld [vmem:[%s272_s23] ss:$0 sm:$0xff]  ;;  %s811_s27 = sshll.u32 %s1064_s19, 3  ;;  %s813_s6 = smul.u32 5, %s1064_s19 }
  0x10   : > { %s269_s26 = scalar_lea.vmem %s1057_s0, %s812_s20  ;;  %s277_s30 = scalar_lea.vmem %s1059_s2, %s811_s27 }
  0x11   : > { %v289_v3 = vld [vmem:[%s269_s26] sm:$0xff]  ;;  %v290_v4 = vld [vmem:[%s269_s26 + $0x8] sm:$0xff]  ;;  %v292_v6 = vld [vmem:[%s269_s26 + $0x18] sm:$0xff]  ;;  %s281_s9 = scalar_lea.vmem %s1060_s3, %s813_s6  ;;  %s285_s12 = scalar_lea.vmem %s1061_s4, %s813_s6 }
  0x12   : > { %v302_v5 = vadd.f32 %v808_v2, %v289_v3  ;;  %v303_v7 = vadd.f32 %v808_v2, %v290_v4  ;;  %v305_v8 = vadd.f32 %v808_v2, %v292_v6  ;;  %v291_v9 = vld [vmem:[%s269_s26 + $0x10] sm:$0xff]  ;;  %v294_v11 = vld [vmem:[%s269_s26 + $0x28] sm:$0x1f]  ;;  %v293_v14 = vld [vmem:[%s269_s26 + $0x20] sm:$0xff]  ;;  %s288_s15 = scalar_lea.vmem %s1062_s5, %s1064_s19 }
  0x13   : > { %v304_v10 = vadd.f32 %v808_v2, %v291_v9  ;;  %v307_v13 = vadd.f32 %v808_v2, %v294_v11  ;;  %v306_v15 = vadd.f32 %v808_v2, %v293_v14  ;;  %v308_v20 = vld [vmem:[%s277_s30] sm:$0x77] }
  0x14   : > { %383 = vperm.xlu1 %826, %v302_v5   ;;  %311 = vperm.xlu0 %825, %v302_v5   ;;  %v409_v27 = vrot.slane %v308_v20, %v918_v18  ;;  %v413_v28 = vrot.slane %v308_v20, %v412_v19  ;;  %v343_v30 = vrot.slane %v308_v20, %v922_v22 }
  0x15   : > { %v347_v31 = vrot.slane %v308_v20, %v346_v23  ;;  %v487_v33 = vrot.slane %v308_v20, %v926_v25  ;;  %v491_v34 = vrot.slane %v308_v20, %v490_v26 }
  0x16   : > { %v935_v35 = vrot.slane %v409_v27, %v918_v18  ;;  %v938_v36 = vrot.slane %v413_v28, %v918_v18  ;;  %v941_v38 = vrot.slane %v343_v30, %v922_v22  ;;  %v660_v30 = vld [vmem:[%s281_s9] sm:$0x1f] }
  0x17   : > { %v944_v39 = vrot.slane %v347_v31, %v922_v22  ;;  %v949_v43 = vrot.slane %v487_v33, %v926_v25  ;;  %v952_v44 = vrot.slane %v491_v34, %v926_v25  ;;  %v661_v31 = vld [vmem:[%s285_s12] sm:$0x1f] }
  0x18   : > { %387 = vperm.xlu1 %826, %v303_v7   ;;  %829 = vset.pattern.permute.xlu0 %v860_v0 }
  0x19   : > { %395 = vperm.xlu0 %829, %v305_v8  }
  0x1c   : > { %391 = vperm.xlu1 %826, %v304_v10  }
  0x1d   : > { %830 = vset.pattern.permute.xlu0 %v861_v1 }
  0x1e   : > { %316 = vperm.xlu0 %830, %v303_v7  }
  0x20   : > { %827 = vset.pattern.permute.xlu1 %v862_v12 }
  0x21   : > { %465 = vperm.xlu1 %827, %v303_v7  }
  0x22   : > { %321 = vperm.xlu0 %830, %v304_v10  }
  0x25   : > { %828 = vset.pattern.permute.xlu1 %v861_v1 }
  0x26   : > { %326 = vperm.xlu1 %828, %v305_v8   ;;  %336 = vperm.xlu0 %830, %v307_v13  }
  0x2a   : > { %831 = vset.pattern.permute.xlu1 %v862_v12  ;;  %833 = vset.pattern.permute.xlu0 %v862_v12 }
  0x2b   : > { %469 = vperm.xlu1 %831, %v304_v10   ;;  %461 = vperm.xlu0 %833, %v302_v5  }
  0x2f   : > { %832 = vset.pattern.permute.xlu1 %v861_v1  ;;  %473 = vperm.xlu0 %833, %v305_v8  }
  0x30   : > { %331 = vperm.xlu1 %832, %v306_v15  }
  0x34   : > { %834 = vset.pattern.permute.xlu1 %v860_v0 }
  0x35   : > { %399 = vperm.xlu1 %834, %v306_v15  }
  0x39   : > { %403 = vperm.xlu1 %834, %v307_v13  }
  0x3d   : > { %835 = vset.pattern.permute.xlu1 %v862_v12 }
  0x3e   : > { %477 = vperm.xlu1 %835, %v306_v15  }
  0x42   : > { %481 = vperm.xlu1 %835, %v307_v13  }
  0x93   : > { %v384_v21 = vpop.permute.xlu1 %383  ;;  %v312_v24 = vpop.permute.xlu0 %311 }
  0x94   : > { %v425_v55 = vsub.f32 %v384_v21, %v938_v36  ;;  %v359_v56 = vsub.f32 %v312_v24, %v944_v39  ;;  %v424_v62 = vsub.f32 %v384_v21, %v935_v35  ;;  %v358_v63 = vsub.f32 %v312_v24, %v941_v38 }
  0x96   : > { %v437_v4 = vmul.f32 %v425_v55, %v425_v55  ;;  %v371_v5 = vmul.f32 %v359_v56, %v359_v56  ;;  %v436_v12 = vmul.f32 %v424_v62, %v424_v62  ;;  %v370_v13 = vmul.f32 %v358_v63, %v358_v63 }
  0x97   : > { %v388_v29 = vpop.permute.xlu1 %387 }
  0x98   : > { %v396_v32 = vpop.permute.xlu0 %395  ;;  %v426_v40 = vsub.f32 %v388_v29, %v935_v35  ;;  %v427_v41 = vsub.f32 %v388_v29, %v938_v36  ;;  %v449_v15 = vadd.f32 %v437_v4, %v371_v5 }
  0x99   : > { %v431_v8 = vsub.f32 %v396_v32, %v938_v36  ;;  %v430_v16 = vsub.f32 %v396_v32, %v935_v35 }
  0x9a   : > { %v438_v47 = vmul.f32 %v426_v40, %v426_v40  ;;  %v439_v48 = vmul.f32 %v427_v41, %v427_v41 }
  0x9b   : > { %v392_v37 = vpop.permute.xlu1 %391  ;;  %v443_v33 = vmul.f32 %v431_v8, %v431_v8  ;;  %v442_v56 = vmul.f32 %v430_v16, %v430_v16 }
  0x9c   : > { %v429_v6 = vsub.f32 %v392_v37, %v938_v36  ;;  %v428_v19 = vsub.f32 %v392_v37, %v935_v35 }
  0x9d   : > { %v317_v42 = vpop.permute.xlu0 %316 }
  0x9e   : > { %v360_v45 = vsub.f32 %v317_v42, %v941_v38  ;;  %v361_v46 = vsub.f32 %v317_v42, %v944_v39  ;;  %v441_v20 = vmul.f32 %v429_v6, %v429_v6 }
  0xa0   : > { %v372_v49 = vmul.f32 %v360_v45, %v360_v45  ;;  %v373_v50 = vmul.f32 %v361_v46, %v361_v46  ;;  %v466_v51 = vpop.permute.xlu1 %465  ;;  %v448_v46 = vadd.f32 %v436_v12, %v370_v13 }
  0xa1   : > { %v504_v52 = vsub.f32 %v466_v51, %v949_v43  ;;  %v505_v53 = vsub.f32 %v466_v51, %v952_v44  ;;  %v322_v54 = vpop.permute.xlu0 %321 }
  0xa2   : > { %v450_v57 = vadd.f32 %v438_v47, %v372_v49  ;;  %v451_v58 = vadd.f32 %v439_v48, %v373_v50  ;;  %v363_v61 = vsub.f32 %v322_v54, %v944_v39  ;;  %v362_v9 = vsub.f32 %v322_v54, %v941_v38 }
  0xa3   : > { %v516_v59 = vmul.f32 %v504_v52, %v504_v52  ;;  %v517_v60 = vmul.f32 %v505_v53, %v505_v53  ;;  %v440_v47 = vmul.f32 %v428_v19, %v428_v19  ;;  %v662_v50 = vsub.f32 %v660_v30, %v661_v31 }
  0xa4   : > { %v375_v10 = vmul.f32 %v363_v61, %v363_v61  ;;  %v374_v34 = vmul.f32 %v362_v9, %v362_v9 }
  0xa5   : > { %v529_v0 = vadd.f32 %v517_v60, %v451_v58  ;;  %v327_v1 = vpop.permute.xlu1 %326  ;;  %v964_v2 = vpop.permute.xlu0 %336  ;;  %v966_v3 = vadd.f32 %v516_v59, %v450_v57  ;;  %v663_v6 = vmul.f32 %v662_v50, %v662_v50 }
  0xa6   : > { %v365_v14 = vsub.f32 %v327_v1, %v944_v39  ;;  %v453_v40 = vadd.f32 %v441_v20, %v375_v10  ;;  %v364_v32 = vsub.f32 %v327_v1, %v941_v38  ;;  %v452_v57 = vadd.f32 %v440_v47, %v374_v34 }
  0xa7   : > { %v970_v7 = vsel %vm538_vm0, %v529_v0, inf  ;;  %v369_v34 = vsub.f32 %v964_v2, %v944_v39 }
  0xa8   : > { %v544_v11 = vmin.f32 %v966_v3, %v970_v7  ;;  %v377_v37 = vmul.f32 %v365_v14, %v365_v14  ;;  %v376_v58 = vmul.f32 %v364_v32, %v364_v32  ;;  %v668_v14 = vrot.slane %v663_v6, %v922_v22 }
  0xaa   : > { %v470_v21 = vpop.permute.xlu1 %469  ;;  %545 = vmin.xlane.f32.xlu1 %v544_v11  ;;  %v462_v24 = vpop.permute.xlu0 %461  ;;  %v455_v60 = vadd.f32 %v443_v33, %v377_v37  ;;  %v454_v8 = vadd.f32 %v442_v56, %v376_v58  ;;  %v368_v33 = vsub.f32 %v964_v2, %v941_v38  ;;  %v684_v56 = vrot.slane %v663_v6, %v346_v23 }
  0xab   : > { %v506_v26 = vsub.f32 %v470_v21, %v949_v43  ;;  %v507_v27 = vsub.f32 %v470_v21, %v952_v44  ;;  %v502_v28 = vsub.f32 %v462_v24, %v949_v43  ;;  %v503_v29 = vsub.f32 %v462_v24, %v952_v44 }
  0xac   : > { %v380_v50 = vmul.f32 %v368_v33, %v368_v33 }
  0xad   : > { %v519_v41 = vmul.f32 %v507_v27, %v507_v27  ;;  %v514_v42 = vmul.f32 %v502_v28, %v502_v28  ;;  %v515_v45 = vmul.f32 %v503_v29, %v503_v29  ;;  %v518_v48 = vmul.f32 %v506_v26, %v506_v26 }
  0xae   : > { %v474_v49 = vpop.permute.xlu0 %473  ;;  %v676_v26 = vrot.slane %v663_v6, %v926_v25  ;;  %v679_v27 = vsub.s32 3, %v912_v17 }
  0xaf   : > { %v531_v51 = vadd.f32 %v519_v41, %v453_v40  ;;  %v527_v52 = vadd.f32 %v515_v45, %v449_v15  ;;  %v508_v53 = vsub.f32 %v474_v49, %v949_v43  ;;  %v509_v54 = vsub.f32 %v474_v49, %v952_v44  ;;  %v332_v55 = vpop.permute.xlu1 %331 }
  0xb0   : > { %v992_v59 = vadd.f32 %v514_v42, %v448_v46  ;;  %v999_v1 = vadd.f32 %v518_v48, %v452_v57  ;;  %v672_v15 = vrot.slane %v663_v6, %v918_v18  ;;  %v366_v20 = vsub.f32 %v332_v55, %v941_v38 }
  0xb1   : > { %v521_v61 = vmul.f32 %v509_v54, %v509_v54  ;;  %v995_v62 = vsel %vm538_vm0, %v527_v52, inf  ;;  %v520_v63 = vmul.f32 %v508_v53, %v508_v53  ;;  %v1002_v5 = vsel %vm538_vm0, %v531_v51, inf }
  0xb2   : > { %v540_v0 = vmin.f32 %v992_v59, %v995_v62  ;;  %v548_v10 = vmin.f32 %v999_v1, %v1002_v5  ;;  %v367_v21 = vsub.f32 %v332_v55, %v944_v39  ;;  %v691_v18 = vsel %vm690_vm1, %v668_v14, 0.0 }
  0xb3   : > { %v533_v4 = vadd.f32 %v521_v61, %v455_v60  ;;  %v1006_v11 = vadd.f32 %v520_v63, %v454_v8  ;;  %v692_v29 = vsel %vm690_vm1, %v672_v15, 0.0  ;;  %v378_v25 = vmul.f32 %v366_v20, %v366_v20 }
  0xb4   : > { %v400_v9 = vpop.permute.xlu1 %399  ;;  %541 = vmin.xlane.f32.xlu0 %v540_v0  ;;  %v379_v32 = vmul.f32 %v367_v21, %v367_v21  ;;  %v693_v41 = vadd.f32 %v692_v29, %v691_v18  ;;  %v680_v46 = vrot.slane %v663_v6, %v679_v27  ;;  %v381_v51 = vmul.f32 %v369_v34, %v369_v34 }
  0xb5   : > { %v432_v12 = vsub.f32 %v400_v9, %v935_v35  ;;  %v1010_v13 = vsel %vm538_vm0, %v533_v4, inf  ;;  %v433_v16 = vsub.f32 %v400_v9, %v938_v36  ;;  %v631_v17 = vmin.f32 %v995_v62, %v1002_v5 }
  0xb6   : > { %v552_v24 = vmin.f32 %v1006_v11, %v1010_v13  ;;  %v696_v58 = vsel %vm690_vm1, %v680_v46, 0.0  ;;  %v632_v23 = vmin.f32 %v970_v7, %v1010_v13  ;;  %v621_v6 = vmin.f32 %v966_v3, %v1006_v11 }
  0xb7   : > { %v444_v28 = vmul.f32 %v432_v12, %v432_v12  ;;  %v445_v30 = vmul.f32 %v433_v16, %v433_v16  ;;  %v698_v15 = vsel %vm690_vm1, %v684_v56, 0.0 }
  0xb8   : > { %v404_v19 = vpop.permute.xlu1 %403  ;;  %549 = vmin.xlane.f32.xlu0 %v548_v10 }
  0xb9   : > { %v434_v22 = vsub.f32 %v404_v19, %v935_v35  ;;  %v435_v31 = vsub.f32 %v404_v19, %v938_v36  ;;  %v456_v42 = vadd.f32 %v444_v28, %v378_v25  ;;  %v694_v36 = vsel %vm690_vm1, %v676_v26, 0.0 }
  0xba   : > { %v457_v47 = vadd.f32 %v445_v30, %v379_v32  ;;  %v695_v57 = vadd.f32 %v694_v36, %v693_v41 }
  0xbb   : > { %v446_v45 = vmul.f32 %v434_v22, %v434_v22  ;;  %v447_v48 = vmul.f32 %v435_v31, %v435_v31 }
  0xbc   : > { %553 = vmin.xlane.f32.xlu0 %v552_v24  ;;  %v697_v9 = vadd.f32 %v696_v58, %v695_v57 }
  0xbd   : > { %v478_v40 = vpop.permute.xlu1 %477  ;;  %v458_v55 = vadd.f32 %v446_v45, %v380_v50  ;;  %v459_v60 = vadd.f32 %v447_v48, %v381_v51 }
  0xbe   : > { %v510_v37 = vsub.f32 %v478_v40, %v949_v43  ;;  %v511_v35 = vsub.f32 %v478_v40, %v952_v44  ;;  %v699_v5 = vadd.f32 %v698_v15, %v697_v9 }
  0xc0   : > { %v522_v49 = vmul.f32 %v510_v37, %v510_v37  ;;  %v523_v38 = vmul.f32 %v511_v35, %v511_v35 }
  0xc1   : > { %v482_v39 = vpop.permute.xlu1 %481 }
  0xc2   : > { %v535_v2 = vadd.f32 %v523_v38, %v457_v47  ;;  %v512_v52 = vsub.f32 %v482_v39, %v949_v43  ;;  %v513_v53 = vsub.f32 %v482_v39, %v952_v44  ;;  %v534_v54 = vadd.f32 %v522_v49, %v456_v42 }
  0xc3   : > { %v620_v43 = vmin.f32 %v992_v59, %v999_v1 }
  0xc4   : > { %v524_v61 = vmul.f32 %v512_v52, %v512_v52  ;;  %v525_v63 = vmul.f32 %v513_v53, %v513_v53  ;;  %v555_v0 = vsel %vm538_vm0, %v535_v2, inf }
  0xc5   : > { %v556_v4 = vmin.f32 %v534_v54, %v555_v0  ;;  %v622_v10 = vmin.f32 %v620_v43, %v534_v54  ;;  %v633_v59 = vmin.f32 %v631_v17, %v555_v0 }
  0xc6   : > { %v536_v44 = vadd.f32 %v524_v61, %v458_v55  ;;  %v537_v8 = vadd.f32 %v525_v63, %v459_v60 }
  0xc7   : > { %557 = vmin.xlane.f32.xlu1 %v556_v4 }
  0xc8   : > { %v560_v12 = vsel %vm559_vm2, %v536_v44, inf  ;;  %v562_v14 = vsel %vm561_vm3, %v537_v8, inf }
  0xc9   : > { %v563_v1 = vmin.f32 %v560_v12, %v562_v14  ;;  %v623_v16 = vmin.f32 %v621_v6, %v560_v12  ;;  %v634_v19 = vmin.f32 %v632_v23, %v562_v14 }
  0xcb   : > { %v624_v20 = vmin.f32 %v622_v10, %v623_v16  ;;  %v635_v62 = vmin.f32 %v633_v59, %v634_v19  ;;  %564 = vmin.xlane.f32.xlu0 %v563_v1 }
  0xcd   : > { %v625_v7 = vrot.slane %v624_v20, 4  ;;  %v636_v13 = vrot.slane %v635_v62, 4 }
  0xcf   : > { %v626_v21 = vmin.f32 %v624_v20, %v625_v7  ;;  %v637_v24 = vmin.f32 %v635_v62, %v636_v13  ;;  %700 = vadd.xlane.f32.xlu0 %v699_v5 }
  0xd1   : > { %v627_v3 = vrot.slane %v626_v21, 2  ;;  %v638_v11 = vrot.slane %v637_v24, 2 }
  0xd3   : > { %v628_v26 = vmin.f32 %v626_v21, %v627_v3  ;;  %v639_v27 = vmin.f32 %v637_v24, %v638_v11 }
  0xd5   : > { %v629_v28 = vrot.slane %v628_v26, 1  ;;  %v640_v22 = vrot.slane %v639_v27, 1 }
  0xd7   : > { %v630_v18 = vmin.f32 %v628_v26, %v629_v28  ;;  %v641_v29 = vmin.f32 %v639_v27, %v640_v22 }
  0xd9   : > { %836 = vrsqrt.f32 %v630_v18  ;;  %vm644_vm4 = vcmp.eq.f32.partialorder %v630_v18, inf  ;;  %v647_v34 = vand.u32 2147483648, %v630_v18  ;;  %vm646_vm5 = vcmp.eq.f32.partialorder %v630_v18, 0.0 }
  0xda   : > { %838 = vrsqrt.f32 %v641_v29  ;;  %vm651_vm6 = vcmp.eq.f32.partialorder %v641_v29, inf  ;;  %v654_v32 = vand.u32 2147483648, %v641_v29  ;;  %vm653_vm7 = vcmp.eq.f32.partialorder %v641_v29, 0.0 }
  0xe3   : > { %v837_v30 = vpop.eup %836 }
  0xe4   : > { %v839_v31 = vpop.eup %838  ;;  %v643_v33 = vmul.f32 %v837_v30, %v630_v18 }
  0xe5   : > { %v650_v25 = vmul.f32 %v839_v31, %v641_v29 }
  0xe6   : > { %v645_v40 = vsel %vm644_vm4, %v630_v18, %v643_v33 }
  0xe7   : > { %v648_v37 = vsel %vm646_vm5, %v647_v34, %v645_v40  ;;  %v652_v35 = vsel %vm651_vm6, %v641_v29, %v650_v25  ;;  %vm702_vm5 = vcmask 0   ;;  %vm704_vm6 = vcmask 8200  }
  0xe8   : > { %v655_v41 = vsel %vm653_vm7, %v654_v32, %v652_v35  ;;  %vm706_vm7 = vcmask 16400  }
  0xe9   : > { %v656_v42 = vsel %vm538_vm0, %v655_v41, 0.0 }
  0xea   : > { %v657_v45 = vadd.f32 %v656_v42, %v648_v37 }
  0xec   : > { %658 = vadd.xlane.f32.xlu1 %v657_v45 }
 0x137   : > { %v546_v47 = vpop.xlane.xlu1 %545 }
 0x138   : > { %vm575_vm9 = vcmp.eq.f32.partialorder %v546_v47, inf  ;;  %v578_v61 = vand.u32 2147483648, %v546_v47  ;;  %vm577_vm13 = vcmp.eq.f32.partialorder %v546_v47, 0.0 }
 0x141   : > { %v542_v46 = vpop.xlane.xlu0 %541 }
 0x142   : > { %840 = vrsqrt.f32 %v542_v46  ;;  %vm568_vm8 = vcmp.eq.f32.partialorder %v542_v46, inf  ;;  %v571_v57 = vand.u32 2147483648, %v542_v46  ;;  %vm570_vm11 = vcmp.eq.f32.partialorder %v542_v46, 0.0 }
 0x143   : > { %842 = vrsqrt.f32 %v546_v47 }
 0x145   : > { %v550_v36 = vpop.xlane.xlu0 %549 }
 0x146   : > { %844 = vrsqrt.f32 %v550_v36  ;;  %vm582_vm10 = vcmp.eq.f32.partialorder %v550_v36, inf  ;;  %v585_v0 = vand.u32 2147483648, %v550_v36  ;;  %vm584_vm14 = vcmp.eq.f32.partialorder %v550_v36, 0.0 }
 0x149   : > { %v554_v48 = vpop.xlane.xlu0 %553 }
 0x14a   : > { %846 = vrsqrt.f32 %v554_v48  ;;  %vm589_vm12 = vcmp.eq.f32.partialorder %v554_v48, inf  ;;  %v592_v17 = vand.u32 2147483648, %v554_v48  ;;  %vm591_vm15 = vcmp.eq.f32.partialorder %v554_v48, 0.0 }
 0x14c   : > { %v841_v49 = vpop.eup %840 }
 0x14d   : > { %v843_v50 = vpop.eup %842  ;;  %v567_v39 = vmul.f32 %v841_v49, %v542_v46 }
 0x14e   : > { %v574_v53 = vmul.f32 %v843_v50, %v546_v47 }
 0x14f   : > { %v569_v55 = vsel %vm568_vm8, %v542_v46, %v567_v39 }
 0x150   : > { %v845_v51 = vpop.eup %844  ;;  %v576_v58 = vsel %vm575_vm9, %v546_v47, %v574_v53  ;;  %v572_v63 = vsel %vm570_vm11, %v571_v57, %v569_v55 }
 0x151   : > { %v581_v54 = vmul.f32 %v845_v51, %v550_v36  ;;  %v579_v44 = vsel %vm577_vm13, %v578_v61, %v576_v58 }
 0x152   : > { %v608_v6 = vadd.f32 %v579_v44, %v572_v63 }
 0x153   : > { %v583_v60 = vsel %vm582_vm10, %v550_v36, %v581_v54 }
 0x154   : > { %v558_v38 = vpop.xlane.xlu1 %557  ;;  %v847_v2 = vpop.eup %846  ;;  %v586_v8 = vsel %vm584_vm14, %v585_v0, %v583_v60 }
 0x155   : > { %848 = vrsqrt.f32 %v558_v38  ;;  %v588_v56 = vmul.f32 %v847_v2, %v554_v48  ;;  %vm596_vm0 = vcmp.eq.f32.partialorder %v558_v38, inf  ;;  %v599_v12 = vand.u32 2147483648, %v558_v38 }
 0x156   : > { %v609_v15 = vadd.f32 %v608_v6, %v586_v8  ;;  %vm598_vm1 = vcmp.eq.f32.partialorder %v558_v38, 0.0 }
 0x157   : > { %v590_v43 = vsel %vm589_vm12, %v554_v48, %v588_v56 }
 0x158   : > { %v565_v52 = vpop.xlane.xlu0 %564  ;;  %v593_v9 = vsel %vm591_vm15, %v592_v17, %v590_v43 }
 0x159   : > { %850 = vrsqrt.f32 %v565_v52  ;;  %v610_v16 = vadd.f32 %v609_v15, %v593_v9  ;;  %vm603_vm3 = vcmp.eq.f32.partialorder %v565_v52, inf  ;;  %v606_v19 = vand.u32 2147483648, %v565_v52 }
 0x15a   : > { %vm605_vm4 = vcmp.eq.f32.partialorder %v565_v52, 0.0 }
 0x15c   : > { %v701_v28 = vpop.xlane.xlu0 %700 }
 0x15f   : > { %v849_v4 = vpop.eup %848 }
 0x160   : > { %v595_v23 = vmul.f32 %v849_v4, %v558_v38 }
 0x162   : > { %v597_v10 = vsel %vm596_vm0, %v558_v38, %v595_v23 }
 0x163   : > { %v851_v14 = vpop.eup %850  ;;  %v600_v59 = vsel %vm598_vm1, %v599_v12, %v597_v10 }
 0x164   : > { %v602_v1 = vmul.f32 %v851_v14, %v565_v52  ;;  %v611_v62 = vadd.f32 %v610_v16, %v600_v59 }
 0x166   : > { %v604_v20 = vsel %vm603_vm3, %v565_v52, %v602_v1 }
 0x167   : > { %v607_v5 = vsel %vm605_vm4, %v606_v19, %v604_v20 }
 0x168   : > { %v612_v7 = vsel %vm559_vm2, %v607_v5, 0.0 }
 0x169   : > { %v613_v13 = vadd.f32 %v612_v7, %v611_v62 }
 0x16b   : > { %v614_v21 = vrot.slane %v613_v13, 4 }
 0x16d   : > { %v615_v24 = vadd.f32 %v614_v21, %v613_v13 }
 0x16f   : > { %v616_v3 = vrot.slane %v615_v24, 2 }
 0x171   : > { %v617_v11 = vadd.f32 %v616_v3, %v615_v24 }
 0x173   : > { %v618_v26 = vrot.slane %v617_v11, 1 }
 0x175   : > { %v619_v27 = vadd.f32 %v618_v26, %v617_v11 }
 0x177   : > { %703 = vst.msk [vmem:[%s288_s15] sm:$0x1] %vm702_vm5, %v619_v27 }
 0x179   : > { %v659_v22 = vpop.xlane.xlu1 %658 }
 0x17a   : > { %705 = vst.msk [vmem:[%s288_s15] sm:$0x1] %vm704_vm6, %v659_v22 }
 0x17b   : > { %707 = vst.msk [vmem:[%s288_s15] sm:$0x1] %vm706_vm7, %v701_v28 }
 0x17c PF: > { %s15_s18 = sadd.s32 1, %s858_s18  }
 0x17d   : > { %p12_p4 = scmp.ge.s32.totalorder %s15_s18, 8  }
 0x17f   :  { %14 = sbr.rel (!%p12_p4) target bundleno = 1 (0x1), region = 82 }

</bundles_post_ra>
